<compile_context>
chip_gen: v5e
topology: v5e:2x2
jax: 0.10.0
libtpu: 0.0.40
codegen_flags: <defaults>
</compile_context>

<pallas_src>
import jax
import jax.numpy as jnp
import numpy as np
from jax.experimental import pallas as pl
from jax.experimental.pallas import tpu as pltpu


def resblock3d_kernel(x_ref, bw1_ref, b1_ref, bw2_ref, b2_ref, out_ref, xs_ref):
    # x_ref  : (D, H, W*C)       bf16  unpadded input volume (batch squeezed)
    # bw*_ref: (9, W*C, W*C)     bf16  banded (block-Toeplitz over W) weights,
    #                                  BN scale + kw taps + W padding folded in
    # b*_ref : (1, W*C)          f32   BN shift, tiled over W
    # out_ref: (TD, H, W*C)      bf16  output D-tile
    # xs_ref : (TD+4, H+2, W*C)  bf16  scratch: D/H-padded input tile, later
    #                                  reused as the D/H-padded mid tile
    D, H, WC = x_ref.shape
    TD = out_ref.shape[0]
    TDM = TD + 2                     # mid rows computed per tile (1-row halo recomputed)
    dt = pl.program_id(1)
    n_d = pl.num_programs(1)
    d0 = pl.multiple_of(dt * TD, TD)

    # ---- Stage 0: build the padded input tile in VMEM (lane-dense minor dim).
    # H halo rows: full-lane zero stores, done every grid step (safe under "parallel").
    xs_ref[:, 0:1, :] = jnp.zeros((TD + 4, 1, WC), jnp.bfloat16)
    xs_ref[:, H + 1:H + 2, :] = jnp.zeros((TD + 4, 1, WC), jnp.bfloat16)
    # Interior: global input rows d0-2 .. d0+TD+1 (clamped; volume-edge rows zeroed below).
    for r in range(TD + 4):
        gc = jnp.clip(d0 + (r - 2), 0, D - 1)
        xs_ref[r:r + 1, 1:H + 1, :] = x_ref[pl.ds(gc, 1), :, :]

    @pl.when(dt == 0)
    def _():  # rows at global d = -2, -1 are conv "SAME" padding
        xs_ref[0:2, :, :] = jnp.zeros((2, H + 2, WC), jnp.bfloat16)

    @pl.when(dt == n_d - 1)
    def _():  # rows at global d = D, D+1 are conv "SAME" padding
        xs_ref[TD + 2:TD + 4, :, :] = jnp.zeros((2, H + 2, WC), jnp.bfloat16)

    def conv_banded(bw_ref, d_base, td_out):
        # 9 accumulating MXU calls; the kw taps and the W boundary are folded
        # into the banded (W*C, W*Cout) weights, so the LHS slabs stay in the
        # fused W*C lane layout (no relayout to a C-minor patch matrix).
        acc = None
        for kd in range(3):
            for kh in range(3):
                slab = xs_ref[d_base + kd:d_base + kd + td_out, kh:kh + H, :]
                p = jnp.dot(slab.reshape(td_out * H, WC), bw_ref[kd * 3 + kh],
                            preferred_element_type=jnp.float32)
                acc = p if acc is None else acc + p
        return acc

    # ---- Stage 1: conv1 -> +BN1 shift -> ReLU over TD+2 mid rows
    # (BN1 scale already folded into bw1).
    mid = jnp.maximum(conv_banded(bw1_ref, 0, TDM) + b1_ref[...], 0.0)

    # ---- Stage 2: overwrite the interior of the SAME scratch with the padded mid.
    # (conv1 above is fully evaluated before the first store below; the H halo
    #  rows zeroed in stage 0 are untouched and serve as conv2's H padding.)
    xs_ref[1:TDM + 1, 1:H + 1, :] = mid.reshape(TDM, H, WC).astype(jnp.bfloat16)

    @pl.when(dt == 0)
    def _():  # mid row at global d = -1 is conv2 padding
        xs_ref[1:2, :, :] = jnp.zeros((1, H + 2, WC), jnp.bfloat16)

    @pl.when(dt == n_d - 1)
    def _():  # mid row at global d = D is conv2 padding
        xs_ref[TDM:TDM + 1, :, :] = jnp.zeros((1, H + 2, WC), jnp.bfloat16)

    # ---- Stage 3: conv2 -> +BN2 shift -> +identity -> ReLU, fully lane-dense.
    acc2 = conv_banded(bw2_ref, 1, TD) + b2_ref[...]
    resid = x_ref[pl.ds(d0, TD), :, :].reshape(TD * H, WC).astype(jnp.float32)
    y = jnp.maximum(acc2 + resid, 0.0)
    out_ref[...] = y.reshape(TD, H, WC).astype(out_ref.dtype)


def fold_bn(gamma, beta, mean, var, eps=1e-5):
    scale = gamma / jnp.sqrt(var + eps)
    shift = beta - mean * scale
    return scale, shift


def make_banded_weight(w, scale, W):
    """w: (3,3,3,Cin,Cout); returns (9, W*Cin, W*Cout) bf16 banded weights.

    For each (kd, kh) the RHS is block-Toeplitz over W: the 3 kw taps sit on
    the (sub/super)diagonal C-blocks and the W-boundary taps are simply
    omitted, so no W padding is needed anywhere in the kernel.  BN scale is
    folded into the output channel.
    """
    w = np.asarray(w, np.float32) * np.asarray(scale, np.float32)   # fold BN scale (Cout)
    _, _, _, C, Co = w.shape
    bw = np.zeros((9, W * C, W * Co), np.float32)
    for kd in range(3):
        for kh in range(3):
            for kw in range(3):
                for wo in range(W):
                    wi = wo + kw - 1
                    if 0 <= wi < W:
                        bw[kd * 3 + kh, wi * C:(wi + 1) * C,
                           wo * Co:(wo + 1) * Co] = w[kd, kh, kw]
    return jnp.asarray(bw, jnp.bfloat16)


def resblock3d(x_ncdhw, w1, bn1, w2, bn2, eps=1e-5, td=4):
    """x_ncdhw: (N, C, D, H, W) like PyTorch; returns same layout (f32)."""
    N, C, D, H, W = x_ncdhw.shape
    assert D % td == 0 and td >= 2, "D must be divisible by td and td >= 2"
    WC = W * C
    # NCDHW -> (N, D, H, W*C): channels fused into the lane (minor) dim, bf16.
    x = jnp.transpose(x_ncdhw, (0, 2, 3, 4, 1)).reshape(N, D, H, WC)
    x = x.astype(jnp.bfloat16)

    s1, b1 = fold_bn(*bn1, eps=eps)
    s2, b2 = fold_bn(*bn2, eps=eps)
    bw1 = make_banded_weight(w1, s1, W)
    bw2 = make_banded_weight(w2, s2, W)
    b1t = jnp.tile(b1, W).reshape(1, WC).astype(jnp.float32)   # lane w*C + c -> b1[c]
    b2t = jnp.tile(b2, W).reshape(1, WC).astype(jnp.float32)

    n_d = D // td
    out = pl.pallas_call(
        resblock3d_kernel,
        out_shape=jax.ShapeDtypeStruct((N, D, H, WC), jnp.bfloat16),
        grid_spec=pltpu.PrefetchScalarGridSpec(
            num_scalar_prefetch=0,
            grid=(N, n_d),
            in_specs=[
                # Full-D input block, resident across the D-tile axis (index
                # only changes with n, so it is not re-fetched per D step).
                pl.BlockSpec((None, D, H, WC), lambda n, d: (n, 0, 0, 0)),
                pl.BlockSpec((9, WC, WC), lambda n, d: (0, 0, 0)),
                pl.BlockSpec((1, WC), lambda n, d: (0, 0)),
                pl.BlockSpec((9, WC, WC), lambda n, d: (0, 0, 0)),
                pl.BlockSpec((1, WC), lambda n, d: (0, 0)),
            ],
            out_specs=pl.BlockSpec((None, td, H, WC), lambda n, d: (n, d, 0, 0)),
            scratch_shapes=[pltpu.VMEM((td + 4, H + 2, WC), jnp.bfloat16)],
        ),
        compiler_params=pltpu.CompilerParams(
            dimension_semantics=("parallel", "parallel"),
            vmem_limit_bytes=32 * 1024 * 1024),
    )(x, bw1, b1t, bw2, b2t)

    out = out.reshape(N, D, H, W, C).astype(jnp.float32)
    return jnp.transpose(out, (0, 4, 1, 2, 3))                     # NCDHW


def reference_resblock3d(x_ncdhw, w1, bn1, w2, bn2, eps=1e-5):
    # pure-JAX f32 reference (eval-mode BN), for correctness checking only
    x = jnp.transpose(x_ncdhw, (0, 2, 3, 4, 1)).astype(jnp.float32)
    dn = ("NDHWC", "DHWIO", "NDHWC")
    s1, b1 = fold_bn(*bn1, eps=eps)
    s2, b2 = fold_bn(*bn2, eps=eps)
    c1 = jax.lax.conv_general_dilated(x, w1, (1, 1, 1), "SAME", dimension_numbers=dn)
    o1 = jnp.maximum(c1 * s1 + b1, 0.0)
    c2 = jax.lax.conv_general_dilated(o1, w2, (1, 1, 1), "SAME", dimension_numbers=dn)
    o2 = jnp.maximum(c2 * s2 + b2 + x, 0.0)
    return jnp.transpose(o2, (0, 4, 1, 2, 3))


if __name__ == "__main__":
    N, C, D, H, W = 2, 4, 8, 16, 16   # x: (N, C, D, H, W) as in PyTorch NCDHW

    key = jax.random.PRNGKey(0)
    ks = jax.random.split(key, 11)

    x = jax.random.normal(ks[0], (N, C, D, H, W), jnp.float32)

    # conv weights stored as (kd, kh, kw, Cin, Cout)
    w1 = 0.1 * jax.random.normal(ks[1], (3, 3, 3, C, C), jnp.float32)
    w2 = 0.1 * jax.random.normal(ks[2], (3, 3, 3, C, C), jnp.float32)

    # BatchNorm params: (gamma, beta, running_mean, running_var)
    bn1 = (1.0 + 0.1 * jax.random.normal(ks[3], (C,), jnp.float32),
           0.05 * jax.random.normal(ks[4], (C,), jnp.float32),
           0.1 * jax.random.normal(ks[5], (C,), jnp.float32),
           1.0 + 0.1 * jnp.abs(jax.random.normal(ks[6], (C,), jnp.float32)))
    bn2 = (1.0 + 0.1 * jax.random.normal(ks[7], (C,), jnp.float32),
           0.05 * jax.random.normal(ks[8], (C,), jnp.float32),
           0.1 * jax.random.normal(ks[9], (C,), jnp.float32),
           1.0 + 0.1 * jnp.abs(jax.random.normal(ks[10], (C,), jnp.float32)))

    out = jax.block_until_ready(resblock3d(x, w1, bn1, w2, bn2, td=4))
    ref = jax.block_until_ready(reference_resblock3d(x, w1, bn1, w2, bn2))

    # bf16 MXU / bf16 output stream vs f32 reference -> expect agreement to ~1-2%.
    np.testing.assert_allclose(np.asarray(out), np.asarray(ref),
                               rtol=5e-2, atol=5e-2)

    print("KERNEL_OK")
</pallas_src>

<mosaic_0001>
module attributes {stable_mosaic.version = 11 : i64} {
  func.func @resblock3d_kernel(%arg0: i32, %arg1: i32, %arg2: memref<1x8x16x64xbf16, #tpu.memory_space<vmem>>, %arg3: memref<9x64x64xbf16, #tpu.memory_space<vmem>>, %arg4: memref<1x64xf32, #tpu.memory_space<vmem>>, %arg5: memref<9x64x64xbf16, #tpu.memory_space<vmem>>, %arg6: memref<1x64xf32, #tpu.memory_space<vmem>>, %arg7: memref<1x4x16x64xbf16, #tpu.memory_space<vmem>>, %arg8: memref<8x18x64xbf16, #tpu.memory_space<vmem>>) attributes {dimension_semantics = [#tpu.dimension_semantics<parallel>, #tpu.dimension_semantics<parallel>], iteration_bounds = array<i64: 2, 2>, scalar_prefetch = 0 : i64, scratch_operands = 1 : i64, tpu.core_type = #tpu.core_type<tc>, window_params = [{transform_indices = @transform_0, window_bounds = array<i64: 1, 8, 16, 64>}, {pipeline_mode = #tpu.pipeline_mode<synchronous>, transform_indices = @transform_1, window_bounds = array<i64: 9, 64, 64>}, {pipeline_mode = #tpu.pipeline_mode<synchronous>, transform_indices = @transform_2, window_bounds = array<i64: 1, 64>}, {pipeline_mode = #tpu.pipeline_mode<synchronous>, transform_indices = @transform_3, window_bounds = array<i64: 9, 64, 64>}, {pipeline_mode = #tpu.pipeline_mode<synchronous>, transform_indices = @transform_4, window_bounds = array<i64: 1, 64>}, {transform_indices = @transform_5, window_bounds = array<i64: 1, 4, 16, 64>}]} {
    %c4_i32 = arith.constant 4 : i32
    %0 = arith.muli %arg1, %c4_i32 : i32
    %1 = tpu.assume_multiple %0, 4 : i32
    %cst = arith.constant 0.000000e+00 : bf16
    %2 = vector.broadcast %cst : bf16 to vector<8x1x64xbf16>
    %c0 = arith.constant 0 : index
    %c0_0 = arith.constant 0 : index
    %c0_1 = arith.constant 0 : index
    %3 = vector.load %arg8[%c0, %c0_0, %c0_1] : memref<8x18x64xbf16, #tpu.memory_space<vmem>>, vector<8x1x64xbf16>
    tpu.vector_store %arg8[%c0, %c0_0, %c0_1], %2 {strides = array<i32>} : memref<8x18x64xbf16, #tpu.memory_space<vmem>>, vector<8x1x64xbf16>,
    %cst_2 = arith.constant 0.000000e+00 : bf16
    %4 = vector.broadcast %cst_2 : bf16 to vector<8x1x64xbf16>
    %c0_3 = arith.constant 0 : index
    %c17 = arith.constant 17 : index
    %c0_4 = arith.constant 0 : index
    %5 = vector.load %arg8[%c0_3, %c17, %c0_4] : memref<8x18x64xbf16, #tpu.memory_space<vmem>>, vector<8x1x64xbf16>
    tpu.vector_store %arg8[%c0_3, %c17, %c0_4], %4 {strides = array<i32>} : memref<8x18x64xbf16, #tpu.memory_space<vmem>>, vector<8x1x64xbf16>,
    %c-2_i32 = arith.constant -2 : i32
    %6 = arith.addi %1, %c-2_i32 : i32
    %c0_i32 = arith.constant 0 : i32
    %c7_i32 = arith.constant 7 : i32
    %7 = arith.maxsi %c0_i32, %6 : i32
    %8 = arith.minsi %c7_i32, %7 : i32
    %c0_5 = arith.constant 0 : index
    %9 = arith.index_cast %8 : i32 to index
    %c0_6 = arith.constant 0 : index
    %c0_7 = arith.constant 0 : index
    %10 = vector.load %arg2[%c0_5, %9, %c0_6, %c0_7] : memref<1x8x16x64xbf16, #tpu.memory_space<vmem>>, vector<1x1x16x64xbf16>
    %11 = vector.shape_cast %10 : vector<1x1x16x64xbf16> to vector<1x16x64xbf16>
    %c0_8 = arith.constant 0 : index
    %c1 = arith.constant 1 : index
    %c0_9 = arith.constant 0 : index
    %12 = vector.load %arg8[%c0_8, %c1, %c0_9] : memref<8x18x64xbf16, #tpu.memory_space<vmem>>, vector<1x16x64xbf16>
    tpu.vector_store %arg8[%c0_8, %c1, %c0_9], %11 {strides = array<i32>} : memref<8x18x64xbf16, #tpu.memory_space<vmem>>, vector<1x16x64xbf16>,
    %c-1_i32 = arith.constant -1 : i32
    %13 = arith.addi %1, %c-1_i32 : i32
    %c0_i32_10 = arith.constant 0 : i32
    %c7_i32_11 = arith.constant 7 : i32
    %14 = arith.maxsi %c0_i32_10, %13 : i32
    %15 = arith.minsi %c7_i32_11, %14 : i32
    %c0_12 = arith.constant 0 : index
    %16 = arith.index_cast %15 : i32 to index
    %c0_13 = arith.constant 0 : index
    %c0_14 = arith.constant 0 : index
    %17 = vector.load %arg2[%c0_12, %16, %c0_13, %c0_14] : memref<1x8x16x64xbf16, #tpu.memory_space<vmem>>, vector<1x1x16x64xbf16>
    %18 = vector.shape_cast %17 : vector<1x1x16x64xbf16> to vector<1x16x64xbf16>
    %c1_15 = arith.constant 1 : index
    %c1_16 = arith.constant 1 : index
    %c0_17 = arith.constant 0 : index
    %19 = vector.load %arg8[%c1_15, %c1_16, %c0_17] : memref<8x18x64xbf16, #tpu.memory_space<vmem>>, vector<1x16x64xbf16>
    tpu.vector_store %arg8[%c1_15, %c1_16, %c0_17], %18 {strides = array<i32>} : memref<8x18x64xbf16, #tpu.memory_space<vmem>>, vector<1x16x64xbf16>,
    %c0_i32_18 = arith.constant 0 : i32
    %20 = arith.addi %1, %c0_i32_18 : i32
    %c0_i32_19 = arith.constant 0 : i32
    %c7_i32_20 = arith.constant 7 : i32
    %21 = arith.maxsi %c0_i32_19, %20 : i32
    %22 = arith.minsi %c7_i32_20, %21 : i32
    %c0_21 = arith.constant 0 : index
    %23 = arith.index_cast %22 : i32 to index
    %c0_22 = arith.constant 0 : index
    %c0_23 = arith.constant 0 : index
    %24 = vector.load %arg2[%c0_21, %23, %c0_22, %c0_23] : memref<1x8x16x64xbf16, #tpu.memory_space<vmem>>, vector<1x1x16x64xbf16>
    %25 = vector.shape_cast %24 : vector<1x1x16x64xbf16> to vector<1x16x64xbf16>
    %c2 = arith.constant 2 : index
    %c1_24 = arith.constant 1 : index
    %c0_25 = arith.constant 0 : index
    %26 = vector.load %arg8[%c2, %c1_24, %c0_25] : memref<8x18x64xbf16, #tpu.memory_space<vmem>>, vector<1x16x64xbf16>
    tpu.vector_store %arg8[%c2, %c1_24, %c0_25], %25 {strides = array<i32>} : memref<8x18x64xbf16, #tpu.memory_space<vmem>>, vector<1x16x64xbf16>,
    %c1_i32 = arith.constant 1 : i32
    %27 = arith.addi %1, %c1_i32 : i32
    %c0_i32_26 = arith.constant 0 : i32
    %c7_i32_27 = arith.constant 7 : i32
    %28 = arith.maxsi %c0_i32_26, %27 : i32
    %29 = arith.minsi %c7_i32_27, %28 : i32
    %c0_28 = arith.constant 0 : index
    %30 = arith.index_cast %29 : i32 to index
    %c0_29 = arith.constant 0 : index
    %c0_30 = arith.constant 0 : index
    %31 = vector.load %arg2[%c0_28, %30, %c0_29, %c0_30] : memref<1x8x16x64xbf16, #tpu.memory_space<vmem>>, vector<1x1x16x64xbf16>
    %32 = vector.shape_cast %31 : vector<1x1x16x64xbf16> to vector<1x16x64xbf16>
    %c3 = arith.constant 3 : index
    %c1_31 = arith.constant 1 : index
    %c0_32 = arith.constant 0 : index
    %33 = vector.load %arg8[%c3, %c1_31, %c0_32] : memref<8x18x64xbf16, #tpu.memory_space<vmem>>, vector<1x16x64xbf16>
    tpu.vector_store %arg8[%c3, %c1_31, %c0_32], %32 {strides = array<i32>} : memref<8x18x64xbf16, #tpu.memory_space<vmem>>, vector<1x16x64xbf16>,
    %c2_i32 = arith.constant 2 : i32
    %34 = arith.addi %1, %c2_i32 : i32
    %c0_i32_33 = arith.constant 0 : i32
    %c7_i32_34 = arith.constant 7 : i32
    %35 = arith.maxsi %c0_i32_33, %34 : i32
    %36 = arith.minsi %c7_i32_34, %35 : i32
    %c0_35 = arith.constant 0 : index
    %37 = arith.index_cast %36 : i32 to index
    %c0_36 = arith.constant 0 : index
    %c0_37 = arith.constant 0 : index
    %38 = vector.load %arg2[%c0_35, %37, %c0_36, %c0_37] : memref<1x8x16x64xbf16, #tpu.memory_space<vmem>>, vector<1x1x16x64xbf16>
    %39 = vector.shape_cast %38 : vector<1x1x16x64xbf16> to vector<1x16x64xbf16>
    %c4 = arith.constant 4 : index
    %c1_38 = arith.constant 1 : index
    %c0_39 = arith.constant 0 : index
    %40 = vector.load %arg8[%c4, %c1_38, %c0_39] : memref<8x18x64xbf16, #tpu.memory_space<vmem>>, vector<1x16x64xbf16>
    tpu.vector_store %arg8[%c4, %c1_38, %c0_39], %39 {strides = array<i32>} : memref<8x18x64xbf16, #tpu.memory_space<vmem>>, vector<1x16x64xbf16>,
    %c3_i32 = arith.constant 3 : i32
    %41 = arith.addi %1, %c3_i32 : i32
    %c0_i32_40 = arith.constant 0 : i32
    %c7_i32_41 = arith.constant 7 : i32
    %42 = arith.maxsi %c0_i32_40, %41 : i32
    %43 = arith.minsi %c7_i32_41, %42 : i32
    %c0_42 = arith.constant 0 : index
    %44 = arith.index_cast %43 : i32 to index
    %c0_43 = arith.constant 0 : index
    %c0_44 = arith.constant 0 : index
    %45 = vector.load %arg2[%c0_42, %44, %c0_43, %c0_44] : memref<1x8x16x64xbf16, #tpu.memory_space<vmem>>, vector<1x1x16x64xbf16>
    %46 = vector.shape_cast %45 : vector<1x1x16x64xbf16> to vector<1x16x64xbf16>
    %c5 = arith.constant 5 : index
    %c1_45 = arith.constant 1 : index
    %c0_46 = arith.constant 0 : index
    %47 = vector.load %arg8[%c5, %c1_45, %c0_46] : memref<8x18x64xbf16, #tpu.memory_space<vmem>>, vector<1x16x64xbf16>
    tpu.vector_store %arg8[%c5, %c1_45, %c0_46], %46 {strides = array<i32>} : memref<8x18x64xbf16, #tpu.memory_space<vmem>>, vector<1x16x64xbf16>,
    %c4_i32_47 = arith.constant 4 : i32
    %48 = arith.addi %1, %c4_i32_47 : i32
    %c0_i32_48 = arith.constant 0 : i32
    %c7_i32_49 = arith.constant 7 : i32
    %49 = arith.maxsi %c0_i32_48, %48 : i32
    %50 = arith.minsi %c7_i32_49, %49 : i32
    %c0_50 = arith.constant 0 : index
    %51 = arith.index_cast %50 : i32 to index
    %c0_51 = arith.constant 0 : index
    %c0_52 = arith.constant 0 : index
    %52 = vector.load %arg2[%c0_50, %51, %c0_51, %c0_52] : memref<1x8x16x64xbf16, #tpu.memory_space<vmem>>, vector<1x1x16x64xbf16>
    %53 = vector.shape_cast %52 : vector<1x1x16x64xbf16> to vector<1x16x64xbf16>
    %c6 = arith.constant 6 : index
    %c1_53 = arith.constant 1 : index
    %c0_54 = arith.constant 0 : index
    %54 = vector.load %arg8[%c6, %c1_53, %c0_54] : memref<8x18x64xbf16, #tpu.memory_space<vmem>>, vector<1x16x64xbf16>
    tpu.vector_store %arg8[%c6, %c1_53, %c0_54], %53 {strides = array<i32>} : memref<8x18x64xbf16, #tpu.memory_space<vmem>>, vector<1x16x64xbf16>,
    %c5_i32 = arith.constant 5 : i32
    %55 = arith.addi %1, %c5_i32 : i32
    %c0_i32_55 = arith.constant 0 : i32
    %c7_i32_56 = arith.constant 7 : i32
    %56 = arith.maxsi %c0_i32_55, %55 : i32
    %57 = arith.minsi %c7_i32_56, %56 : i32
    %c0_57 = arith.constant 0 : index
    %58 = arith.index_cast %57 : i32 to index
    %c0_58 = arith.constant 0 : index
    %c0_59 = arith.constant 0 : index
    %59 = vector.load %arg2[%c0_57, %58, %c0_58, %c0_59] : memref<1x8x16x64xbf16, #tpu.memory_space<vmem>>, vector<1x1x16x64xbf16>
    %60 = vector.shape_cast %59 : vector<1x1x16x64xbf16> to vector<1x16x64xbf16>
    %c7 = arith.constant 7 : index
    %c1_60 = arith.constant 1 : index
    %c0_61 = arith.constant 0 : index
    %61 = vector.load %arg8[%c7, %c1_60, %c0_61] : memref<8x18x64xbf16, #tpu.memory_space<vmem>>, vector<1x16x64xbf16>
    tpu.vector_store %arg8[%c7, %c1_60, %c0_61], %60 {strides = array<i32>} : memref<8x18x64xbf16, #tpu.memory_space<vmem>>, vector<1x16x64xbf16>,
    %c0_i32_62 = arith.constant 0 : i32
    %62 = arith.cmpi eq, %arg1, %c0_i32_62 : i32
    %63 = arith.extui %62 : i1 to i32
    %c0_i32_63 = arith.constant 0 : i32
    %64 = arith.cmpi ne, %63, %c0_i32_63 : i32
    scf.if %64 {
      %cst_211 = arith.constant 0.000000e+00 : bf16
      %204 = vector.broadcast %cst_211 : bf16 to vector<2x18x64xbf16>
      %c0_212 = arith.constant 0 : index
      %c0_213 = arith.constant 0 : index
      %c0_214 = arith.constant 0 : index
      %205 = vector.load %arg8[%c0_212, %c0_213, %c0_214] : memref<8x18x64xbf16, #tpu.memory_space<vmem>>, vector<2x18x64xbf16>
      tpu.vector_store %arg8[%c0_212, %c0_213, %c0_214], %204 {strides = array<i32>} : memref<8x18x64xbf16, #tpu.memory_space<vmem>>, vector<2x18x64xbf16>,
    } else {
    }
    %c1_i32_64 = arith.constant 1 : i32
    %65 = arith.cmpi eq, %arg1, %c1_i32_64 : i32
    %66 = arith.extui %65 : i1 to i32
    %c0_i32_65 = arith.constant 0 : i32
    %67 = arith.cmpi ne, %66, %c0_i32_65 : i32
    scf.if %67 {
      %cst_211 = arith.constant 0.000000e+00 : bf16
      %204 = vector.broadcast %cst_211 : bf16 to vector<2x18x64xbf16>
      %c6_212 = arith.constant 6 : index
      %c0_213 = arith.constant 0 : index
      %c0_214 = arith.constant 0 : index
      %205 = vector.load %arg8[%c6_212, %c0_213, %c0_214] : memref<8x18x64xbf16, #tpu.memory_space<vmem>>, vector<2x18x64xbf16>
      tpu.vector_store %arg8[%c6_212, %c0_213, %c0_214], %204 {strides = array<i32>} : memref<8x18x64xbf16, #tpu.memory_space<vmem>>, vector<2x18x64xbf16>,
    } else {
    }
    %c0_66 = arith.constant 0 : index
    %c0_67 = arith.constant 0 : index
    %c0_68 = arith.constant 0 : index
    %68 = vector.load %arg8[%c0_66, %c0_67, %c0_68] : memref<8x18x64xbf16, #tpu.memory_space<vmem>>, vector<6x16x64xbf16>
    %69 = vector.shape_cast %68 : vector<6x16x64xbf16> to vector<96x64xbf16>
    %c0_69 = arith.constant 0 : index
    %c0_70 = arith.constant 0 : index
    %c0_71 = arith.constant 0 : index
    %70 = vector.load %arg3[%c0_69, %c0_70, %c0_71] : memref<9x64x64xbf16, #tpu.memory_space<vmem>>, vector<1x64x64xbf16>
    %71 = vector.shape_cast %70 : vector<1x64x64xbf16> to vector<64x64xbf16>
    %cst_72 = arith.constant dense<0.000000e+00> : vector<96x64xf32>
    %72 = tpu.matmul %69, %71, %cst_72 {dimension_numbers = #tpu.dot_dimension_numbers<[1], [0], [0], [1], [0, 0, 1, 1], [], []>} : vector<96x64xbf16>, vector<64x64xbf16>, vector<96x64xf32> -> vector<96x64xf32>
    %c0_73 = arith.constant 0 : index
    %c1_74 = arith.constant 1 : index
    %c0_75 = arith.constant 0 : index
    %73 = vector.load %arg8[%c0_73, %c1_74, %c0_75] : memref<8x18x64xbf16, #tpu.memory_space<vmem>>, vector<6x16x64xbf16>
    %74 = vector.shape_cast %73 : vector<6x16x64xbf16> to vector<96x64xbf16>
    %c1_76 = arith.constant 1 : index
    %c0_77 = arith.constant 0 : index
    %c0_78 = arith.constant 0 : index
    %75 = vector.load %arg3[%c1_76, %c0_77, %c0_78] : memref<9x64x64xbf16, #tpu.memory_space<vmem>>, vector<1x64x64xbf16>
    %76 = vector.shape_cast %75 : vector<1x64x64xbf16> to vector<64x64xbf16>
    %cst_79 = arith.constant dense<0.000000e+00> : vector<96x64xf32>
    %77 = tpu.matmul %74, %76, %cst_79 {dimension_numbers = #tpu.dot_dimension_numbers<[1], [0], [0], [1], [0, 0, 1, 1], [], []>} : vector<96x64xbf16>, vector<64x64xbf16>, vector<96x64xf32> -> vector<96x64xf32>
    %78 = arith.addf %72, %77 : vector<96x64xf32>
    %c0_80 = arith.constant 0 : index
    %c2_81 = arith.constant 2 : index
    %c0_82 = arith.constant 0 : index
    %79 = vector.load %arg8[%c0_80, %c2_81, %c0_82] : memref<8x18x64xbf16, #tpu.memory_space<vmem>>, vector<6x16x64xbf16>
    %80 = vector.shape_cast %79 : vector<6x16x64xbf16> to vector<96x64xbf16>
    %c2_83 = arith.constant 2 : index
    %c0_84 = arith.constant 0 : index
    %c0_85 = arith.constant 0 : index
    %81 = vector.load %arg3[%c2_83, %c0_84, %c0_85] : memref<9x64x64xbf16, #tpu.memory_space<vmem>>, vector<1x64x64xbf16>
    %82 = vector.shape_cast %81 : vector<1x64x64xbf16> to vector<64x64xbf16>
    %cst_86 = arith.constant dense<0.000000e+00> : vector<96x64xf32>
    %83 = tpu.matmul %80, %82, %cst_86 {dimension_numbers = #tpu.dot_dimension_numbers<[1], [0], [0], [1], [0, 0, 1, 1], [], []>} : vector<96x64xbf16>, vector<64x64xbf16>, vector<96x64xf32> -> vector<96x64xf32>
    %84 = arith.addf %78, %83 : vector<96x64xf32>
    %c1_87 = arith.constant 1 : index
    %c0_88 = arith.constant 0 : index
    %c0_89 = arith.constant 0 : index
    %85 = vector.load %arg8[%c1_87, %c0_88, %c0_89] : memref<8x18x64xbf16, #tpu.memory_space<vmem>>, vector<6x16x64xbf16>
    %86 = vector.shape_cast %85 : vector<6x16x64xbf16> to vector<96x64xbf16>
    %c3_90 = arith.constant 3 : index
    %c0_91 = arith.constant 0 : index
    %c0_92 = arith.constant 0 : index
    %87 = vector.load %arg3[%c3_90, %c0_91, %c0_92] : memref<9x64x64xbf16, #tpu.memory_space<vmem>>, vector<1x64x64xbf16>
    %88 = vector.shape_cast %87 : vector<1x64x64xbf16> to vector<64x64xbf16>
    %cst_93 = arith.constant dense<0.000000e+00> : vector<96x64xf32>
    %89 = tpu.matmul %86, %88, %cst_93 {dimension_numbers = #tpu.dot_dimension_numbers<[1], [0], [0], [1], [0, 0, 1, 1], [], []>} : vector<96x64xbf16>, vector<64x64xbf16>, vector<96x64xf32> -> vector<96x64xf32>
    %90 = arith.addf %84, %89 : vector<96x64xf32>
    %c1_94 = arith.constant 1 : index
    %c1_95 = arith.constant 1 : index
    %c0_96 = arith.constant 0 : index
    %91 = vector.load %arg8[%c1_94, %c1_95, %c0_96] : memref<8x18x64xbf16, #tpu.memory_space<vmem>>, vector<6x16x64xbf16>
    %92 = vector.shape_cast %91 : vector<6x16x64xbf16> to vector<96x64xbf16>
    %c4_97 = arith.constant 4 : index
    %c0_98 = arith.constant 0 : index
    %c0_99 = arith.constant 0 : index
    %93 = vector.load %arg3[%c4_97, %c0_98, %c0_99] : memref<9x64x64xbf16, #tpu.memory_space<vmem>>, vector<1x64x64xbf16>
    %94 = vector.shape_cast %93 : vector<1x64x64xbf16> to vector<64x64xbf16>
    %cst_100 = arith.constant dense<0.000000e+00> : vector<96x64xf32>
    %95 = tpu.matmul %92, %94, %cst_100 {dimension_numbers = #tpu.dot_dimension_numbers<[1], [0], [0], [1], [0, 0, 1, 1], [], []>} : vector<96x64xbf16>, vector<64x64xbf16>, vector<96x64xf32> -> vector<96x64xf32>
    %96 = arith.addf %90, %95 : vector<96x64xf32>
    %c1_101 = arith.constant 1 : index
    %c2_102 = arith.constant 2 : index
    %c0_103 = arith.constant 0 : index
    %97 = vector.load %arg8[%c1_101, %c2_102, %c0_103] : memref<8x18x64xbf16, #tpu.memory_space<vmem>>, vector<6x16x64xbf16>
    %98 = vector.shape_cast %97 : vector<6x16x64xbf16> to vector<96x64xbf16>
    %c5_104 = arith.constant 5 : index
    %c0_105 = arith.constant 0 : index
    %c0_106 = arith.constant 0 : index
    %99 = vector.load %arg3[%c5_104, %c0_105, %c0_106] : memref<9x64x64xbf16, #tpu.memory_space<vmem>>, vector<1x64x64xbf16>
    %100 = vector.shape_cast %99 : vector<1x64x64xbf16> to vector<64x64xbf16>
    %cst_107 = arith.constant dense<0.000000e+00> : vector<96x64xf32>
    %101 = tpu.matmul %98, %100, %cst_107 {dimension_numbers = #tpu.dot_dimension_numbers<[1], [0], [0], [1], [0, 0, 1, 1], [], []>} : vector<96x64xbf16>, vector<64x64xbf16>, vector<96x64xf32> -> vector<96x64xf32>
    %102 = arith.addf %96, %101 : vector<96x64xf32>
    %c2_108 = arith.constant 2 : index
    %c0_109 = arith.constant 0 : index
    %c0_110 = arith.constant 0 : index
    %103 = vector.load %arg8[%c2_108, %c0_109, %c0_110] : memref<8x18x64xbf16, #tpu.memory_space<vmem>>, vector<6x16x64xbf16>
    %104 = vector.shape_cast %103 : vector<6x16x64xbf16> to vector<96x64xbf16>
    %c6_111 = arith.constant 6 : index
    %c0_112 = arith.constant 0 : index
    %c0_113 = arith.constant 0 : index
    %105 = vector.load %arg3[%c6_111, %c0_112, %c0_113] : memref<9x64x64xbf16, #tpu.memory_space<vmem>>, vector<1x64x64xbf16>
    %106 = vector.shape_cast %105 : vector<1x64x64xbf16> to vector<64x64xbf16>
    %cst_114 = arith.constant dense<0.000000e+00> : vector<96x64xf32>
    %107 = tpu.matmul %104, %106, %cst_114 {dimension_numbers = #tpu.dot_dimension_numbers<[1], [0], [0], [1], [0, 0, 1, 1], [], []>} : vector<96x64xbf16>, vector<64x64xbf16>, vector<96x64xf32> -> vector<96x64xf32>
    %108 = arith.addf %102, %107 : vector<96x64xf32>
    %c2_115 = arith.constant 2 : index
    %c1_116 = arith.constant 1 : index
    %c0_117 = arith.constant 0 : index
    %109 = vector.load %arg8[%c2_115, %c1_116, %c0_117] : memref<8x18x64xbf16, #tpu.memory_space<vmem>>, vector<6x16x64xbf16>
    %110 = vector.shape_cast %109 : vector<6x16x64xbf16> to vector<96x64xbf16>
    %c7_118 = arith.constant 7 : index
    %c0_119 = arith.constant 0 : index
    %c0_120 = arith.constant 0 : index
    %111 = vector.load %arg3[%c7_118, %c0_119, %c0_120] : memref<9x64x64xbf16, #tpu.memory_space<vmem>>, vector<1x64x64xbf16>
    %112 = vector.shape_cast %111 : vector<1x64x64xbf16> to vector<64x64xbf16>
    %cst_121 = arith.constant dense<0.000000e+00> : vector<96x64xf32>
    %113 = tpu.matmul %110, %112, %cst_121 {dimension_numbers = #tpu.dot_dimension_numbers<[1], [0], [0], [1], [0, 0, 1, 1], [], []>} : vector<96x64xbf16>, vector<64x64xbf16>, vector<96x64xf32> -> vector<96x64xf32>
    %114 = arith.addf %108, %113 : vector<96x64xf32>
    %c2_122 = arith.constant 2 : index
    %c2_123 = arith.constant 2 : index
    %c0_124 = arith.constant 0 : index
    %115 = vector.load %arg8[%c2_122, %c2_123, %c0_124] : memref<8x18x64xbf16, #tpu.memory_space<vmem>>, vector<6x16x64xbf16>
    %116 = vector.shape_cast %115 : vector<6x16x64xbf16> to vector<96x64xbf16>
    %c8 = arith.constant 8 : index
    %c0_125 = arith.constant 0 : index
    %c0_126 = arith.constant 0 : index
    %117 = vector.load %arg3[%c8, %c0_125, %c0_126] : memref<9x64x64xbf16, #tpu.memory_space<vmem>>, vector<1x64x64xbf16>
    %118 = vector.shape_cast %117 : vector<1x64x64xbf16> to vector<64x64xbf16>
    %cst_127 = arith.constant dense<0.000000e+00> : vector<96x64xf32>
    %119 = tpu.matmul %116, %118, %cst_127 {dimension_numbers = #tpu.dot_dimension_numbers<[1], [0], [0], [1], [0, 0, 1, 1], [], []>} : vector<96x64xbf16>, vector<64x64xbf16>, vector<96x64xf32> -> vector<96x64xf32>
    %120 = arith.addf %114, %119 : vector<96x64xf32>
    %c0_128 = arith.constant 0 : index
    %c0_129 = arith.constant 0 : index
    %121 = vector.load %arg4[%c0_128, %c0_129] : memref<1x64xf32, #tpu.memory_space<vmem>>, vector<1x64xf32>
    %122 = vector.broadcast %121 : vector<1x64xf32> to vector<96x64xf32>
    %123 = arith.addf %120, %122 : vector<96x64xf32>
    %cst_130 = arith.constant 0.000000e+00 : f32
    %124 = vector.broadcast %cst_130 : f32 to vector<96x64xf32>
    %125 = arith.maximumf %123, %124 : vector<96x64xf32>
    %126 = vector.shape_cast %125 : vector<96x64xf32> to vector<6x16x64xf32>
    %127 = arith.truncf %126 : vector<6x16x64xf32> to vector<6x16x64xbf16>
    %c1_131 = arith.constant 1 : index
    %c1_132 = arith.constant 1 : index
    %c0_133 = arith.constant 0 : index
    %128 = vector.load %arg8[%c1_131, %c1_132, %c0_133] : memref<8x18x64xbf16, #tpu.memory_space<vmem>>, vector<6x16x64xbf16>
    tpu.vector_store %arg8[%c1_131, %c1_132, %c0_133], %127 {strides = array<i32>} : memref<8x18x64xbf16, #tpu.memory_space<vmem>>, vector<6x16x64xbf16>,
    %c0_i32_134 = arith.constant 0 : i32
    %129 = arith.cmpi eq, %arg1, %c0_i32_134 : i32
    %130 = arith.extui %129 : i1 to i32
    %c0_i32_135 = arith.constant 0 : i32
    %131 = arith.cmpi ne, %130, %c0_i32_135 : i32
    scf.if %131 {
      %cst_211 = arith.constant 0.000000e+00 : bf16
      %204 = vector.broadcast %cst_211 : bf16 to vector<1x18x64xbf16>
      %c1_212 = arith.constant 1 : index
      %c0_213 = arith.constant 0 : index
      %c0_214 = arith.constant 0 : index
      %205 = vector.load %arg8[%c1_212, %c0_213, %c0_214] : memref<8x18x64xbf16, #tpu.memory_space<vmem>>, vector<1x18x64xbf16>
      tpu.vector_store %arg8[%c1_212, %c0_213, %c0_214], %204 {strides = array<i32>} : memref<8x18x64xbf16, #tpu.memory_space<vmem>>, vector<1x18x64xbf16>,
    } else {
    }
    %c1_i32_136 = arith.constant 1 : i32
    %132 = arith.cmpi eq, %arg1, %c1_i32_136 : i32
    %133 = arith.extui %132 : i1 to i32
    %c0_i32_137 = arith.constant 0 : i32
    %134 = arith.cmpi ne, %133, %c0_i32_137 : i32
    scf.if %134 {
      %cst_211 = arith.constant 0.000000e+00 : bf16
      %204 = vector.broadcast %cst_211 : bf16 to vector<1x18x64xbf16>
      %c6_212 = arith.constant 6 : index
      %c0_213 = arith.constant 0 : index
      %c0_214 = arith.constant 0 : index
      %205 = vector.load %arg8[%c6_212, %c0_213, %c0_214] : memref<8x18x64xbf16, #tpu.memory_space<vmem>>, vector<1x18x64xbf16>
      tpu.vector_store %arg8[%c6_212, %c0_213, %c0_214], %204 {strides = array<i32>} : memref<8x18x64xbf16, #tpu.memory_space<vmem>>, vector<1x18x64xbf16>,
    } else {
    }
    %c1_138 = arith.constant 1 : index
    %c0_139 = arith.constant 0 : index
    %c0_140 = arith.constant 0 : index
    %135 = vector.load %arg8[%c1_138, %c0_139, %c0_140] : memref<8x18x64xbf16, #tpu.memory_space<vmem>>, vector<4x16x64xbf16>
    %136 = vector.shape_cast %135 : vector<4x16x64xbf16> to vector<64x64xbf16>
    %c0_141 = arith.constant 0 : index
    %c0_142 = arith.constant 0 : index
    %c0_143 = arith.constant 0 : index
    %137 = vector.load %arg5[%c0_141, %c0_142, %c0_143] : memref<9x64x64xbf16, #tpu.memory_space<vmem>>, vector<1x64x64xbf16>
    %138 = vector.shape_cast %137 : vector<1x64x64xbf16> to vector<64x64xbf16>
    %cst_144 = arith.constant dense<0.000000e+00> : vector<64x64xf32>
    %139 = tpu.matmul %136, %138, %cst_144 {dimension_numbers = #tpu.dot_dimension_numbers<[1], [0], [0], [1], [0, 0, 1, 1], [], []>} : vector<64x64xbf16>, vector<64x64xbf16>, vector<64x64xf32> -> vector<64x64xf32>
    %c1_145 = arith.constant 1 : index
    %c1_146 = arith.constant 1 : index
    %c0_147 = arith.constant 0 : index
    %140 = vector.load %arg8[%c1_145, %c1_146, %c0_147] : memref<8x18x64xbf16, #tpu.memory_space<vmem>>, vector<4x16x64xbf16>
    %141 = vector.shape_cast %140 : vector<4x16x64xbf16> to vector<64x64xbf16>
    %c1_148 = arith.constant 1 : index
    %c0_149 = arith.constant 0 : index
    %c0_150 = arith.constant 0 : index
    %142 = vector.load %arg5[%c1_148, %c0_149, %c0_150] : memref<9x64x64xbf16, #tpu.memory_space<vmem>>, vector<1x64x64xbf16>
    %143 = vector.shape_cast %142 : vector<1x64x64xbf16> to vector<64x64xbf16>
    %cst_151 = arith.constant dense<0.000000e+00> : vector<64x64xf32>
    %144 = tpu.matmul %141, %143, %cst_151 {dimension_numbers = #tpu.dot_dimension_numbers<[1], [0], [0], [1], [0, 0, 1, 1], [], []>} : vector<64x64xbf16>, vector<64x64xbf16>, vector<64x64xf32> -> vector<64x64xf32>
    %145 = arith.addf %139, %144 : vector<64x64xf32>
    %c1_152 = arith.constant 1 : index
    %c2_153 = arith.constant 2 : index
    %c0_154 = arith.constant 0 : index
    %146 = vector.load %arg8[%c1_152, %c2_153, %c0_154] : memref<8x18x64xbf16, #tpu.memory_space<vmem>>, vector<4x16x64xbf16>
    %147 = vector.shape_cast %146 : vector<4x16x64xbf16> to vector<64x64xbf16>
    %c2_155 = arith.constant 2 : index
    %c0_156 = arith.constant 0 : index
    %c0_157 = arith.constant 0 : index
    %148 = vector.load %arg5[%c2_155, %c0_156, %c0_157] : memref<9x64x64xbf16, #tpu.memory_space<vmem>>, vector<1x64x64xbf16>
    %149 = vector.shape_cast %148 : vector<1x64x64xbf16> to vector<64x64xbf16>
    %cst_158 = arith.constant dense<0.000000e+00> : vector<64x64xf32>
    %150 = tpu.matmul %147, %149, %cst_158 {dimension_numbers = #tpu.dot_dimension_numbers<[1], [0], [0], [1], [0, 0, 1, 1], [], []>} : vector<64x64xbf16>, vector<64x64xbf16>, vector<64x64xf32> -> vector<64x64xf32>
    %151 = arith.addf %145, %150 : vector<64x64xf32>
    %c2_159 = arith.constant 2 : index
    %c0_160 = arith.constant 0 : index
    %c0_161 = arith.constant 0 : index
    %152 = vector.load %arg8[%c2_159, %c0_160, %c0_161] : memref<8x18x64xbf16, #tpu.memory_space<vmem>>, vector<4x16x64xbf16>
    %153 = vector.shape_cast %152 : vector<4x16x64xbf16> to vector<64x64xbf16>
    %c3_162 = arith.constant 3 : index
    %c0_163 = arith.constant 0 : index
    %c0_164 = arith.constant 0 : index
    %154 = vector.load %arg5[%c3_162, %c0_163, %c0_164] : memref<9x64x64xbf16, #tpu.memory_space<vmem>>, vector<1x64x64xbf16>
    %155 = vector.shape_cast %154 : vector<1x64x64xbf16> to vector<64x64xbf16>
    %cst_165 = arith.constant dense<0.000000e+00> : vector<64x64xf32>
    %156 = tpu.matmul %153, %155, %cst_165 {dimension_numbers = #tpu.dot_dimension_numbers<[1], [0], [0], [1], [0, 0, 1, 1], [], []>} : vector<64x64xbf16>, vector<64x64xbf16>, vector<64x64xf32> -> vector<64x64xf32>
    %157 = arith.addf %151, %156 : vector<64x64xf32>
    %c2_166 = arith.constant 2 : index
    %c1_167 = arith.constant 1 : index
    %c0_168 = arith.constant 0 : index
    %158 = vector.load %arg8[%c2_166, %c1_167, %c0_168] : memref<8x18x64xbf16, #tpu.memory_space<vmem>>, vector<4x16x64xbf16>
    %159 = vector.shape_cast %158 : vector<4x16x64xbf16> to vector<64x64xbf16>
    %c4_169 = arith.constant 4 : index
    %c0_170 = arith.constant 0 : index
    %c0_171 = arith.constant 0 : index
    %160 = vector.load %arg5[%c4_169, %c0_170, %c0_171] : memref<9x64x64xbf16, #tpu.memory_space<vmem>>, vector<1x64x64xbf16>
    %161 = vector.shape_cast %160 : vector<1x64x64xbf16> to vector<64x64xbf16>
    %cst_172 = arith.constant dense<0.000000e+00> : vector<64x64xf32>
    %162 = tpu.matmul %159, %161, %cst_172 {dimension_numbers = #tpu.dot_dimension_numbers<[1], [0], [0], [1], [0, 0, 1, 1], [], []>} : vector<64x64xbf16>, vector<64x64xbf16>, vector<64x64xf32> -> vector<64x64xf32>
    %163 = arith.addf %157, %162 : vector<64x64xf32>
    %c2_173 = arith.constant 2 : index
    %c2_174 = arith.constant 2 : index
    %c0_175 = arith.constant 0 : index
    %164 = vector.load %arg8[%c2_173, %c2_174, %c0_175] : memref<8x18x64xbf16, #tpu.memory_space<vmem>>, vector<4x16x64xbf16>
    %165 = vector.shape_cast %164 : vector<4x16x64xbf16> to vector<64x64xbf16>
    %c5_176 = arith.constant 5 : index
    %c0_177 = arith.constant 0 : index
    %c0_178 = arith.constant 0 : index
    %166 = vector.load %arg5[%c5_176, %c0_177, %c0_178] : memref<9x64x64xbf16, #tpu.memory_space<vmem>>, vector<1x64x64xbf16>
    %167 = vector.shape_cast %166 : vector<1x64x64xbf16> to vector<64x64xbf16>
    %cst_179 = arith.constant dense<0.000000e+00> : vector<64x64xf32>
    %168 = tpu.matmul %165, %167, %cst_179 {dimension_numbers = #tpu.dot_dimension_numbers<[1], [0], [0], [1], [0, 0, 1, 1], [], []>} : vector<64x64xbf16>, vector<64x64xbf16>, vector<64x64xf32> -> vector<64x64xf32>
    %169 = arith.addf %163, %168 : vector<64x64xf32>
    %c3_180 = arith.constant 3 : index
    %c0_181 = arith.constant 0 : index
    %c0_182 = arith.constant 0 : index
    %170 = vector.load %arg8[%c3_180, %c0_181, %c0_182] : memref<8x18x64xbf16, #tpu.memory_space<vmem>>, vector<4x16x64xbf16>
    %171 = vector.shape_cast %170 : vector<4x16x64xbf16> to vector<64x64xbf16>
    %c6_183 = arith.constant 6 : index
    %c0_184 = arith.constant 0 : index
    %c0_185 = arith.constant 0 : index
    %172 = vector.load %arg5[%c6_183, %c0_184, %c0_185] : memref<9x64x64xbf16, #tpu.memory_space<vmem>>, vector<1x64x64xbf16>
    %173 = vector.shape_cast %172 : vector<1x64x64xbf16> to vector<64x64xbf16>
    %cst_186 = arith.constant dense<0.000000e+00> : vector<64x64xf32>
    %174 = tpu.matmul %171, %173, %cst_186 {dimension_numbers = #tpu.dot_dimension_numbers<[1], [0], [0], [1], [0, 0, 1, 1], [], []>} : vector<64x64xbf16>, vector<64x64xbf16>, vector<64x64xf32> -> vector<64x64xf32>
    %175 = arith.addf %169, %174 : vector<64x64xf32>
    %c3_187 = arith.constant 3 : index
    %c1_188 = arith.constant 1 : index
    %c0_189 = arith.constant 0 : index
    %176 = vector.load %arg8[%c3_187, %c1_188, %c0_189] : memref<8x18x64xbf16, #tpu.memory_space<vmem>>, vector<4x16x64xbf16>
    %177 = vector.shape_cast %176 : vector<4x16x64xbf16> to vector<64x64xbf16>
    %c7_190 = arith.constant 7 : index
    %c0_191 = arith.constant 0 : index
    %c0_192 = arith.constant 0 : index
    %178 = vector.load %arg5[%c7_190, %c0_191, %c0_192] : memref<9x64x64xbf16, #tpu.memory_space<vmem>>, vector<1x64x64xbf16>
    %179 = vector.shape_cast %178 : vector<1x64x64xbf16> to vector<64x64xbf16>
    %cst_193 = arith.constant dense<0.000000e+00> : vector<64x64xf32>
    %180 = tpu.matmul %177, %179, %cst_193 {dimension_numbers = #tpu.dot_dimension_numbers<[1], [0], [0], [1], [0, 0, 1, 1], [], []>} : vector<64x64xbf16>, vector<64x64xbf16>, vector<64x64xf32> -> vector<64x64xf32>
    %181 = arith.addf %175, %180 : vector<64x64xf32>
    %c3_194 = arith.constant 3 : index
    %c2_195 = arith.constant 2 : index
    %c0_196 = arith.constant 0 : index
    %182 = vector.load %arg8[%c3_194, %c2_195, %c0_196] : memref<8x18x64xbf16, #tpu.memory_space<vmem>>, vector<4x16x64xbf16>
    %183 = vector.shape_cast %182 : vector<4x16x64xbf16> to vector<64x64xbf16>
    %c8_197 = arith.constant 8 : index
    %c0_198 = arith.constant 0 : index
    %c0_199 = arith.constant 0 : index
    %184 = vector.load %arg5[%c8_197, %c0_198, %c0_199] : memref<9x64x64xbf16, #tpu.memory_space<vmem>>, vector<1x64x64xbf16>
    %185 = vector.shape_cast %184 : vector<1x64x64xbf16> to vector<64x64xbf16>
    %cst_200 = arith.constant dense<0.000000e+00> : vector<64x64xf32>
    %186 = tpu.matmul %183, %185, %cst_200 {dimension_numbers = #tpu.dot_dimension_numbers<[1], [0], [0], [1], [0, 0, 1, 1], [], []>} : vector<64x64xbf16>, vector<64x64xbf16>, vector<64x64xf32> -> vector<64x64xf32>
    %187 = arith.addf %181, %186 : vector<64x64xf32>
    %c0_201 = arith.constant 0 : index
    %c0_202 = arith.constant 0 : index
    %188 = vector.load %arg6[%c0_201, %c0_202] : memref<1x64xf32, #tpu.memory_space<vmem>>, vector<1x64xf32>
    %189 = vector.broadcast %188 : vector<1x64xf32> to vector<64x64xf32>
    %190 = arith.addf %187, %189 : vector<64x64xf32>
    %c0_203 = arith.constant 0 : index
    %191 = arith.index_cast %1 : i32 to index
    %c0_204 = arith.constant 0 : index
    %c0_205 = arith.constant 0 : index
    %192 = vector.load %arg2[%c0_203, %191, %c0_204, %c0_205] : memref<1x8x16x64xbf16, #tpu.memory_space<vmem>>, vector<1x4x16x64xbf16>
    %193 = vector.shape_cast %192 : vector<1x4x16x64xbf16> to vector<4x16x64xbf16>
    %194 = vector.shape_cast %193 : vector<4x16x64xbf16> to vector<64x64xbf16>
    %195 = arith.extf %194 : vector<64x64xbf16> to vector<64x64xf32>
    %196 = arith.addf %190, %195 : vector<64x64xf32>
    %cst_206 = arith.constant 0.000000e+00 : f32
    %197 = vector.broadcast %cst_206 : f32 to vector<64x64xf32>
    %198 = arith.maximumf %196, %197 : vector<64x64xf32>
    %199 = vector.shape_cast %198 : vector<64x64xf32> to vector<4x16x64xf32>
    %200 = arith.truncf %199 : vector<4x16x64xf32> to vector<4x16x64xbf16>
    %c0_207 = arith.constant 0 : index
    %c0_208 = arith.constant 0 : index
    %c0_209 = arith.constant 0 : index
    %c0_210 = arith.constant 0 : index
    %201 = vector.load %arg7[%c0_207, %c0_208, %c0_209, %c0_210] : memref<1x4x16x64xbf16, #tpu.memory_space<vmem>>, vector<1x4x16x64xbf16>
    %202 = vector.shape_cast %201 : vector<1x4x16x64xbf16> to vector<4x16x64xbf16>
    %203 = vector.shape_cast %200 : vector<4x16x64xbf16> to vector<1x4x16x64xbf16>
    tpu.vector_store %arg7[%c0_207, %c0_208, %c0_209, %c0_210], %203 {strides = array<i32>} : memref<1x4x16x64xbf16, #tpu.memory_space<vmem>>, vector<1x4x16x64xbf16>,
    return
  }
  func.func @transform_0(%arg0: i32, %arg1: i32) -> (i32, i32, i32, i32) {
    %c0_i32 = arith.constant 0 : i32
    %c0_i32_0 = arith.constant 0 : i32
    %c0_i32_1 = arith.constant 0 : i32
    %c0_i32_2 = arith.constant 0 : i32
    return %arg0, %c0_i32, %c0_i32_0, %c0_i32_1 : i32, i32, i32, i32
  }
  func.func @transform_1(%arg0: i32, %arg1: i32) -> (i32, i32, i32) {
    %c0_i32 = arith.constant 0 : i32
    %c0_i32_0 = arith.constant 0 : i32
    %c0_i32_1 = arith.constant 0 : i32
    %c0_i32_2 = arith.constant 0 : i32
    return %c0_i32, %c0_i32_0, %c0_i32_1 : i32, i32, i32
  }
  func.func @transform_2(%arg0: i32, %arg1: i32) -> (i32, i32) {
    %c0_i32 = arith.constant 0 : i32
    %c0_i32_0 = arith.constant 0 : i32
    %c0_i32_1 = arith.constant 0 : i32
    return %c0_i32, %c0_i32_0 : i32, i32
  }
  func.func @transform_3(%arg0: i32, %arg1: i32) -> (i32, i32, i32) {
    %c0_i32 = arith.constant 0 : i32
    %c0_i32_0 = arith.constant 0 : i32
    %c0_i32_1 = arith.constant 0 : i32
    %c0_i32_2 = arith.constant 0 : i32
    return %c0_i32, %c0_i32_0, %c0_i32_1 : i32, i32, i32
  }
  func.func @transform_4(%arg0: i32, %arg1: i32) -> (i32, i32) {
    %c0_i32 = arith.constant 0 : i32
    %c0_i32_0 = arith.constant 0 : i32
    %c0_i32_1 = arith.constant 0 : i32
    return %c0_i32, %c0_i32_0 : i32, i32
  }
  func.func @transform_5(%arg0: i32, %arg1: i32) -> (i32, i32, i32, i32) {
    %c0_i32 = arith.constant 0 : i32
    %c0_i32_0 = arith.constant 0 : i32
    %c0_i32_1 = arith.constant 0 : i32
    return %arg0, %arg1, %c0_i32, %c0_i32_0 : i32, i32, i32, i32
  }
}

</mosaic_0001>

<bundles_post_ra>
// kernel: tpu_custom_call.1
= control target key start
LH: loop header
LB: loop body
LE: loop exit
PB: predicated region body
PF: predicated region fallthrough
CT: control target
= control target key end

     0   :  { %s6523_s0 = inlined_call_operand.hbm [shape: bf16[2,8,16,64], index: 0, kind: input, shape index: {}]   ;;  %s6524_s1 = inlined_call_operand.hbm [shape: bf16[9,64,64], index: 1, kind: input, shape index: {}]   ;;  %s6525_s2 = inlined_call_operand.vmem [shape: f32[1,64], index: 2, kind: input, shape index: {}]   ;;  %s6526_s3 = inlined_call_operand.hbm [shape: bf16[9,64,64], index: 3, kind: input, shape index: {}]   ;;  %s6527_s4 = inlined_call_operand.vmem [shape: f32[1,64], index: 4, kind: input, shape index: {}]   ;;  %s6528_s5 = inlined_call_operand.hbm [shape: bf16[2,8,16,64], index: 5, kind: output, shape index: {}]  }
   0x1   :  { %6539 = sst [smem:[#allocation20_spill]] %s6524_s1 }
   0x2   :  { %6540 = sst [smem:[#allocation21_spill]] %s6526_s3 }
   0x3   :  { %6541 = sst [smem:[#allocation22_spill]] %s6528_s5 }
   0x4   :  { %10 = vsyncpa [#allocation4], 0 }
   0x5   :  { %12 = vsyncpa [#allocation4 + $0x1], 0 }
   0x6   :  { %13 = vsyncpa [#allocation7], 0 }
   0x7   :  { %14 = vsyncpa [#allocation5], 0 }
   0x8   :  { %16 = vsyncpa [#allocation5 + $0x1], 0  ;;  %s5380_s18 = smov 0   ;;  %s5382_s19 = smov 0  }
   0x9   :  { %s5384_s20 = smov 0   ;;  %s5386_s21 = smov 0  }
   0xa   :  { %s5388_s22 = smov 0   ;;  %s5390_s23 = smov 0  }
   0xb   :  { %s5392_s24 = smov 0   ;;  %s5394_s25 = smov 0  }
   0xc   :  { %s5396_s26 = smov 0   ;;  %s5398_s27 = smov 0  }
   0xd   :  { %s5400_s28 = smov 0  }
   0xe LB: > { %6542 = sst [smem:[#allocation13_spill]] %s5298_s18  ;;  %s4219_s29 = sadd.s32 4294967295, %s5338_s28   ;;  %s5338_s28 = sphi %s5400_s28, %s22_s28   ;;  %s5334_s27 = sphi %s5398_s27, %s6586_s27   ;;  %s5330_s26 = sphi %s5396_s26, %s6577_s26   ;;  %s5326_s25 = sphi %s5394_s25, %s6585_s25   ;;  %s5322_s24 = sphi %s5392_s24, %s6576_s24   ;;  %s5318_s23 = sphi %s5390_s23, %s6584_s23   ;;  %s5314_s22 = sphi %s5388_s22, %s6583_s22   ;;  %s5310_s21 = sphi %s5386_s21, %s6582_s21   ;;  %s5306_s20 = sphi %s5384_s20, %s6581_s20   ;;  %s5302_s19 = sphi %s5382_s19, %s6580_s19   ;;  %s5298_s18 = sphi %s5380_s18, %s6579_s18  }
   0xf   : > { %6543 = sst [smem:[#allocation14_spill]] %s5326_s25  ;;  %s4220_s30 = sadd.s32 4294967294, %s5338_s28  }
  0x10   : > { %6544 = sst [smem:[#allocation15_spill]] %s5330_s26  ;;  %p54_p0 = scmp.ne.s32.totalorder %s5314_s22, %s5310_s21 }
  0x11   : > { %p5436_p1 = scmp.eq.s32.totalorder %s4219_s29, 0  ;;  %p163_p2 = scmp.ne.s32.totalorder %s5306_s20, %s5302_s19 }
  0x12   : > { %p164_p3 = scmp.eq.s32.totalorder %s4219_s29, 3  ;;  %p169_p5 = scmp.ne.s32.totalorder %s5302_s19, %s5298_s18 }
  0x13   : > { %p5444_p4 = por %p5436_p1, %p54_p0  ;;  %p170_p7 = scmp.eq.s32.totalorder %s4220_s30, 3 }
  0x14   : > { %p5450_p6 = por %p164_p3, %p163_p2  ;;  %p4221_p8 = scmp.ge.s32.totalorder %s5338_s28, 1 }
  0x15   : > { %p177_p9 = scmp.lt.s32.totalorder %s5338_s28, 5  ;;  %p5456_p10 = por %p170_p7, %p169_p5 }
  0x16   : > { %s6547_s8 = scalar_select %p5450_p6, 1, 0 }
  0x17   : > { %s6549_s9 = scalar_select %p5456_p10, 1, 0 }
  0x18   : > { %6548 = sst [smem:[#allocation16_spill]] %s6547_s8  ;;  %p5460_p11 = pnand %p4221_p8, %p177_p9 }
  0x19   : > { %6550 = sst [smem:[#allocation17_spill]] %s6549_s9  ;;  %s5340_s14 = smov [#allocation6]  }
  0x1a   : > { %s6552_s1 = sld [smem:[#allocation20_spill]]  ;;  %p5000_p12 = pneg %p5460_p11 }
  0x1b   : > { %s190_s15 = sshll.u32 %s5340_s14, 4  ;;  %s6553_s3 = sld [smem:[#allocation21_spill]]  ;;  %s191_s15 = int_to_ptr.vmem [resolvable:$true] %s190_s15 }
  0x1c   : > { %p5001_p13 = pnand %p5000_p12, %p5436_p1  ;;  %s6529_s29 = smov 64  }
  0x1d   : > { %s6530_s30 = smov 4   ;;  %s5343_s11 = smov [#allocation8]  }
  0x1e   : > { %s207_s12 = sshll.u32 %s5343_s11, 4  ;;  %s31_s14 = sadd.s32 1, %s5330_s26  ;;  %s208_s12 = int_to_ptr.vmem [resolvable:$true] %s207_s12 }
  0x1f   : > { %p32_p0 = scmp.ge.s32.totalorder %s31_s14, 2  ;;  %s34_s16 = sadd.s32 1, %s5334_s27 }
  0x20   : > { %s188_s13 = sshll.u32 %s6552_s1, 4  ;;  %p48_p2 = scmp.ne.s32.totalorder %s5318_s23, %s5314_s22  ;;  %s189_s13 = int_to_ptr.hbm [resolvable:$true] %s188_s13 }
  0x21   : > { %s205_s21 = sshll.u32 %s6553_s3, 4  ;;  %s6588_s14 = smov (%p32_p0, %s31_s14), 0  ;;  %s206_s21 = int_to_ptr.hbm [resolvable:$true] %s205_s21 }
  0x22   : > { %5003 = dma.hbm_to_vmem [thread:$0]  (!%p5001_p13), %s189_s13, 4608, %s191_s15, [#allocation7], %s6529_s29, %s6529_s29, %s6530_s30  }
  0x23   : > { %5006 = dma.hbm_to_vmem [thread:$0]  (!%p5001_p13), %s206_s21, 4608, %s208_s12, [#allocation7], %s6529_s29, %s6529_s29, %s6530_s30  }
  0x24   : > { %6554 = sst [smem:[#allocation18_spill]] %s6588_s14  ;;  %s6590_s16 = smov (!%p32_p0, %s34_s16), %s5334_s27 }
  0x25   : > { %s41_s13 = sadd.s32 1, %s5318_s23  ;;  %p49_p3 = scmp.eq.s32.totalorder %s5338_s28, 0 }
  0x26   : > { %p36_p5 = scmp.ge.s32.totalorder %s6590_s16, 2  ;;  %s149_s15 = ssub.s32 %s5330_s26, %s6588_s14 }
  0x27   : > { %p5491_p7 = por %p49_p3, %p48_p2  ;;  %s153_s21 = sadd.s32 1, %s5306_s20 }
  0x28   : > { %s6592_s16 = smov (%p36_p5, %s6590_s16), 0  ;;  %p5017_p8 = scmp.lt.s32.totalorder %s5338_s28, 4 }
  0x29   : > { %6556 = sst [smem:[#allocation19_spill]] %s6592_s16  ;;  %s224_s11 = sand.u32 1, %s5318_s23  }
  0x2a   : > { %s38_s12 = ssub.s32 %s5334_s27, %s6592_s16  ;;  %s4831_s29 = sshll.u32 %s5334_s27, 6 }
  0x2b   : > { %p39_p9 = scmp.eq.s32.totalorder %s38_s12, 0  ;;  %s150_s30 = sor.u32 %s149_s15, %s38_s12 }
  0x2c   : > { %p151_p12 = scmp.eq.s32.totalorder %s150_s30, 0  ;;  %s4225_s1 = sshll.u32 %s224_s11, 6 }
  0x2d   : > { %s5504_s3 = scalar_select %p39_p9, %s5318_s23, %s41_s13  }
  0x2e   : > { %s5507_s14 = scalar_select %p151_p12, %s5306_s20, %s153_s21  }
  0x2f   : > { %s233_s18 = scalar_lea.hbm %s6523_s0, %s4831_s29  ;;  %s228_s5 = scalar_lea.vmem [#allocation3], %s4225_s1 }
  0x30   : > { %s234_s8 = sshll.u32 %s233_s18, 4  ;;  %s236_s25 = sshll.u32 %s228_s5, 4  ;;  %s235_s8 = int_to_ptr.hbm [resolvable:$true] %s234_s8  ;;  %s237_s25 = int_to_ptr.vmem [resolvable:$true] %s236_s25 }
  0x31   : > { %p5008_p13 = pnand %p5017_p8, %p5491_p7  ;;  %s225_s16 = scalar_lea.sflag [#allocation4], %s224_s11 }
  0x32   : > { %s6557_s15 = smov 4   ;;  %s6558_s30 = smov 64  }
  0x33   : > { %5010 = dma.hbm_to_vmem [thread:$0]  (!%p5008_p13), %s235_s8, 1024, %s237_s25, %s225_s16, %s6558_s30, %s6558_s30, %s6557_s15  }
  0x34   : > { %248 = sbr.rel (%p5460_p11) target bundleno = 942 (0x3ae), region = 40  ;;  %s250_s26 = sand.u32 (!%p5460_p11), 1, %s5314_s22  }
  0x35   : > { %s4229_s9 = sshll.u32 (!%p5460_p11), %s250_s26, 6  ;;  %s251_s18 = scalar_lea.sflag (!%p5460_p11), [#allocation4], %s250_s26 }
  0x36   : > { %s5522_s1 = scalar_lea.vmem (!%p5460_p11), [#allocation3], %s4229_s9 }
  0x39   : > { %5285 = dma.done.wait (%p5444_p4), %s251_s18, 1024  }
  0x3a   : > { %5287 = vsyncadd (%p5444_p4), %s251_s18, 4294966272 }
  0x3b   : > { %5289 = dma.done.wait (%p5436_p1), [#allocation7], 9216  }
  0x3c   : > { %5291 = vsyncadd (%p5436_p1), [#allocation7], 4294958080  ;;  %s289_s5 = sand.u32 1, %s5302_s19   ;;  %s5538_s8 = sshll.u32 %s5322_s24, 2  ;;  %vm295_vm0 = vcmask 516096   ;;  %vm380_vm6 = vcmask 519168  }
  0x3d   : > { %s5535_s25 = sshll.u32 %s289_s5, 5  ;;  %vm296_vm1 = vsmask.f32 256  ;;  %s348_s7 = sadd.s32 4294967294, %s5538_s8  ;;  %vm322_vm3 = vsmask.f32 7938 }
  0x3e   : > { %p349_p4 = scmp.gt.s32.totalorder %s348_s7, 0  ;;  %p4234_p11 = scmp.lt.s32.totalorder %s348_s7, 7  ;;  %vm5547_vm2 = vmand %vm295_vm0, %vm296_vm1  ;;  %v298_v1 = vld [vmem:[#allocation2] sm:$0x1]  ;;  %v301_v2 = vld [vmem:[#allocation2 + $0xc] sm:$0x1] }
  0x3f   : > { %s5542_s10 = sadd.s32 4294967295, %s5538_s8  ;;  %p428_p1 = scmp.gt.s32.totalorder %s5538_s8, 0  ;;  %v304_v3 = vld [vmem:[#allocation2 + $0x18] sm:$0x1]  ;;  %v299_v4 = vsel %vm5547_vm2, 0, %v298_v1  ;;  %v302_v5 = vsel %vm5547_vm2, 0, %v301_v2  ;;  %vm5572_vm4 = vmand %vm295_vm0, %vm322_vm3 }
  0x40   : > { %s350_s6 = scalar_select %p349_p4, %s348_s7, 0  ;;  %v305_v6 = vsel %vm5547_vm2, 0, %v304_v3  ;;  %v307_v7 = vld [vmem:[#allocation2 + $0x24] sm:$0x1]  ;;  %300 = vst [vmem:[#allocation2] sm:$0x1] %v299_v4  ;;  %vm5628_vm7 = vmand %vm380_vm6, %vm322_vm3 }
  0x41   : > { %p391_p0 = scmp.gt.s32.totalorder %s5542_s10, 0  ;;  %p4241_p2 = scmp.lt.s32.totalorder %s5542_s10, 7  ;;  %v308_v8 = vsel %vm5547_vm2, 0, %v307_v7  ;;  %v310_v9 = vld [vmem:[#allocation2 + $0x30] sm:$0x1] }
  0x42   : > { %s6594_s6 = smov (!%p4234_p11, %s350_s6), 7  ;;  %303 = vst [vmem:[#allocation2 + $0xc] sm:$0x1] %v302_v5  ;;  %v311_v10 = vsel %vm5547_vm2, 0, %v310_v9  ;;  %v313_v11 = vld [vmem:[#allocation2 + $0x3c] sm:$0x1] }
  0x43   : > { %s392_s29 = scalar_select %p391_p0, %s5542_s10, 0  ;;  %306 = vst [vmem:[#allocation2 + $0x18] sm:$0x1] %v305_v6  ;;  %v314_v12 = vsel %vm5547_vm2, 0, %v313_v11  ;;  %v316_v13 = vld [vmem:[#allocation2 + $0x48] sm:$0x1] }
  0x44   : > { %s4834_s16 = sshll.u32 %s6594_s6, 3  ;;  %p4248_p3 = scmp.lt.s32.totalorder %s5538_s8, 7  ;;  %309 = vst [vmem:[#allocation2 + $0x24] sm:$0x1] %v308_v8  ;;  %v317_v15 = vsel %vm5547_vm2, 0, %v316_v13 }
  0x45   : > { %v319_v16 = vld [vmem:[#allocation2 + $0x54] sm:$0x1]  ;;  %s6596_s29 = smov (!%p4241_p2, %s392_s29), 7  ;;  %312 = vst [vmem:[#allocation2 + $0x30] sm:$0x1] %v311_v10  ;;  %s5594_s21 = sadd.s32 1, %s5538_s8 }
  0x46   : > { %v320_v17 = vsel %vm5547_vm2, 0, %v319_v16  ;;  %v324_v18 = vld [vmem:[#allocation2 + $0x8] sm:$0x1]  ;;  %s429_s13 = scalar_select %p428_p1, %s5538_s8, 0  ;;  %315 = vst [vmem:[#allocation2 + $0x3c] sm:$0x1] %v314_v12 }
  0x47   : > { %v325_v19 = vsel %vm5572_vm4, 0, %v324_v18  ;;  %v327_v20 = vld [vmem:[#allocation2 + $0x14] sm:$0x1]  ;;  %s4837_s17 = sshll.u32 %s6596_s29, 3  ;;  %318 = vst [vmem:[#allocation2 + $0x48] sm:$0x1] %v317_v15  ;;  %s355_s11 = scalar_lea.vmem %s5522_s1, %s4834_s16 [#allocation3] }
  0x48   : > { %v328_v21 = vsel %vm5572_vm4, 0, %v327_v20  ;;  %v330_v22 = vld [vmem:[#allocation2 + $0x20] sm:$0x1]  ;;  %321 = vst [vmem:[#allocation2 + $0x54] sm:$0x1] %v320_v17  ;;  %s6598_s13 = smov (!%p4248_p3, %s429_s13), 7  ;;  %s397_s15 = scalar_lea.vmem %s5522_s1, %s4837_s17 [#allocation3] }
  0x49   : > { %v331_v23 = vsel %vm5572_vm4, 0, %v330_v22  ;;  %v333_v24 = vld [vmem:[#allocation2 + $0x2c] sm:$0x1]  ;;  %vm358_vm5 = vsmask.f32 4368  ;;  %p466_p5 = scmp.gt.s32.totalorder %s5594_s21, 0 }
  0x4a   : > { %326 = vst [vmem:[#allocation2 + $0x8] sm:$0x1] %v325_v19  ;;  %v334_v25 = vsel %vm5572_vm4, 0, %v333_v24  ;;  %v336_v26 = vld [vmem:[#allocation2 + $0x38] sm:$0x1]  ;;  %s4840_s12 = sshll.u32 %s6598_s13, 3  ;;  %vm5637_vm8 = vmor %vm296_vm1, %vm358_vm5 }
  0x4b   : > { %329 = vst [vmem:[#allocation2 + $0x14] sm:$0x1] %v328_v21  ;;  %v337_v27 = vsel %vm5572_vm4, 0, %v336_v26  ;;  %v339_v28 = vld [vmem:[#allocation2 + $0x44] sm:$0x1]  ;;  %p4255_p7 = scmp.lt.s32.totalorder %s5594_s21, 7  ;;  %s434_s9 = scalar_lea.vmem %s5522_s1, %s4840_s12 [#allocation3] }
  0x4c   : > { %332 = vst [vmem:[#allocation2 + $0x20] sm:$0x1] %v331_v23  ;;  %v340_v29 = vsel %vm5572_vm4, 0, %v339_v28  ;;  %v342_v30 = vld [vmem:[#allocation2 + $0x50] sm:$0x1]  ;;  %s467_s30 = scalar_select %p466_p5, %s5594_s21, 0 }
  0x4d   : > { %335 = vst [vmem:[#allocation2 + $0x2c] sm:$0x1] %v334_v25  ;;  %v343_v31 = vsel %vm5572_vm4, 0, %v342_v30  ;;  %v345_v32 = vld [vmem:[#allocation2 + $0x5c] sm:$0x1]  ;;  %s5623_s26 = sadd.s32 2, %s5538_s8 }
  0x4e   : > { %338 = vst [vmem:[#allocation2 + $0x38] sm:$0x1] %v337_v27  ;;  %v346_v33 = vsel %vm5572_vm4, 0, %v345_v32  ;;  %v356_v34 = vld [vmem:[%s355_s11] sm:$0xf]  ;;  %s6600_s30 = smov (!%p4255_p7, %s467_s30), 7 }
  0x4f   : > { %341 = vst [vmem:[#allocation2 + $0x44] sm:$0x1] %v340_v29  ;;  %v361_v35 = vshrl.u32 %v356_v34, 16  ;;  %v364_v36 = vshll.u32 %v356_v34, 16  ;;  %v357_v37 = vld [vmem:[%s355_s11 + $0x4] sm:$0xf] }
  0x50   : > { %344 = vst [vmem:[#allocation2 + $0x50] sm:$0x1] %v343_v31  ;;  %v398_v38 = vld [vmem:[%s397_s15] sm:$0xf]  ;;  %v369_v40 = vshrl.u32 %v357_v37, 16  ;;  %v372_v41 = vshll.u32 %v357_v37, 16 }
  0x51   : > { %347 = vst [vmem:[#allocation2 + $0x5c] sm:$0x1] %v346_v33  ;;  %v363_v39 = vrot.slane %v361_v35, 7  ;;  %v401_v42 = vshrl.u32 %v398_v38, 16  ;;  %v382_v44 = vld [vmem:[#allocation2] sm:$0xf] }
  0x52   : > { %v387_v45 = vld [vmem:[#allocation2 + $0x8] sm:$0x1]  ;;  %v404_v46 = vshll.u32 %v398_v38, 16  ;;  %v371_v49 = vrot.slane %v369_v40, 7  ;;  %v399_v51 = vld [vmem:[%s397_s15 + $0x4] sm:$0xf] }
  0x53   : > { %v366_v47 = vor.u32 %v364_v36, %v363_v39  ;;  %v367_v48 = vrot.slane %v363_v39, 4  ;;  %v403_v50 = vrot.slane %v401_v42, 7  ;;  %p504_p8 = scmp.gt.s32.totalorder %s5623_s26, 0  ;;  %v421_v53 = vld [vmem:[#allocation2 + $0xc] sm:$0xf]  ;;  %v409_v54 = vshrl.u32 %v399_v51, 16 }
  0x54   : > { %v412_v55 = vshll.u32 %v399_v51, 16  ;;  %v435_v56 = vld [vmem:[%s434_s9] sm:$0xf]  ;;  %v374_v58 = vor.u32 %v372_v41, %v371_v49  ;;  %v376_v59 = vrot.slane %v371_v49, 4  ;;  %v425_v61 = vld [vmem:[#allocation2 + $0x14] sm:$0x1] }
  0x55   : > { %v383_v57 = vsel %vm5628_vm7, %v366_v47, %v382_v44  ;;  %v406_v60 = vor.u32 %v404_v46, %v403_v50  ;;  %v436_v62 = vld [vmem:[%s434_s9 + $0x4] sm:$0xf]  ;;  %s4843_s18 = sshll.u32 %s6600_s30, 3  ;;  %v407_v63 = vrot.slane %v403_v50, 4  ;;  %v411_v1 = vrot.slane %v409_v54, 7  ;;  %p4262_p9 = scmp.lt.s32.totalorder %s5623_s26, 7 }
  0x56   : > { %384 = vst [vmem:[#allocation2] sm:$0xf] %v383_v57  ;;  %v438_v2 = vshrl.u32 %v435_v56, 16  ;;  %v441_v3 = vshll.u32 %v435_v56, 16  ;;  %s472_s7 = scalar_lea.vmem %s5522_s1, %s4843_s18 [#allocation3]  ;;  %v375_v4 = vsel %vm5637_vm8, %v367_v48, %v374_v58  ;;  %v388_v5 = vsel %vm5547_vm2, %v376_v59, %v387_v45  ;;  %v458_v7 = vld [vmem:[#allocation2 + $0x18] sm:$0xf] }
  0x57   : > { %v422_v6 = vsel %vm5628_vm7, %v406_v60, %v421_v53  ;;  %v446_v8 = vshrl.u32 %v436_v62, 16  ;;  %v473_v9 = vld [vmem:[%s472_s7] sm:$0xf]  ;;  %s505_s10 = scalar_select %p504_p8, %s5623_s26, 0  ;;  %386 = vst.msk [vmem:[#allocation2 + $0x4] sm:$0xf] %vm380_vm6, %v375_v4  ;;  %v414_v10 = vor.u32 %v412_v55, %v411_v1 }
  0x58   : > { %v416_v11 = vrot.slane %v411_v1, 4  ;;  %v440_v12 = vrot.slane %v438_v2, 7  ;;  %v449_v13 = vshll.u32 %v436_v62, 16  ;;  %389 = vst [vmem:[#allocation2 + $0x8] sm:$0x1] %v388_v5  ;;  %v476_v15 = vshrl.u32 %v473_v9, 16 }
  0x59   : > { %v448_v14 = vrot.slane %v446_v8, 7  ;;  %v479_v16 = vshll.u32 %v473_v9, 16  ;;  %s5656_s6 = sadd.s32 3, %s5538_s8  ;;  %423 = vst [vmem:[#allocation2 + $0xc] sm:$0xf] %v422_v6  ;;  %v415_v17 = vsel %vm5637_vm8, %v407_v63, %v414_v10  ;;  %s6602_s10 = smov (!%p4262_p9, %s505_s10), 7 }
  0x5a   : > { %v426_v18 = vsel %vm5547_vm2, %v416_v11, %v425_v61  ;;  %v443_v19 = vor.u32 %v441_v3, %v440_v12  ;;  %v444_v20 = vrot.slane %v440_v12, 4  ;;  %v462_v21 = vld [vmem:[#allocation2 + $0x20] sm:$0x1]  ;;  %424 = vst.msk [vmem:[#allocation2 + $0x10] sm:$0xf] %vm380_vm6, %v415_v17  ;;  %v478_v24 = vrot.slane %v476_v15, 7 }
  0x5b   : > { %v451_v22 = vor.u32 %v449_v13, %v448_v14  ;;  %v453_v23 = vrot.slane %v448_v14, 4  ;;  %v474_v25 = vld [vmem:[%s472_s7 + $0x4] sm:$0xf]  ;;  %427 = vst [vmem:[#allocation2 + $0x14] sm:$0x1] %v426_v18  ;;  %s4846_s29 = sshll.u32 %s6602_s10, 3 }
  0x5c   : > { %v459_v26 = vsel %vm5628_vm7, %v443_v19, %v458_v7  ;;  %v496_v27 = vld [vmem:[#allocation2 + $0x24] sm:$0xf]  ;;  %v484_v28 = vshrl.u32 %v474_v25, 16  ;;  %v487_v29 = vshll.u32 %v474_v25, 16  ;;  %v481_v32 = vor.u32 %v479_v16, %v478_v24  ;;  %v500_v33 = vld [vmem:[#allocation2 + $0x2c] sm:$0x1]  ;;  %s510_s16 = scalar_lea.vmem %s5522_s1, %s4846_s29 [#allocation3] }
  0x5d   : > { %460 = vst [vmem:[#allocation2 + $0x18] sm:$0xf] %v459_v26  ;;  %v452_v30 = vsel %vm5637_vm8, %v444_v20, %v451_v22  ;;  %v463_v31 = vsel %vm5547_vm2, %v453_v23, %v462_v21  ;;  %v482_v34 = vrot.slane %v478_v24, 4  ;;  %p542_p12 = scmp.gt.s32.totalorder %s5656_s6, 0  ;;  %v511_v37 = vld [vmem:[%s510_s16] sm:$0xf] }
  0x5e   : > { %461 = vst.msk [vmem:[#allocation2 + $0x1c] sm:$0xf] %vm380_vm6, %v452_v30  ;;  %v486_v35 = vrot.slane %v484_v28, 7  ;;  %v497_v36 = vsel %vm5628_vm7, %v481_v32, %v496_v27  ;;  %v512_v38 = vld [vmem:[%s510_s16 + $0x4] sm:$0xf]  ;;  %v514_v41 = vshrl.u32 %v511_v37, 16 }
  0x5f   : > { %464 = vst [vmem:[#allocation2 + $0x20] sm:$0x1] %v463_v31  ;;  %v517_v42 = vshll.u32 %v511_v37, 16  ;;  %s543_s13 = scalar_select %p542_p12, %s5656_s6, 0  ;;  %v522_v44 = vshrl.u32 %v512_v38, 16  ;;  %v525_v45 = vshll.u32 %v512_v38, 16 }
  0x60   : > { %498 = vst [vmem:[#allocation2 + $0x24] sm:$0xf] %v497_v36  ;;  %v489_v39 = vor.u32 %v487_v29, %v486_v35  ;;  %v491_v40 = vrot.slane %v486_v35, 4  ;;  %p4269_p13 = scmp.lt.s32.totalorder %s5656_s6, 7  ;;  %s5677_s17 = sadd.s32 4, %s5538_s8  ;;  %v516_v48 = vrot.slane %v514_v41, 7 }
  0x61   : > { %p580_p4 = scmp.gt.s32.totalorder %s5677_s17, 0  ;;  %p4276_p11 = scmp.lt.s32.totalorder %s5677_s17, 7  ;;  %v534_v49 = vld [vmem:[#allocation2 + $0x30] sm:$0xf]  ;;  %v524_v50 = vrot.slane %v522_v44, 7 }
  0x62   : > { %v490_v46 = vsel %vm5637_vm8, %v482_v34, %v489_v39  ;;  %v501_v47 = vsel %vm5547_vm2, %v491_v40, %v500_v33  ;;  %s6604_s13 = smov (!%p4269_p13, %s543_s13), 7  ;;  %v519_v51 = vor.u32 %v517_v42, %v516_v48  ;;  %v520_v53 = vrot.slane %v516_v48, 4  ;;  %v538_v54 = vld [vmem:[#allocation2 + $0x38] sm:$0x1]  ;;  %s5688_s12 = sadd.s32 5, %s5538_s8 }
  0x63   : > { %499 = vst.msk [vmem:[#allocation2 + $0x28] sm:$0xf] %vm380_vm6, %v490_v46  ;;  %s581_s21 = scalar_select %p580_p4, %s5677_s17, 0  ;;  %v527_v55 = vor.u32 %v525_v45, %v524_v50  ;;  %v529_v56 = vrot.slane %v524_v50, 4  ;;  %v572_v5 = vld [vmem:[#allocation2 + $0x3c] sm:$0xf] }
  0x64   : > { %502 = vst [vmem:[#allocation2 + $0x2c] sm:$0x1] %v501_v47  ;;  %s4849_s11 = sshll.u32 %s6604_s13, 3  ;;  %v535_v57 = vsel %vm5628_vm7, %v519_v51, %v534_v49  ;;  %p618_p1 = scmp.gt.s32.totalorder %s5688_s12, 0  ;;  %v576_v6 = vld [vmem:[#allocation2 + $0x44] sm:$0x1] }
  0x65   : > { %s548_s15 = scalar_lea.vmem %s5522_s1, %s4849_s11 [#allocation3]  ;;  %536 = vst [vmem:[#allocation2 + $0x30] sm:$0xf] %v535_v57  ;;  %v528_v58 = vsel %vm5637_vm8, %v520_v53, %v527_v55  ;;  %v539_v59 = vsel %vm5547_vm2, %v529_v56, %v538_v54  ;;  %s6606_s21 = smov (!%p4276_p11, %s581_s21), 7  ;;  %v610_v18 = vld [vmem:[#allocation2 + $0x48] sm:$0xf] }
  0x66   : > { %v549_v60 = vld [vmem:[%s548_s15] sm:$0xf]  ;;  %v550_v61 = vld [vmem:[%s548_s15 + $0x4] sm:$0xf]  ;;  %537 = vst.msk [vmem:[#allocation2 + $0x34] sm:$0xf] %vm380_vm6, %v528_v58 }
  0x67   : > { %v552_v62 = vshrl.u32 %v549_v60, 16  ;;  %v555_v63 = vshll.u32 %v549_v60, 16  ;;  %v560_v1 = vshrl.u32 %v550_v61, 16  ;;  %v563_v2 = vshll.u32 %v550_v61, 16  ;;  %540 = vst [vmem:[#allocation2 + $0x38] sm:$0x1] %v539_v59 }
  0x68   : > { %s619_s8 = scalar_select %p618_p1, %s5688_s12, 0  ;;  %v614_v22 = vld [vmem:[#allocation2 + $0x50] sm:$0x1]  ;;  %v648_v38 = vld [vmem:[#allocation2 + $0x54] sm:$0xf] }
  0x69   : > { %v554_v3 = vrot.slane %v552_v62, 7  ;;  %v562_v4 = vrot.slane %v560_v1, 7  ;;  %s4852_s30 = sshll.u32 %s6606_s21, 3  ;;  %p4283_p0 = scmp.lt.s32.totalorder %s5688_s12, 7  ;;  %v652_v42 = vld [vmem:[#allocation2 + $0x5c] sm:$0x1] }
  0x6a   : > { %s586_s26 = scalar_lea.vmem %s5522_s1, %s4852_s30 [#allocation3]  ;;  %s5729_s7 = scalar_lea.vmem [#allocation9], %s5535_s25 }
  0x6b   : > { %v557_v7 = vor.u32 %v555_v63, %v554_v3  ;;  %v558_v8 = vrot.slane %v554_v3, 4  ;;  %v565_v9 = vor.u32 %v563_v2, %v562_v4  ;;  %v567_v10 = vrot.slane %v562_v4, 4  ;;  %v587_v11 = vld [vmem:[%s586_s26] sm:$0xf]  ;;  %v588_v12 = vld [vmem:[%s586_s26 + $0x4] sm:$0xf] }
  0x6c   : > { %s6608_s8 = smov (!%p4283_p0, %s619_s8), 7  ;;  %v590_v16 = vshrl.u32 %v587_v11, 16  ;;  %v593_v17 = vshll.u32 %v587_v11, 16  ;;  %v598_v19 = vshrl.u32 %v588_v12, 16  ;;  %v601_v20 = vshll.u32 %v588_v12, 16  ;;  %p4290_p2 = scmp.ne.s32.totalorder %s5322_s24, 0 }
  0x6d   : > { %v573_v13 = vsel %vm5628_vm7, %v557_v7, %v572_v5  ;;  %v566_v14 = vsel %vm5637_vm8, %v558_v8, %v565_v9  ;;  %v577_v15 = vsel %vm5547_vm2, %v567_v10, %v576_v6  ;;  %s4855_s9 = sshll.u32 %s6608_s8, 3 }
  0x6e   : > { %574 = vst [vmem:[#allocation2 + $0x3c] sm:$0xf] %v573_v13  ;;  %v592_v21 = vrot.slane %v590_v16, 7  ;;  %s624_s18 = scalar_lea.vmem %s5522_s1, %s4855_s9 [#allocation3]  ;;  %v600_v23 = vrot.slane %v598_v19, 7 }
  0x6f   : > { %575 = vst.msk [vmem:[#allocation2 + $0x40] sm:$0xf] %vm380_vm6, %v566_v14  ;;  %v625_v24 = vld [vmem:[%s624_s18] sm:$0xf]  ;;  %v626_v29 = vld [vmem:[%s624_s18 + $0x4] sm:$0xf] }
  0x70   : > { %578 = vst [vmem:[#allocation2 + $0x44] sm:$0x1] %v577_v15  ;;  %v595_v25 = vor.u32 %v593_v17, %v592_v21  ;;  %v596_v26 = vrot.slane %v592_v21, 4  ;;  %v628_v27 = vshrl.u32 %v625_v24, 16  ;;  %v631_v28 = vshll.u32 %v625_v24, 16 }
  0x71   : > { %v603_v30 = vor.u32 %v601_v20, %v600_v23  ;;  %v605_v31 = vrot.slane %v600_v23, 4  ;;  %v636_v32 = vshrl.u32 %v626_v29, 16  ;;  %v639_v33 = vshll.u32 %v626_v29, 16 }
  0x72   : > { %v611_v34 = vsel %vm5628_vm7, %v595_v25, %v610_v18  ;;  %v630_v35 = vrot.slane %v628_v27, 7 }
  0x73   : > { %612 = vst [vmem:[#allocation2 + $0x48] sm:$0xf] %v611_v34  ;;  %v604_v36 = vsel %vm5637_vm8, %v596_v26, %v603_v30  ;;  %v615_v37 = vsel %vm5547_vm2, %v605_v31, %v614_v22  ;;  %v638_v39 = vrot.slane %v636_v32, 7 }
  0x74   : > { %613 = vst.msk [vmem:[#allocation2 + $0x4c] sm:$0xf] %vm380_vm6, %v604_v36  ;;  %v633_v40 = vor.u32 %v631_v28, %v630_v35  ;;  %v634_v41 = vrot.slane %v630_v35, 4 }
  0x75   : > { %616 = vst [vmem:[#allocation2 + $0x50] sm:$0x1] %v615_v37  ;;  %v641_v44 = vor.u32 %v639_v33, %v638_v39  ;;  %v643_v45 = vrot.slane %v638_v39, 4  ;;  %658 = sbr.rel (%p4290_p2) target bundleno = 129 (0x81), region = 56 }
  0x76   : > { %v649_v46 = vsel %vm5628_vm7, %v633_v40, %v648_v38 }
  0x77   : > { %650 = vst [vmem:[#allocation2 + $0x54] sm:$0xf] %v649_v46  ;;  %v642_v47 = vsel %vm5637_vm8, %v634_v41, %v641_v44  ;;  %v653_v48 = vsel %vm5547_vm2, %v643_v45, %v652_v42 }
  0x78   : > { %651 = vst.msk [vmem:[#allocation2 + $0x58] sm:$0xf] %vm380_vm6, %v642_v47 }
  0x79   : > { %654 = vst [vmem:[#allocation2 + $0x5c] sm:$0x1] %v653_v48 }
  0x7a   : > { %v5344_v49 = vmov 0  }
  0x7b   : > { %659 = vst.msk [vmem:[#allocation2] sm:$0xf] %vm380_vm6, %v5344_v49 }
  0x7c   : > { %660 = vst.msk [vmem:[#allocation2 + $0x4] sm:$0xf] %vm380_vm6, %v5344_v49 }
  0x7d   : > { %662 = vst.msk [vmem:[#allocation2 + $0x8] sm:$0x1] %vm295_vm0, %v5344_v49 }
  0x7e   : > { %663 = vst.msk [vmem:[#allocation2 + $0xc] sm:$0xf] %vm380_vm6, %v5344_v49 }
  0x7f   : > { %664 = vst.msk [vmem:[#allocation2 + $0x10] sm:$0xf] %vm380_vm6, %v5344_v49 }
  0x80   : > { %665 = vst.msk [vmem:[#allocation2 + $0x14] sm:$0x1] %vm295_vm0, %v5344_v49 }
  0x81 PF: > { %p4291_p3 = scmp.ne.s32.totalorder %s5322_s24, 1 }
  0x83   : > { %669 = sbr.rel (%p4291_p3) target bundleno = 143 (0x8f), region = 60 }
  0x88   : > { %v5345_v50 = vmov 0  }
  0x89   : > { %670 = vst.msk [vmem:[#allocation2 + $0x48] sm:$0xf] %vm380_vm6, %v5345_v50 }
  0x8a   : > { %671 = vst.msk [vmem:[#allocation2 + $0x4c] sm:$0xf] %vm380_vm6, %v5345_v50 }
  0x8b   : > { %673 = vst.msk [vmem:[#allocation2 + $0x50] sm:$0x1] %vm295_vm0, %v5345_v50 }
  0x8c   : > { %674 = vst.msk [vmem:[#allocation2 + $0x54] sm:$0xf] %vm380_vm6, %v5345_v50 }
  0x8d   : > { %675 = vst.msk [vmem:[#allocation2 + $0x58] sm:$0xf] %vm380_vm6, %v5345_v50 }
  0x8e   : > { %676 = vst.msk [vmem:[#allocation2 + $0x5c] sm:$0x1] %vm295_vm0, %v5345_v50 }
  0x8f PF: > { %v4869_v51 = vld [vmem:[#allocation6 + $0x38] sm:$0xff]  ;;  %v4868_v55 = vld [vmem:[#allocation6 + $0x30] sm:$0xff]  ;;  %vm703_vm9 = vsmask.f32 3328  ;;  %vm704_vm10 = vsmask.f32 7440 }
  0x90   : > { %v4865_v53 = vld [vmem:[#allocation6 + $0x18] sm:$0xff]  ;;  %924 = vmatpush.bf16.msra.mxu0 %v4869_v51  ;;  %v4864_v56 = vld [vmem:[#allocation6 + $0x10] sm:$0xff]  ;;  %vm1088_vm11 = vcmask 1042432   ;;  %vm1089_vm12 = vcmask 1046532   ;;  %v677_v58 = vld [vmem:[#allocation2] sm:$0xf] }
  0x91   : > { %v5749_v54 = vld [vmem:[#allocation6 + $0x58] sm:$0xff]  ;;  %1035 = vmatpush.bf16.msra.mxu1 %v4865_v53  ;;  %4980 = vmatpush.bf16.msra.mxu3 %v4865_v53  ;;  %v5752_v57 = vld [vmem:[#allocation6 + $0x50] sm:$0xff]  ;;  %v678_v59 = vld [vmem:[#allocation2 + $0x4] sm:$0xf]  ;;  %v707_v63 = vshrl.u32 %v677_v58, 16  ;;  %v710_v1 = vshll.u32 %v677_v58, 16 }
  0x92   : > { %1206 = vmatpush.bf16.msra.mxu2 %v5749_v54  ;;  %v697_v60 = vld [vmem:[#allocation2 + $0x8] sm:$0x1]  ;;  %v716_v2 = vshll.u32 %v678_v59, 16  ;;  %v720_v3 = vshrl.u32 %v678_v59, 16  ;;  %v1070_v6 = vld [vmem:[#allocation2] sm:$0xe]  ;;  %vm5759_vm13 = vmor %vm1088_vm11, %vm1089_vm12 }
  0x93   : > { %v4867_v61 = vld [vmem:[#allocation6 + $0x28] sm:$0xff]  ;;  %v726_v5 = vshll.u32 %v697_v60, 16  ;;  %v1093_v7 = vrot.slane %v678_v59, 5  ;;  %v1096_v8 = vrot.slane %v697_v60, 5  ;;  %v709_v9 = vrot.slane %v707_v63, 4  ;;  %v4866_v20 = vld [vmem:[#allocation6 + $0x20] sm:$0xff]  ;;  %vm5768_vm14 = vmor %vm703_vm9, %vm704_vm10 }
  0x94   : > { %v4863_v62 = vld [vmem:[#allocation6 + $0x8] sm:$0xff]  ;;  %925 = vmatpush.bf16.msra.mxu0 %v4868_v55  ;;  %v712_v10 = vrot.slane %v710_v1, 5  ;;  %v718_v11 = vrot.slane %v716_v2, 5  ;;  %v722_v12 = vrot.slane %v720_v3, 4  ;;  %v4360_v16 = vrot.slane %v1070_v6, 9  ;;  %v4862_v25 = vld [vmem:[#allocation6] sm:$0xff] }
  0x95   : > { %1036 = vmatpush.bf16.msra.mxu1 %v4864_v56  ;;  %v5754_v4 = vld [vmem:[#allocation6 + $0x48] sm:$0xff]  ;;  %4981 = vmatpush.bf16.msra.mxu3 %v4864_v56  ;;  %v728_v15 = vrot.slane %v726_v5, 5  ;;  %v1095_v17 = vrot.slane %v1093_v7, 4  ;;  %v5763_v18 = vld [vmem:[#allocation2 + $0x10] sm:$0xf]  ;;  %v5778_v32 = vld [vmem:[#allocation6 + $0x40] sm:$0xff] }
  0x96   : > { %1207 = vmatpush.bf16.msra.mxu2 %v5752_v57  ;;  %v679_v14 = vld [vmem:[#allocation2 + $0xc] sm:$0xf]  ;;  %v713_v21 = vor.u32 %v712_v10, %v709_v9  ;;  %v723_v22 = vor.u32 %v722_v12, %v718_v11  ;;  %v740_v24 = vshll.u32 %v5763_v18, 16  ;;  %v1094_v27 = vsel %vm5759_vm13, %v4360_v16, %v1093_v7  ;;  %v698_v29 = vld [vmem:[#allocation2 + $0x14] sm:$0x1]  ;;  %v4887_v37 = vld [vmem:[#allocation6 + $0x98] sm:$0xff] }
  0x97   : > { %v731_v19 = vshrl.u32 %v679_v14, 16  ;;  %v734_v23 = vshll.u32 %v679_v14, 16  ;;  %v1097_v28 = vsel %vm5759_vm13, %v1095_v17, %v1096_v8  ;;  %v744_v31 = vshrl.u32 %v5763_v18, 16  ;;  %v4856_v44 = vld [vmem:[#allocation2] sm:$0xff]  ;;  %v1071_v53 = vld [vmem:[#allocation2 + $0xc] sm:$0xe] }
  0x98   : > { %926 = vmatpush.bf16.msra.mxu0 %v4867_v61  ;;  %v714_v33 = vrot.slane %v713_v21, 4  ;;  %v724_v34 = vrot.slane %v723_v22, 4  ;;  %v1142_v35 = vunpack.c.l.b16 %v1094_v27  ;;  %v1143_v36 = vunpack.c.l.b16 %v1097_v28  ;;  %v5784_v46 = vld [vmem:[#allocation2 + $0x40] sm:$0xf]  ;;  %v1075_v58 = vld [vmem:[#allocation2 + $0x3c] sm:$0xe] }
  0x99   : > { %1037 = vmatpush.bf16.msra.mxu1 %v4863_v62  ;;  %v733_v30 = vrot.slane %v731_v19, 4  ;;  %4982 = vmatpush.bf16.msra.mxu3 %v4863_v62  ;;  %v736_v38 = vrot.slane %v734_v23, 5  ;;  %v742_v39 = vrot.slane %v740_v24, 5  ;;  %v746_v40 = vrot.slane %v744_v31, 4  ;;  %v4861_v49 = vld [vmem:[#allocation2 + $0x3c] sm:$0xff]  ;;  %v4886_v62 = vld [vmem:[#allocation6 + $0x90] sm:$0xff] }
  0x9a   : > { %1208 = vmatpush.bf16.msra.mxu2 %v5754_v4  ;;  %v719_v41 = vsel %vm5768_vm14, %v714_v33, %v718_v11  ;;  %v729_v42 = vsel %vm5768_vm14, %v724_v34, %v728_v15  ;;  %vm901_vm15 = vcmask 523264   ;;  %v750_v45 = vshll.u32 %v698_v29, 16  ;;  %v5789_v60 = vld [vmem:[#allocation2 + $0x44] sm:$0x1]  ;;  %v681_v8 = vld [vmem:[#allocation2 + $0x18] sm:$0xf] }
  0x9b   : > { %v859_v47 = vunpack.c.l.b16 %v719_v41  ;;  %v860_v48 = vunpack.c.l.b16 %v729_v42  ;;  %v737_v50 = vor.u32 %v736_v38, %v733_v30  ;;  %v747_v51 = vor.u32 %v746_v40, %v742_v39  ;;  %v682_v10 = vld [vmem:[#allocation2 + $0x1c] sm:$0xf]  ;;  %v699_v34 = vld [vmem:[#allocation2 + $0x20] sm:$0x1] }
  0x9c   : > { %927 = vmatpush.bf16.msra.mxu0 %v4866_v20  ;;  %v1154_v55 = vpack.c.b16 %v1143_v36, %v1142_v35  ;;  %v1100_v56 = vrot.slane %v5763_v18, 5  ;;  %v1128_v61 = vrot.slane %v5784_v46, 5  ;;  %v752_v63 = vrot.slane %v750_v45, 5  ;;  %v4883_v23 = vld [vmem:[#allocation6 + $0x78] sm:$0xff]  ;;  %v4857_v35 = vld [vmem:[#allocation2 + $0xc] sm:$0xff] }
  0x9d   : > { %1038 = vmatpush.bf16.msra.mxu1 %v4862_v25  ;;  %4983 = vmatpush.bf16.msra.mxu3 %v4862_v25  ;;  %v871_v59 = vpack.c.b16 %v860_v48, %v859_v47  ;;  %v4361_v1 = vrot.slane %v1071_v53, 9  ;;  %v1103_v2 = vrot.slane %v698_v29, 5  ;;  %v738_v3 = vrot.slane %v737_v50, 4  ;;  %v4882_v36 = vld [vmem:[#allocation6 + $0x70] sm:$0xff]  ;;  %v1072_v45 = vld [vmem:[#allocation2 + $0x18] sm:$0xe] }
  0x9e   : > { %1209 = vmatpush.bf16.msra.mxu2 %v5778_v32  ;;  %v748_v5 = vrot.slane %v747_v51, 4  ;;  %v1102_v6 = vrot.slane %v1100_v56, 4  ;;  %v4365_v7 = vrot.slane %v1075_v58, 9  ;;  %v1131_v9 = vrot.slane %v5789_v60, 5  ;;  %v684_v50 = vld [vmem:[#allocation2 + $0x28] sm:$0xf] }
  0x9f   : > { %4308 = vmatmul.msk.bf16.vlgmr.msra.gmra.mxu0 %vm901_vm15, %v871_v59  ;;  %v1101_v11 = vsel %vm5759_vm13, %v4361_v1, %v1100_v56  ;;  %v755_v12 = vshrl.u32 %v681_v8, 16  ;;  %v743_v14 = vsel %vm5768_vm14, %v738_v3, %v742_v39  ;;  %v758_v18 = vshll.u32 %v681_v8, 16  ;;  %v4885_v51 = vld [vmem:[#allocation6 + $0x88] sm:$0xff]  ;;  %v4880_v58 = vld [vmem:[#allocation6 + $0x60] sm:$0xff] }
  0xa0   : > { %1632 = vmatpush.bf16.msrb.mxu0 %v4887_v37  ;;  %4354 = vmatmul.msk.bf16.vlgmr.msra.gmra.mxu1 %vm901_vm15, %v4856_v44  ;;  %v753_v15 = vsel %vm5768_vm14, %v748_v5, %v752_v63  ;;  %v1104_v16 = vsel %vm5759_vm13, %v1102_v6, %v1103_v2  ;;  %v1129_v17 = vsel %vm5759_vm13, %v4365_v7, %v1128_v61  ;;  %v764_v19 = vshll.u32 %v682_v10, 16  ;;  %v4881_v44 = vld [vmem:[#allocation6 + $0x68] sm:$0xff] }
  0xa1   : > { %4984 = vmatpush.bf16.msrb.mxu3 %v5749_v54  ;;  %4382 = vmatmul.msk.bf16.vlgmr.msra.gmra.mxu2 %vm901_vm15, %v1154_v55  ;;  %v1130_v54 = vrot.slane %v1128_v61, 4  ;;  %v768_v20 = vshrl.u32 %v682_v10, 16  ;;  %v861_v21 = vunpack.c.l.b16 %v743_v14  ;;  %v1144_v22 = vunpack.c.l.b16 %v1101_v11 }
  0xa2   : > { %4359 = vmatmul.msk.bf16.vlgmr.msra.gmra.mxu3 %vm901_vm15, %v4861_v49  ;;  %v862_v24 = vunpack.c.l.b16 %v753_v15  ;;  %v1145_v25 = vunpack.c.l.b16 %v1104_v16  ;;  %v1152_v27 = vunpack.c.l.b16 %v1129_v17  ;;  %v757_v29 = vrot.slane %v755_v12, 4  ;;  %v4858_v15 = vld [vmem:[#allocation2 + $0x18] sm:$0xff] }
  0xa3   : > { %v760_v30 = vrot.slane %v758_v18, 5  ;;  %v766_v31 = vrot.slane %v764_v19, 5  ;;  %v770_v33 = vrot.slane %v768_v20, 4  ;;  %v774_v41 = vshll.u32 %v699_v34, 16  ;;  %v1073_v20 = vld [vmem:[#allocation2 + $0x24] sm:$0xe] }
  0xa4   : > { %1633 = vmatpush.bf16.msrb.mxu0 %v4886_v62  ;;  %v872_v37 = vpack.c.b16 %v862_v24, %v861_v21  ;;  %v1107_v42 = vrot.slane %v682_v10, 5  ;;  %v4362_v53 = vrot.slane %v1072_v45, 9  ;;  %v1110_v56 = vrot.slane %v699_v34, 5  ;;  %v686_v34 = vld [vmem:[#allocation2 + $0x34] sm:$0xf] }
  0xa5   : > { %4985 = vmatpush.bf16.msrb.mxu3 %v5752_v57  ;;  %v1132_v57 = vsel %vm5759_vm13, %v1130_v54, %v1131_v9  ;;  %v761_v39 = vor.u32 %v760_v30, %v757_v29  ;;  %v771_v40 = vor.u32 %v770_v33, %v766_v31  ;;  %v776_v49 = vrot.slane %v774_v41, 5  ;;  %v700_v9 = vld [vmem:[#allocation2 + $0x2c] sm:$0x1]  ;;  %v4884_v30 = vld [vmem:[#allocation6 + $0x80] sm:$0xff]  ;;  %v685_v33 = vld [vmem:[#allocation2 + $0x30] sm:$0xf] }
  0xa6   : > { %v1153_v28 = vunpack.c.l.b16 %v1132_v57  ;;  %v1109_v55 = vrot.slane %v1107_v42, 4  ;;  %v788_v62 = vshll.u32 %v684_v50, 16  ;;  %v792_v63 = vshrl.u32 %v684_v50, 16  ;;  %v4874_v57 = vld [vmem:[#allocation2 + $0xc] sm:$0xff] }
  0xa7   : > { %v762_v47 = vrot.slane %v761_v39, 4  ;;  %v772_v48 = vrot.slane %v771_v40, 4  ;;  %v1108_v3 = vsel %vm5759_vm13, %v4362_v53, %v1107_v42  ;;  %v798_v16 = vshll.u32 %v700_v9, 16  ;;  %v4859_v53 = vld [vmem:[#allocation2 + $0x24] sm:$0xff] }
  0xa8   : > { %v1159_v38 = vpack.c.b16 %v1153_v28, %v1152_v27  ;;  %1634 = vmatpush.bf16.msrb.mxu0 %v4885_v51  ;;  %v1111_v5 = vsel %vm5759_vm13, %v1109_v55, %v1110_v56  ;;  %v790_v10 = vrot.slane %v788_v62, 5  ;;  %v794_v11 = vrot.slane %v792_v63, 4  ;;  %v701_v51 = vld [vmem:[#allocation2 + $0x38] sm:$0x1] }
  0xa9   : > { %4986 = vmatpush.bf16.msrb.mxu3 %v5754_v4  ;;  %v1155_v4 = vpack.c.b16 %v1145_v25, %v1144_v22  ;;  %v767_v1 = vsel %vm5768_vm14, %v762_v47, %v766_v31  ;;  %v777_v2 = vsel %vm5768_vm14, %v772_v48, %v776_v49  ;;  %v1146_v12 = vunpack.c.l.b16 %v1108_v3  ;;  %v4901_v31 = vld [vmem:[#allocation6 + $0xd8] sm:$0xff]  ;;  %v4900_v3 = vld [vmem:[#allocation6 + $0xd0] sm:$0xff] }
  0xaa   : > { %v863_v8 = vunpack.c.l.b16 %v767_v1  ;;  %v864_v54 = vunpack.c.l.b16 %v777_v2  ;;  %v1147_v14 = vunpack.c.l.b16 %v1111_v5  ;;  %v795_v19 = vor.u32 %v794_v11, %v790_v10  ;;  %1962 = vmatpush.bf16.msrb.mxu2 %v4901_v31  ;;  %v4875_v56 = vld [vmem:[#allocation2 + $0x18] sm:$0xff]  ;;  %v1074_v1 = vld [vmem:[#allocation2 + $0x30] sm:$0xe] }
  0xab   : > { %v1114_v21 = vrot.slane %v684_v50, 5  ;;  %v4363_v24 = vrot.slane %v1073_v20, 9  ;;  %v1117_v29 = vrot.slane %v700_v9, 5  ;;  %v806_v39 = vshll.u32 %v685_v33, 16  ;;  %v4891_v2 = vld [vmem:[#allocation6 + $0xb8] sm:$0xff] }
  0xac   : > { %v873_v17 = vpack.c.b16 %v864_v54, %v863_v8  ;;  %v1156_v22 = vpack.c.b16 %v1147_v14, %v1146_v12  ;;  %v796_v27 = vrot.slane %v795_v19, 4  ;;  %1635 = vmatpush.bf16.msrb.mxu0 %v4884_v30  ;;  %v812_v40 = vshll.u32 %v686_v34, 16  ;;  %v687_v8 = vld [vmem:[#allocation2 + $0x3c] sm:$0xf]  ;;  %1818 = vmatpush.bf16.msrb.mxu1 %v4891_v2  ;;  %v4890_v12 = vld [vmem:[#allocation6 + $0xb0] sm:$0xff]  ;;  %v4899_v14 = vld [vmem:[#allocation6 + $0xc8] sm:$0xff] }
  0xad   : > { %4987 = vmatpush.bf16.msrb.mxu3 %v5778_v32  ;;  %v683_v32 = vld [vmem:[#allocation2 + $0x24] sm:$0xf]  ;;  %v1116_v28 = vrot.slane %v1114_v21, 4  ;;  %v816_v41 = vshrl.u32 %v686_v34, 16  ;;  %v808_v48 = vrot.slane %v806_v39, 5  ;;  %v822_v62 = vshll.u32 %v701_v51, 16 }
  0xae   : > { %v779_v59 = vshrl.u32 %v683_v32, 16  ;;  %v782_v61 = vshll.u32 %v683_v32, 16  ;;  %v814_v49 = vrot.slane %v812_v40, 5  ;;  %v1121_v63 = vrot.slane %v686_v34, 5  ;;  %v4905_v54 = vld [vmem:[#allocation6 + $0xf8] sm:$0xff]  ;;  %1963 = vmatpush.bf16.msrb.mxu2 %v4900_v3  ;;  %v4860_v34 = vld [vmem:[#allocation2 + $0x30] sm:$0xff] }
  0xaf   : > { %4309 = vmatmul.msk.bf16.gmra.mxu0 %vm901_vm15, %v872_v37  ;;  %v1115_v37 = vsel %vm5759_vm13, %v4363_v24, %v1114_v21  ;;  %v818_v50 = vrot.slane %v816_v41, 4  ;;  %v4364_v9 = vrot.slane %v1074_v1, 9  ;;  %v1124_v11 = vrot.slane %v701_v51, 5  ;;  %v1397_v51 = vld [vmem:[#allocation2 + $0xc] sm:$0xf] }
  0xb0   : > { %4355 = vmatmul.msk.bf16.gmra.mxu1 %vm901_vm15, %v4857_v35  ;;  %v781_v6 = vrot.slane %v779_v59, 4  ;;  %v784_v7 = vrot.slane %v782_v61, 5  ;;  %v1148_v45 = vunpack.c.l.b16 %v1115_v37  ;;  %v1398_v37 = vld [vmem:[#allocation2 + $0x10] sm:$0xf] }
  0xb1   : > { %1350 = vmatpush.bf16.msra.mxu3 %v4883_v23  ;;  %4383 = vmatmul.msk.bf16.gmra.mxu2 %vm901_vm15, %v1155_v4  ;;  %v800_v23 = vrot.slane %v798_v16, 5  ;;  %v803_v4 = vshrl.u32 %v685_v33, 16  ;;  %v819_v61 = vor.u32 %v818_v50, %v814_v49  ;;  %v840_v16 = vshrl.u32 %v5784_v46, 16  ;;  %v4888_v33 = vld [vmem:[#allocation6 + $0xa0] sm:$0xff] }
  0xb2   : > { %4387 = vmatmul.msk.bf16.vlgmr.msrb.gmra.mxu3 %vm901_vm15, %v1159_v38  ;;  %v785_v18 = vor.u32 %v784_v7, %v781_v6  ;;  %v1118_v38 = vsel %vm5759_vm13, %v1116_v28, %v1117_v29  ;;  %v824_v7 = vrot.slane %v822_v62, 5  ;;  %v1122_v20 = vsel %vm5759_vm13, %v4364_v9, %v1121_v63  ;;  %1819 = vmatpush.bf16.msrb.mxu1 %v4890_v12  ;;  %v4877_v12 = vld [vmem:[#allocation2 + $0x30] sm:$0xff] }
  0xb3   : > { %v1149_v32 = vunpack.c.l.b16 %v1118_v38  ;;  %v805_v47 = vrot.slane %v803_v4, 4  ;;  %v820_v6 = vrot.slane %v819_v61, 4  ;;  %1964 = vmatpush.bf16.msrb.mxu2 %v4899_v14  ;;  %v842_v24 = vrot.slane %v840_v16, 4  ;;  %v4876_v4 = vld [vmem:[#allocation2 + $0x24] sm:$0xff] }
  0xb4   : > { %v786_v25 = vrot.slane %v785_v18, 4  ;;  %v1150_v30 = vunpack.c.l.b16 %v1122_v20  ;;  %v1705_v40 = vrot.slane %v1398_v37, 5  ;;  %v1419_v61 = vshll.u32 %v1397_v51, 16  ;;  %v1402_v20 = vld [vmem:[#allocation2 + $0x20] sm:$0x1] }
  0xb5   : > { %1351 = vmatpush.bf16.msra.mxu3 %v4882_v36  ;;  %v801_v36 = vsel %vm5768_vm14, %v796_v27, %v800_v23  ;;  %v809_v59 = vor.u32 %v808_v48, %v805_v47  ;;  %v825_v19 = vsel %vm5768_vm14, %v820_v6, %v824_v7  ;;  %v4898_v23 = vld [vmem:[#allocation6 + $0xc0] sm:$0xff]  ;;  %v4909_v48 = vld [vmem:[#allocation6 + $0x118] sm:$0xff]  ;;  %v1425_v62 = vshll.u32 %v1398_v37, 16 }
  0xb6   : > { %v791_v35 = vsel %vm5768_vm14, %v786_v25, %v790_v10  ;;  %v1123_v10 = vrot.slane %v1121_v63, 4  ;;  %v868_v27 = vunpack.c.l.b16 %v825_v19  ;;  %2430 = vmatpush.bf16.msra.mxu0 %v4909_v48  ;;  %v1429_v63 = vshrl.u32 %v1398_v37, 16  ;;  %v1400_v19 = vld [vmem:[#allocation2 + $0x18] sm:$0xf] }
  0xb7   : > { %v865_v42 = vunpack.c.l.b16 %v791_v35  ;;  %v810_v5 = vrot.slane %v809_v59, 4  ;;  %1965 = vmatpush.bf16.msrb.mxu2 %v4898_v23  ;;  %v1416_v59 = vshrl.u32 %v1397_v51, 16  ;;  %v1421_v7 = vrot.slane %v1419_v61, 5  ;;  %v4878_v51 = vld [vmem:[#allocation2 + $0x3c] sm:$0xff]  ;;  %v1681_v61 = vld [vmem:[#allocation2 + $0x24] sm:$0xe] }
  0xb8   : > { %v1125_v21 = vsel %vm5759_vm13, %v1123_v10, %v1124_v11  ;;  %v1401_v10 = vld [vmem:[#allocation2 + $0x1c] sm:$0xf] }
  0xb9   : > { %1352 = vmatpush.bf16.msra.mxu3 %v4881_v44  ;;  %v866_v44 = vunpack.c.l.b16 %v801_v36  ;;  %v815_v18 = vsel %vm5768_vm14, %v810_v5, %v814_v49  ;;  %v1151_v31 = vunpack.c.l.b16 %v1125_v21  ;;  %v846_v36 = vshll.u32 %v5789_v60, 16  ;;  %v4904_v21 = vld [vmem:[#allocation6 + $0xf0] sm:$0xff] }
  0xba   : > { %v867_v25 = vunpack.c.l.b16 %v815_v18  ;;  %v1707_v49 = vrot.slane %v1705_v40, 4  ;;  %v1418_v6 = vrot.slane %v1416_v59, 4  ;;  %v1712_v14 = vrot.slane %v1401_v10, 5  ;;  %v1680_v18 = vld [vmem:[#allocation2 + $0x18] sm:$0xe]  ;;  %v4893_v59 = vld [vmem:[#allocation2 + $0x24] sm:$0xff] }
  0xbb   : > { %v874_v55 = vpack.c.b16 %v866_v44, %v865_v42  ;;  %v1158_v41 = vpack.c.b16 %v1151_v31, %v1150_v30  ;;  %v1679_v42 = vld [vmem:[#allocation2 + $0xc] sm:$0xe]  ;;  %v1443_v30 = vshll.u32 %v1400_v19, 16 }
  0xbc   : > { %v875_v38 = vpack.c.b16 %v868_v27, %v867_v25  ;;  %v4456_v60 = vrot.slane %v1679_v42, 9  ;;  %v1422_v16 = vor.u32 %v1421_v7, %v1418_v6  ;;  %v1714_v23 = vrot.slane %v1712_v14, 4  ;;  %v4903_v31 = vld [vmem:[#allocation6 + $0xe8] sm:$0xff]  ;;  %v2009_v6 = vld [vmem:[#allocation2 + $0x18] sm:$0xf] }
  0xbd   : > { %1353 = vmatpush.bf16.msra.mxu3 %v4880_v58  ;;  %v1157_v58 = vpack.c.b16 %v1149_v32, %v1148_v45  ;;  %v848_v45 = vrot.slane %v846_v36, 5  ;;  %v1399_v32 = vld [vmem:[#allocation2 + $0x14] sm:$0x1]  ;;  %v4458_v7 = vrot.slane %v1681_v61, 9 }
  0xbe   : > { %v1708_v50 = vrot.slane %v1399_v32, 5  ;;  %v1423_v25 = vrot.slane %v1422_v16, 4  ;;  %v2031_v16 = vshll.u32 %v2009_v6, 16 }
  0xbf   : > { %4310 = vmatmul.msk.bf16.gmra.mxu0 %vm901_vm15, %v873_v17  ;;  %v827_v17 = vshrl.u32 %v687_v8, 16 }
  0xc0   : > { %4356 = vmatmul.msk.bf16.gmra.mxu1 %vm901_vm15, %v4858_v15  ;;  %v836_v15 = vshll.u32 %v5784_v46, 16 }
  0xc1   : > { %4384 = vmatmul.msk.bf16.gmra.mxu2 %vm901_vm15, %v1156_v22  ;;  %2244 = vmatpush.bf16.msrb.mxu3 %v4905_v54  ;;  %v4889_v22 = vld [vmem:[#allocation6 + $0xa8] sm:$0xff]  ;;  %v829_v28 = vrot.slane %v827_v17, 4  ;;  %v1431_v54 = vrot.slane %v1429_v63, 4 }
  0xc2   : > { %4428 = vmatmul.msk.bf16.vlgmr.msra.gmra.mxu3 %vm901_vm15, %v4874_v57  ;;  %v830_v57 = vshll.u32 %v687_v8, 16  ;;  %v838_v46 = vrot.slane %v836_v15, 5  ;;  %1820 = vmatpush.bf16.msrb.mxu1 %v4889_v22  ;;  %v1427_v8 = vrot.slane %v1425_v62, 5  ;;  %v4892_v15 = vld [vmem:[#allocation2 + $0x18] sm:$0xff]  ;;  %v4457_v22 = vrot.slane %v1680_v18, 9 }
  0xc4   : > { %v832_v29 = vrot.slane %v830_v57, 5  ;;  %v843_v35 = vor.u32 %v842_v24, %v838_v46  ;;  %v1432_v17 = vor.u32 %v1431_v54, %v1427_v8  ;;  %v1435_v57 = vshll.u32 %v1399_v32, 16  ;;  %v4908_v24 = vld [vmem:[#allocation6 + $0x110] sm:$0xff] }
  0xc5   : > { %2245 = vmatpush.bf16.msrb.mxu3 %v4904_v21  ;;  %2431 = vmatpush.bf16.msra.mxu0 %v4908_v24  ;;  %v1428_v37 = vsel %vm5768_vm14, %v1423_v25, %v1427_v8  ;;  %v2033_v24 = vrot.slane %v2031_v16, 5 }
  0xc6   : > { %v833_v39 = vor.u32 %v832_v29, %v829_v28  ;;  %1821 = vmatpush.bf16.msrb.mxu1 %v4888_v33  ;;  %v844_v44 = vrot.slane %v843_v35, 4  ;;  %v1433_v27 = vrot.slane %v1432_v17, 4  ;;  %v1437_v28 = vrot.slane %v1435_v57, 5 }
  0xc7   : > { %v1440_v29 = vshrl.u32 %v1400_v19, 16  ;;  %v1449_v33 = vshll.u32 %v1401_v10, 16  ;;  %v1713_v35 = vsel %vm5759_vm13, %v4457_v22, %v1712_v14 }
  0xc8   : > { %v834_v47 = vrot.slane %v833_v39, 4  ;;  %v1445_v39 = vrot.slane %v1443_v30, 5  ;;  %v1756_v42 = vunpack.c.l.b16 %v1713_v35 }
  0xc9   : > { %2246 = vmatpush.bf16.msrb.mxu3 %v4903_v31 }
  0xcf   : > { %4311 = vmatmul.msk.bf16.gmra.mxu0 %vm901_vm15, %v874_v55  ;;  %v849_v55 = vsel %vm5768_vm14, %v844_v44, %v848_v45  ;;  %v1568_v45 = vunpack.c.l.b16 %v1428_v37 }
  0xd0   : > { %4357 = vmatmul.msk.bf16.gmra.mxu1 %vm901_vm15, %v4859_v53  ;;  %v839_v53 = vsel %vm5768_vm14, %v834_v47, %v838_v46  ;;  %v870_v5 = vunpack.c.l.b16 %v849_v55  ;;  %v1715_v46 = vrot.slane %v1402_v20, 5  ;;  %v4902_v55 = vld [vmem:[#allocation6 + $0xe0] sm:$0xff] }
  0xd1   : > { %4385 = vmatmul.msk.bf16.gmra.mxu2 %vm901_vm15, %v1157_v58  ;;  %v1709_v58 = vsel %vm5759_vm13, %v1707_v49, %v1708_v50  ;;  %v869_v3 = vunpack.c.l.b16 %v839_v53  ;;  %v1404_v50 = vld [vmem:[#allocation2 + $0x28] sm:$0xf]  ;;  %2247 = vmatpush.bf16.msrb.mxu3 %v4902_v55 }
  0xd2   : > { %4429 = vmatmul.msk.bf16.gmra.mxu3 %vm901_vm15, %v4875_v56  ;;  %v1706_v56 = vsel %vm5759_vm13, %v4456_v60, %v1705_v40  ;;  %v1755_v2 = vunpack.c.l.b16 %v1709_v58  ;;  %v1716_v36 = vsel %vm5759_vm13, %v1714_v23, %v1715_v46  ;;  %v1451_v40 = vrot.slane %v1449_v33, 5  ;;  %v4907_v55 = vld [vmem:[#allocation6 + $0x108] sm:$0xff] }
  0xd3   : > { %v1754_v1 = vunpack.c.l.b16 %v1706_v56  ;;  %v876_v11 = vpack.c.b16 %v870_v5, %v869_v3  ;;  %v1757_v44 = vunpack.c.l.b16 %v1716_v36  ;;  %v1459_v60 = vshll.u32 %v1402_v20, 16  ;;  %v1403_v56 = vld [vmem:[#allocation2 + $0x24] sm:$0xf]  ;;  %2432 = vmatpush.bf16.msra.mxu0 %v4907_v55 }
  0xd4   : > { %v1719_v58 = vrot.slane %v1404_v50, 5  ;;  %v1464_v3 = vshrl.u32 %v1403_v56, 16  ;;  %v1467_v5 = vshll.u32 %v1403_v56, 16 }
  0xd5   : > { %v1766_v9 = vpack.c.b16 %v1755_v2, %v1754_v1  ;;  %v1767_v49 = vpack.c.b16 %v1757_v44, %v1756_v42  ;;  %v1461_v1 = vrot.slane %v1459_v60, 5  ;;  %v1405_v2 = vld [vmem:[#allocation2 + $0x2c] sm:$0x1]  ;;  %v4894_v44 = vld [vmem:[#allocation2 + $0x30] sm:$0xff] }
  0xd6   : > { %v1721_v8 = vrot.slane %v1719_v58, 4  ;;  %v1722_v54 = vrot.slane %v1405_v2, 5  ;;  %v1466_v17 = vrot.slane %v1464_v3, 4  ;;  %v1469_v57 = vrot.slane %v1467_v5, 5  ;;  %v1682_v60 = vld [vmem:[#allocation2 + $0x30] sm:$0xe] }
  0xd7   : > { %v1720_v18 = vsel %vm5759_vm13, %v4458_v7, %v1719_v58  ;;  %v1483_v33 = vshll.u32 %v1405_v2, 16  ;;  %v4459_v56 = vrot.slane %v1682_v60, 9  ;;  %v5902_v2 = vld [vmem:[#allocation2 + $0x28] sm:$0xf] }
  0xd8   : > { %v1723_v19 = vsel %vm5759_vm13, %v1721_v8, %v1722_v54  ;;  %v1758_v25 = vunpack.c.l.b16 %v1720_v18  ;;  %v1470_v30 = vor.u32 %v1469_v57, %v1466_v17 }
  0xdf   : > { %4312 = vmatmul.msk.bf16.gmra.mxu0 %vm901_vm15, %v875_v38  ;;  %v1438_v38 = vsel %vm5768_vm14, %v1433_v27, %v1437_v28  ;;  %v1759_v27 = vunpack.c.l.b16 %v1723_v19 }
  0xe0   : > { %4358 = vmatmul.msk.bf16.gmra.mxu1 %vm901_vm15, %v4860_v34  ;;  %v1453_v34 = vshrl.u32 %v1401_v10, 16  ;;  %v1569_v32 = vunpack.c.l.b16 %v1438_v38  ;;  %v1477_v10 = vshrl.u32 %v1404_v50, 16 }
  0xe1   : > { %4386 = vmatmul.msk.bf16.gmra.mxu2 %vm901_vm15, %v1158_v41  ;;  %v1768_v38 = vpack.c.b16 %v1759_v27, %v1758_v25 }
  0xe2   : > { %4430 = vmatmul.msk.bf16.gmra.mxu3 %vm901_vm15, %v4876_v4  ;;  %v1442_v4 = vrot.slane %v1440_v29, 4  ;;  %v1455_v41 = vrot.slane %v1453_v34, 4  ;;  %v1580_v53 = vpack.c.b16 %v1569_v32, %v1568_v45  ;;  %v1479_v21 = vrot.slane %v1477_v10, 4  ;;  %v5891_v34 = vld [vmem:[#allocation2 + $0x20] sm:$0x1] }
  0xe3   : > { %v1471_v45 = vrot.slane %v1470_v30, 4  ;;  %v2065_v10 = vshrl.u32 %v5902_v2, 16 }
  0xe4   : > { %v1446_v47 = vor.u32 %v1445_v39, %v1442_v4  ;;  %v1456_v48 = vor.u32 %v1455_v41, %v1451_v40  ;;  %v1407_v4 = vld [vmem:[#allocation2 + $0x34] sm:$0xf]  ;;  %v4879_v39 = vld [vmem:[#allocation2 + $0x48] sm:$0xff]  ;;  %v2047_v41 = vshll.u32 %v5891_v34, 16 }
  0xe5   : > { %v1726_v42 = vrot.slane %v1407_v4, 5  ;;  %v1501_v7 = vshrl.u32 %v1407_v4, 16  ;;  %v2067_v30 = vrot.slane %v2065_v10, 4 }
  0xe6   : > { %v1447_v62 = vrot.slane %v1446_v47, 4  ;;  %v1457_v63 = vrot.slane %v1456_v48, 4  ;;  %v1485_v47 = vrot.slane %v1483_v33, 5 }
  0xe7   : > { %v1728_v58 = vrot.slane %v1726_v42, 4 }
  0xe8   : > { %v1462_v14 = vsel %vm5768_vm14, %v1457_v63, %v1461_v1  ;;  %v2049_v1 = vrot.slane %v2047_v41, 5 }
  0xe9   : > { %v1571_v29 = vunpack.c.l.b16 %v1462_v14 }
  0xef   : > { %4313 = vmatmul.msk.bf16.gmra.mxu0 %vm901_vm15, %v876_v11  ;;  %v5879_v11 = vld [vmem:[#allocation2 + $0x1c] sm:$0xf] }
  0xf0   : > { %4478 = vmatmul.msk.bf16.vlgmr.msrb.gmra.mxu1 %vm901_vm15, %v1766_v9  ;;  %v1473_v9 = vshll.u32 %v1404_v50, 16  ;;  %v2037_v22 = vshll.u32 %v5879_v11, 16  ;;  %v2041_v23 = vshrl.u32 %v5879_v11, 16  ;;  %v1406_v50 = vld [vmem:[#allocation2 + $0x30] sm:$0xf] }
  0xf1   : > { %4524 = vmatmul.msk.bf16.vlgmr.msrb.gmra.mxu2 %vm901_vm15, %v4892_v15  ;;  %v2028_v15 = vshrl.u32 %v2009_v6, 16  ;;  %v1488_v3 = vshrl.u32 %v1406_v50, 16  ;;  %v1491_v5 = vshll.u32 %v1406_v50, 16  ;;  %v1497_v6 = vshll.u32 %v1407_v4, 16  ;;  %v1410_v4 = vld [vmem:[#allocation2 + $0x40] sm:$0xf] }
  0xf2   : > { %4431 = vmatmul.msk.bf16.gmra.mxu3 %vm901_vm15, %v4877_v12  ;;  %v1452_v12 = vsel %vm5768_vm14, %v1447_v62, %v1451_v40  ;;  %v1475_v20 = vrot.slane %v1473_v9, 5  ;;  %v2039_v35 = vrot.slane %v2037_v22, 5  ;;  %v2043_v36 = vrot.slane %v2041_v23, 4 }
  0xf3   : > { %v2030_v46 = vrot.slane %v2028_v15, 4  ;;  %v1570_v28 = vunpack.c.l.b16 %v1452_v12  ;;  %v2061_v9 = vshll.u32 %v5902_v2, 16  ;;  %v1727_v12 = vsel %vm5759_vm13, %v4459_v56, %v1726_v42  ;;  %v5924_v56 = vld [vmem:[#allocation2 + $0x44] sm:$0x1] }
  0xf4   : > { %v1480_v31 = vor.u32 %v1479_v21, %v1475_v20  ;;  %v2044_v48 = vor.u32 %v2043_v36, %v2039_v35  ;;  %v1476_v61 = vsel %vm5768_vm14, %v1471_v45, %v1475_v20  ;;  %v1490_v18 = vrot.slane %v1488_v3, 4 }
  0xf5   : > { %v2034_v37 = vor.u32 %v2033_v24, %v2030_v46  ;;  %v1581_v40 = vpack.c.b16 %v1571_v29, %v1570_v28  ;;  %v1572_v15 = vunpack.c.l.b16 %v1476_v61  ;;  %v1493_v19 = vrot.slane %v1491_v5, 5  ;;  %v5916_v28 = vld [vmem:[#allocation2 + $0x2c] sm:$0x1]  ;;  %v5928_v61 = vld [vmem:[#allocation2 + $0x34] sm:$0xf] }
  0xf6   : > { %v1481_v32 = vrot.slane %v1480_v31, 4  ;;  %v2045_v63 = vrot.slane %v2044_v48, 4  ;;  %v5914_v20 = vrot.slane %v1497_v6, 5  ;;  %v1503_v21 = vrot.slane %v1501_v7, 4 }
  0xf7   : > { %v1760_v46 = vunpack.c.l.b16 %v1727_v12  ;;  %v5918_v29 = vrot.slane %v2061_v9, 5  ;;  %v1494_v31 = vor.u32 %v1493_v19, %v1490_v18  ;;  %v1521_v6 = vshll.u32 %v1410_v4, 16 }
  0xf8   : > { %v1486_v62 = vsel %vm5768_vm14, %v1481_v32, %v1485_v47  ;;  %v2050_v57 = vsel %vm5768_vm14, %v2045_v63, %v2049_v1  ;;  %v1504_v33 = vor.u32 %v1503_v21, %v5914_v20  ;;  %v4895_v32 = vld [vmem:[#allocation2 + $0x3c] sm:$0xff]  ;;  %v1736_v1 = vrot.slane %v5924_v56, 5 }
  0xf9   : > { %v1573_v16 = vunpack.c.l.b16 %v1486_v62  ;;  %v2181_v27 = vunpack.c.l.b16 %v2050_v57  ;;  %v2068_v42 = vor.u32 %v2067_v30, %v5918_v29  ;;  %v1683_v47 = vld [vmem:[#allocation2 + $0x3c] sm:$0xe]  ;;  %v1495_v60 = vrot.slane %v1494_v31, 4  ;;  %v4906_v31 = vld [vmem:[#allocation6 + $0x100] sm:$0xff] }
  0xfa   : > { %v4460_v62 = vrot.slane %v1683_v47, 9  ;;  %v1525_v7 = vshrl.u32 %v1410_v4, 16  ;;  %2433 = vmatpush.bf16.msra.mxu0 %v4906_v31 }
  0xfb   : > { %v1500_v10 = vsel %vm5768_vm14, %v1495_v60, %v5914_v20 }
  0xff   : > { %4450 = vmatmul.msk.bf16.vlgmr.msrb.gmra.mxu0 %vm901_vm15, %v1580_v53  ;;  %v2012_v53 = vld [vmem:[#allocation2 + $0x24] sm:$0xf] }
 0x100   : > { %4479 = vmatmul.msk.bf16.gmra.mxu1 %vm901_vm15, %v1767_v49  ;;  %v2035_v49 = vrot.slane %v2034_v37, 4  ;;  %v2052_v8 = vshrl.u32 %v2012_v53, 16  ;;  %v2055_v54 = vshll.u32 %v2012_v53, 16  ;;  %v2071_v37 = vshll.u32 %v5916_v28, 16  ;;  %v1409_v53 = vld [vmem:[#allocation2 + $0x3c] sm:$0xf] }
 0x101   : > { %4525 = vmatmul.msk.bf16.gmra.mxu2 %vm901_vm15, %v4893_v59  ;;  %v1512_v3 = vshrl.u32 %v1409_v53, 16  ;;  %v1515_v5 = vshll.u32 %v1409_v53, 16 }
 0x102   : > { %4432 = vmatmul.msk.bf16.gmra.mxu3 %vm901_vm15, %v4878_v51  ;;  %v1408_v51 = vld [vmem:[#allocation2 + $0x38] sm:$0x1]  ;;  %v2040_v17 = vsel %vm5768_vm14, %v2035_v49, %v2039_v35  ;;  %v2054_v22 = vrot.slane %v2052_v8, 4  ;;  %v2057_v23 = vrot.slane %v2055_v54, 5  ;;  %v1505_v49 = vrot.slane %v1504_v33, 4 }
 0x103   : > { %v1729_v59 = vrot.slane %v1408_v51, 5  ;;  %v2180_v25 = vunpack.c.l.b16 %v2040_v17  ;;  %v1507_v35 = vshll.u32 %v1408_v51, 16  ;;  %v2073_v55 = vrot.slane %v2071_v37, 5 }
 0x104   : > { %v2058_v36 = vor.u32 %v2057_v23, %v2054_v22  ;;  %v1514_v23 = vrot.slane %v1512_v3, 4 }
 0x105   : > { %v1730_v14 = vsel %vm5759_vm13, %v1728_v58, %v1729_v59  ;;  %v2192_v41 = vpack.c.b16 %v2181_v27, %v2180_v25  ;;  %v1509_v50 = vrot.slane %v1507_v35, 5  ;;  %v2015_v58 = vld [vmem:[#allocation2 + $0x30] sm:$0xf]  ;;  %v2069_v59 = vrot.slane %v2068_v42, 4 }
 0x106   : > { %v1761_v24 = vunpack.c.l.b16 %v1730_v14  ;;  %v2059_v51 = vrot.slane %v2058_v36, 4  ;;  %v2076_v8 = vshrl.u32 %v2015_v58, 16  ;;  %v2079_v54 = vshll.u32 %v2015_v58, 16 }
 0x107   : > { %v1510_v12 = vsel %vm5768_vm14, %v1505_v49, %v1509_v50  ;;  %v2085_v14 = vshll.u32 %v5928_v61, 16  ;;  %v2074_v18 = vsel %vm5768_vm14, %v2069_v59, %v2073_v55  ;;  %v1527_v27 = vrot.slane %v1525_v7, 4  ;;  %v1413_v50 = vld [vmem:[#allocation2 + $0x4c] sm:$0xf] }
 0x108   : > { %v2064_v57 = vsel %vm5768_vm14, %v2059_v51, %v5918_v29  ;;  %v2078_v30 = vrot.slane %v2076_v8, 4  ;;  %v2081_v29 = vrot.slane %v2079_v54, 5  ;;  %v1740_v59 = vrot.slane %v1413_v50, 5 }
 0x109   : > { %v5954_v33 = vrot.slane %v2085_v14, 5  ;;  %v1412_v14 = vld [vmem:[#allocation2 + $0x48] sm:$0xf] }
 0x10f   : > { %4451 = vmatmul.msk.bf16.gmra.mxu0 %vm901_vm15, %v1581_v40  ;;  %v1582_v40 = vpack.c.b16 %v1573_v16, %v1572_v15  ;;  %v2089_v15 = vshrl.u32 %v5928_v61, 16 }
 0x110   : > { %4480 = vmatmul.msk.bf16.gmra.mxu1 %vm901_vm15, %v1768_v38  ;;  %v1769_v38 = vpack.c.b16 %v1761_v24, %v1760_v46  ;;  %v1517_v46 = vrot.slane %v1515_v5, 5  ;;  %v5952_v24 = vrot.slane %v1521_v6, 5 }
 0x111   : > { %4526 = vmatmul.msk.bf16.gmra.mxu2 %vm901_vm15, %v4894_v44  ;;  %v1733_v44 = vrot.slane %v1410_v4, 5  ;;  %v2091_v35 = vrot.slane %v2089_v15, 4  ;;  %v1575_v4 = vunpack.c.l.b16 %v1510_v12  ;;  %v5967_v12 = vld [vmem:[#allocation2 + $0x50] sm:$0x1] }
 0x112   : > { %4433 = vmatmul.msk.bf16.gmra.mxu3 %vm901_vm15, %v4879_v39  ;;  %v1518_v42 = vor.u32 %v1517_v46, %v1514_v23 }
 0x113   : > { %v1735_v63 = vrot.slane %v1733_v44, 4  ;;  %v1734_v19 = vsel %vm5759_vm13, %v4460_v62, %v1733_v44  ;;  %v1528_v44 = vor.u32 %v1527_v27, %v5952_v24  ;;  %v1539_v27 = vshll.u32 %v1412_v14, 16 }
 0x114   : > { %v1762_v36 = vunpack.c.l.b16 %v1734_v19  ;;  %v1519_v3 = vrot.slane %v1518_v42, 4 }
 0x115   : > { %v1737_v20 = vsel %vm5759_vm13, %v1735_v63, %v1736_v1  ;;  %v4896_v1 = vld [vmem:[#allocation2 + $0x48] sm:$0xff]  ;;  %v1529_v6 = vrot.slane %v1528_v44, 4 }
 0x116   : > { %v1763_v37 = vunpack.c.l.b16 %v1737_v20 }
 0x118   : > { %v1770_v49 = vpack.c.b16 %v1763_v37, %v1762_v36 }
 0x11c   : > { %v929_v45 = vpop.f32.mrf.mxu0 }
 0x11d   : > { %v1040_v39 = vpop.f32.mrf.mxu1 }
 0x11e   : > { %v1041_v48 = vadd.f32 %v1040_v39, %v929_v45  ;;  %v2182_v39 = vunpack.c.l.b16 %v2064_v57  ;;  %v1531_v45 = vshll.u32 %v5924_v56, 16  ;;  %v1684_v56 = vld [vmem:[#allocation2 + $0x48] sm:$0xe]  ;;  %v2018_v57 = vld [vmem:[#allocation2 + $0x3c] sm:$0xf] }
 0x11f   : > { %4452 = vmatmul.msk.bf16.gmra.mxu0 %vm901_vm15, %v1582_v40  ;;  %v2183_v40 = vunpack.c.l.b16 %v2074_v18  ;;  %v4461_v15 = vrot.slane %v1684_v56, 9  ;;  %v1524_v18 = vsel %vm5768_vm14, %v1519_v3, %v5952_v24  ;;  %v1549_v24 = vshrl.u32 %v1413_v50, 16  ;;  %v5995_v3 = vld [vmem:[#allocation2 + $0x44] sm:$0x1] }
 0x120   : > { %4481 = vmatmul.msk.bf16.gmra.mxu1 %vm901_vm15, %v1769_v38  ;;  %v1574_v38 = vunpack.c.l.b16 %v1500_v10  ;;  %v1533_v7 = vrot.slane %v1531_v45, 5  ;;  %v1576_v44 = vunpack.c.l.b16 %v1524_v18 }
 0x121   : > { %4527 = vmatmul.msk.bf16.gmra.mxu2 %vm901_vm15, %v4895_v32  ;;  %v2082_v32 = vor.u32 %v2081_v29, %v2078_v30  ;;  %v2193_v58 = vpack.c.b16 %v2183_v40, %v2182_v39  ;;  %v1545_v30 = vshll.u32 %v1413_v50, 16  ;;  %v1741_v36 = vsel %vm5759_vm13, %v4461_v15, %v1740_v59 }
 0x122   : > { %4546 = vmatmul.msk.bf16.vlgmr.msrb.gmra.mxu3 %vm901_vm15, %v2192_v41  ;;  %v5956_v41 = vld [vmem:[#allocation2 + $0x38] sm:$0x1]  ;;  %v1583_v55 = vpack.c.b16 %v1575_v4, %v1574_v38  ;;  %v1534_v19 = vsel %vm5768_vm14, %v1529_v6, %v1533_v7  ;;  %v2103_v4 = vshll.u32 %v2018_v57, 16  ;;  %v1555_v15 = vshll.u32 %v5967_v12, 16 }
 0x123   : > { %v2095_v60 = vshll.u32 %v5956_v41, 16  ;;  %v2083_v8 = vrot.slane %v2082_v32, 4  ;;  %v1577_v45 = vunpack.c.l.b16 %v1534_v19 }
 0x124   : > { %v1211_v16 = vpop.f32.mrf.mxu2  ;;  %v931_v22 = vpop.f32.mrf.mxu0 }
 0x125   : > { %v5932_v9 = vpop.f32.mrf.mxu3  ;;  %v1042_v17 = vpop.f32.mrf.mxu1  ;;  %v5950_v21 = vadd.f32 %v1211_v16, %v1041_v48  ;;  %v2092_v48 = vor.u32 %v2091_v35, %v5954_v33  ;;  %v2097_v10 = vrot.slane %v2095_v60, 5  ;;  %v1742_v16 = vrot.slane %v1740_v59, 4 }
 0x126   : > { %v1043_v25 = vadd.f32 %v1042_v17, %v931_v22  ;;  %v1743_v17 = vrot.slane %v5967_v12, 5  ;;  %v2088_v20 = vsel %vm5768_vm14, %v2083_v8, %v5954_v33  ;;  %v5981_v22 = vld [vmem:[#allocation2 + $0x40] sm:$0xf]  ;;  %v2100_v35 = vshrl.u32 %v2018_v57, 16  ;;  %v4897_v57 = vld [vmem:[#allocation2 + $0x54] sm:$0xff] }
 0x127   : > { %v2093_v54 = vrot.slane %v2092_v48, 4  ;;  %v2109_v39 = vshll.u32 %v5981_v22, 16  ;;  %v2113_v40 = vshrl.u32 %v5981_v22, 16  ;;  %v1541_v48 = vrot.slane %v1539_v27, 5 }
 0x128   : > { %v1744_v33 = vsel %vm5759_vm13, %v1742_v16, %v1743_v17  ;;  %v1764_v60 = vunpack.c.l.b16 %v1741_v36  ;;  %v2184_v50 = vunpack.c.l.b16 %v2088_v20  ;;  %v2105_v59 = vrot.slane %v2103_v4, 5 }
 0x129   : > { %v2098_v46 = vsel %vm5768_vm14, %v2093_v54, %v2097_v10  ;;  %v1584_v54 = vpack.c.b16 %v1577_v45, %v1576_v44  ;;  %v2119_v20 = vshll.u32 %v5995_v3, 16 }
 0x12c   : > { %v1213_v53 = vpop.f32.mrf.mxu2  ;;  %v934_v63 = vpop.f32.mrf.mxu0 }
 0x12d   : > { %v5960_v47 = vpop.f32.mrf.mxu3  ;;  %v1045_v51 = vpop.f32.mrf.mxu1  ;;  %v5964_v62 = vadd.f32 %v1213_v53, %v1043_v25  ;;  %v1536_v25 = vshrl.u32 %v1412_v14, 16  ;;  %v2185_v53 = vunpack.c.l.b16 %v2098_v46 }
 0x12e   : > { %v1046_v5 = vadd.f32 %v1045_v51, %v934_v63  ;;  %v1547_v51 = vrot.slane %v1545_v30, 5  ;;  %v2111_v63 = vrot.slane %v2109_v39, 5  ;;  %v1557_v30 = vrot.slane %v1555_v15, 5 }
 0x12f   : > { %4453 = vmatmul.msk.bf16.gmra.mxu0 %vm901_vm15, %v1583_v55  ;;  %v1538_v32 = vrot.slane %v1536_v25, 4  ;;  %v1551_v55 = vrot.slane %v1549_v24, 4  ;;  %v2194_v10 = vpack.c.b16 %v2185_v53, %v2184_v50  ;;  %v2121_v24 = vrot.slane %v2119_v20, 5 }
 0x130   : > { %4482 = vmatmul.msk.bf16.gmra.mxu1 %vm901_vm15, %v1770_v49  ;;  %v1765_v49 = vunpack.c.l.b16 %v1744_v33 }
 0x131   : > { %4528 = vmatmul.msk.bf16.gmra.mxu2 %vm901_vm15, %v4896_v1  ;;  %v2115_v1 = vrot.slane %v2113_v40, 4  ;;  %v1552_v14 = vor.u32 %v1551_v55, %v1547_v51 }
 0x132   : > { %4547 = vmatmul.msk.bf16.gmra.mxu3 %vm901_vm15, %v2193_v58  ;;  %v2102_v58 = vrot.slane %v2100_v35, 4  ;;  %v1771_v6 = vpack.c.b16 %v1765_v49, %v1764_v60  ;;  %v6007_v35 = vld [vmem:[#allocation2 + $0x4c] sm:$0xf] }
 0x133   : > { %v2116_v19 = vor.u32 %v2115_v1, %v2111_v63  ;;  %v1553_v27 = vrot.slane %v1552_v14, 4  ;;  %v2133_v45 = vshll.u32 %v6007_v35, 16 }
 0x134   : > { %v1216_v29 = vpop.f32.mrf.mxu2  ;;  %v936_v38 = vpop.f32.mrf.mxu0  ;;  %v2106_v18 = vor.u32 %v2105_v59, %v2102_v58 }
 0x135   : > { %v5983_v23 = vpop.f32.mrf.mxu3  ;;  %v1047_v31 = vpop.f32.mrf.mxu1  ;;  %v5991_v37 = vadd.f32 %v1216_v29, %v1046_v5  ;;  %v1542_v5 = vor.u32 %v1541_v48, %v1538_v32  ;;  %v2021_v29 = vld [vmem:[#allocation2 + $0x48] sm:$0xf]  ;;  %v1558_v44 = vsel %vm5768_vm14, %v1553_v27, %v1557_v30  ;;  %v2137_v32 = vshrl.u32 %v6007_v35, 16 }
 0x136   : > { %v1048_v42 = vadd.f32 %v1047_v31, %v936_v38  ;;  %v2107_v12 = vrot.slane %v2106_v18, 4  ;;  %v2117_v31 = vrot.slane %v2116_v19, 4  ;;  %v2124_v38 = vshrl.u32 %v2021_v29, 16  ;;  %v2291_v19 = vld [vmem:[#allocation2 + $0x18] sm:$0xe] }
 0x137   : > { %v1543_v25 = vrot.slane %v1542_v5, 4  ;;  %v2127_v4 = vshll.u32 %v2021_v29, 16  ;;  %v2135_v5 = vrot.slane %v2133_v45, 5  ;;  %v4552_v29 = vrot.slane %v2291_v19, 9 }
 0x138   : > { %v2112_v49 = vsel %vm5768_vm14, %v2107_v12, %v2111_v63  ;;  %v2122_v50 = vsel %vm5768_vm14, %v2117_v31, %v2121_v24  ;;  %v2126_v55 = vrot.slane %v2124_v38, 4  ;;  %v2320_v31 = vrot.slane %v5891_v34, 5 }
 0x139   : > { %v1548_v33 = vsel %vm5768_vm14, %v1543_v25, %v1547_v51  ;;  %v1579_v51 = vunpack.c.l.b16 %v1558_v44  ;;  %v2129_v58 = vrot.slane %v2127_v4, 5  ;;  %v2186_v59 = vunpack.c.l.b16 %v2112_v49 }
 0x13a   : > { %v2187_v1 = vunpack.c.l.b16 %v2122_v50  ;;  %v2317_v25 = vrot.slane %v5879_v11, 5 }
 0x13c   : > { %v1218_v7 = vpop.f32.mrf.mxu2  ;;  %v939_v17 = vpop.f32.mrf.mxu0  ;;  %v2319_v24 = vrot.slane %v2317_v25, 4  ;;  %v2318_v11 = vsel %vm5759_vm13, %v4552_v29, %v2317_v25  ;;  %v2324_v29 = vrot.slane %v5902_v2, 5 }
 0x13d   : > { %v5997_v56 = vpop.f32.mrf.mxu3  ;;  %v1050_v8 = vpop.f32.mrf.mxu1  ;;  %v6000_v16 = vadd.f32 %v1218_v7, %v1048_v42  ;;  %v6024_v7 = vld [vmem:[#allocation2 + $0x50] sm:$0x1] }
 0x13e   : > { %v1051_v46 = vadd.f32 %v1050_v8, %v939_v17  ;;  %v2195_v17 = vpack.c.b16 %v2187_v1, %v2186_v59  ;;  %v2143_v18 = vshll.u32 %v6024_v7, 16  ;;  %v2321_v50 = vsel %vm5759_vm13, %v2319_v24, %v2320_v31 }
 0x13f   : > { %4454 = vmatmul.msk.bf16.gmra.mxu0 %vm901_vm15, %v1584_v54  ;;  %v2367_v59 = vunpack.c.l.b16 %v2321_v50 }
 0x140   : > { %4483 = vmatmul.msk.bf16.gmra.mxu1 %vm901_vm15, %v1771_v6  ;;  %v2139_v6 = vrot.slane %v2137_v32, 4  ;;  %v2145_v12 = vrot.slane %v2143_v18, 5 }
 0x141   : > { %4529 = vmatmul.msk.bf16.gmra.mxu2 %vm901_vm15, %v4897_v57 }
 0x142   : > { %4548 = vmatmul.msk.bf16.gmra.mxu3 %vm901_vm15, %v2194_v10  ;;  %v2130_v10 = vor.u32 %v2129_v58, %v2126_v55  ;;  %v2140_v57 = vor.u32 %v2139_v6, %v2135_v5  ;;  %v2366_v58 = vunpack.c.l.b16 %v2318_v11  ;;  %v6053_v6 = vld [vmem:[#allocation2 + $0x5c] sm:$0x1] }
 0x144   : > { %v1221_v39 = vpop.f32.mrf.mxu2  ;;  %v941_v60 = vpop.f32.mrf.mxu0  ;;  %v2131_v30 = vrot.slane %v2130_v10, 4  ;;  %v2378_v18 = vpack.c.b16 %v2367_v59, %v2366_v58 }
 0x145   : > { %v1355_v36 = vpop.f32.mrf.mxu3  ;;  %v1052_v42 = vpop.f32.mrf.mxu1  ;;  %v6018_v48 = vadd.f32 %v1221_v39, %v1051_v46 }
 0x146   : > { %v6012_v40 = vadd.f32 %v1355_v36, %v5950_v21  ;;  %v1053_v53 = vadd.f32 %v1052_v42, %v941_v60  ;;  %v1578_v21 = vunpack.c.l.b16 %v1548_v33  ;;  %v2024_v36 = vld [vmem:[#allocation2 + $0x54] sm:$0xf]  ;;  %v6036_v33 = vld [vmem:[#allocation2 + $0x58] sm:$0xf]  ;;  %v2136_v4 = vsel %vm5768_vm14, %v2131_v30, %v2135_v5 }
 0x147   : > { %v2148_v34 = vshrl.u32 %v2024_v36, 16  ;;  %v2151_v32 = vshll.u32 %v2024_v36, 16  ;;  %v2188_v55 = vunpack.c.l.b16 %v2136_v4  ;;  %v2327_v4 = vrot.slane %v5916_v28, 5 }
 0x148   : > { %v1585_v54 = vpack.c.b16 %v1579_v51, %v1578_v21  ;;  %v2161_v21 = vshrl.u32 %v6036_v33, 16 }
 0x149   : > { %v2150_v1 = vrot.slane %v2148_v34, 4  ;;  %v2153_v5 = vrot.slane %v2151_v32, 5 }
 0x14b   : > { %v2154_v19 = vor.u32 %v2153_v5, %v2150_v1 }
 0x14c   : > { %v1223_v14 = vpop.f32.mrf.mxu2  ;;  %v944_v46 = vpop.f32.mrf.mxu0 }
 0x14d   : > { %v1357_v8 = vpop.f32.mrf.mxu3  ;;  %v1055_v15 = vpop.f32.mrf.mxu1  ;;  %v6030_v20 = vadd.f32 %v1223_v14, %v1053_v53  ;;  %v2157_v53 = vshll.u32 %v6036_v33, 16  ;;  %v2155_v31 = vrot.slane %v2154_v19, 4 }
 0x14e   : > { %v6027_v63 = vadd.f32 %v1357_v8, %v5964_v62  ;;  %v1056_v27 = vadd.f32 %v1055_v15, %v944_v46  ;;  %v2141_v62 = vrot.slane %v2140_v57, 4  ;;  %v2167_v46 = vshll.u32 %v6053_v6, 16 }
 0x14f   : > { %4455 = vmatmul.msk.bf16.gmra.mxu0 %vm901_vm15, %v1585_v54  ;;  %v2159_v8 = vrot.slane %v2157_v53, 5  ;;  %v2163_v54 = vrot.slane %v2161_v21, 4 }
 0x150   : > { %v2146_v45 = vsel %vm5768_vm14, %v2141_v62, %v2145_v12  ;;  %v2292_v12 = vld [vmem:[#allocation2 + $0x24] sm:$0xe]  ;;  %v2169_v24 = vrot.slane %v2167_v46, 5 }
 0x151   : > { %v2164_v30 = vor.u32 %v2163_v54, %v2159_v8  ;;  %v4553_v36 = vrot.slane %v2292_v12, 9  ;;  %v2160_v2 = vsel %vm5768_vm14, %v2155_v31, %v2159_v8 }
 0x152   : > { %4549 = vmatmul.msk.bf16.gmra.mxu3 %vm901_vm15, %v2195_v17  ;;  %v2190_v21 = vunpack.c.l.b16 %v2160_v2 }
 0x153   : > { %v2325_v50 = vsel %vm5759_vm13, %v4553_v36, %v2324_v29 }
 0x154   : > { %v1226_v39 = vpop.f32.mrf.mxu2  ;;  %v946_v49 = vpop.f32.mrf.mxu0 }
 0x155   : > { %v1360_v38 = vpop.f32.mrf.mxu3  ;;  %v1057_v44 = vpop.f32.mrf.mxu1  ;;  %v6047_v60 = vadd.f32 %v1226_v39, %v1056_v27 }
 0x156   : > { %v6043_v42 = vadd.f32 %v1360_v38, %v5991_v37  ;;  %v1058_v51 = vadd.f32 %v1057_v44, %v946_v49  ;;  %v2189_v37 = vunpack.c.l.b16 %v2146_v45  ;;  %v2326_v38 = vrot.slane %v2324_v29, 4 }
 0x158   : > { %v2196_v14 = vpack.c.b16 %v2189_v37, %v2188_v55  ;;  %v2328_v28 = vsel %vm5759_vm13, %v2326_v38, %v2327_v4  ;;  %v2294_v38 = vld [vmem:[#allocation2 + $0x3c] sm:$0xe] }
 0x159   : > { %v2369_v55 = vunpack.c.l.b16 %v2328_v28  ;;  %v4555_v4 = vrot.slane %v2294_v38, 9 }
 0x15c   : > { %v1228_v15 = vpop.f32.mrf.mxu2  ;;  %v949_v27 = vpop.f32.mrf.mxu0 }
 0x15d   : > { %v1362_v10 = vpop.f32.mrf.mxu3  ;;  %v1060_v57 = vpop.f32.mrf.mxu1  ;;  %v1248_v25 = vadd.f32 %v1228_v15, %v1058_v51  ;;  %v2293_v15 = vld [vmem:[#allocation2 + $0x30] sm:$0xe] }
 0x15e   : > { %v6056_v17 = vadd.f32 %v1362_v10, %v6000_v16  ;;  %v1061_v62 = vadd.f32 %v1060_v57, %v949_v27  ;;  %v2165_v16 = vrot.slane %v2164_v30, 4  ;;  %v2331_v10 = vrot.slane %v5928_v61, 5 }
 0x15f   : > { %4574 = vmatmul.msk.bf16.vlgmr.msra.gmra.mxu0 %vm901_vm15, %v2378_v18  ;;  %v4554_v18 = vrot.slane %v2293_v15, 9 }
 0x160   : > { %v2170_v49 = vsel %vm5768_vm14, %v2165_v16, %v2169_v24  ;;  %v2333_v19 = vrot.slane %v2331_v10, 4 }
 0x161   : > { %v2191_v51 = vunpack.c.l.b16 %v2170_v49  ;;  %v2332_v61 = vsel %vm5759_vm13, %v4554_v18, %v2331_v10  ;;  %v2296_v18 = vld [vmem:[#allocation2 + $0x54] sm:$0xe] }
 0x162   : > { %4550 = vmatmul.msk.bf16.gmra.mxu3 %vm901_vm15, %v2196_v14 }
 0x163   : > { %v2197_v1 = vpack.c.b16 %v2191_v51, %v2190_v21  ;;  %v2295_v21 = vld [vmem:[#allocation2 + $0x48] sm:$0xe] }
 0x164   : > { %v1231_v39 = vpop.f32.mrf.mxu2  ;;  %v951_v32 = vpop.f32.mrf.mxu0  ;;  %v4556_v51 = vrot.slane %v2295_v21, 9 }
 0x165   : > { %v1365_v11 = vpop.f32.mrf.mxu3  ;;  %v1062_v45 = vpop.f32.mrf.mxu1  ;;  %v1249_v34 = vadd.f32 %v1231_v39, %v1061_v62  ;;  %v2370_v62 = vunpack.c.l.b16 %v2332_v61 }
 0x166   : > { %v6064_v44 = vadd.f32 %v1365_v11, %v6018_v48  ;;  %v1063_v53 = vadd.f32 %v1062_v45, %v951_v32  ;;  %v2368_v48 = vunpack.c.l.b16 %v2325_v50 }
 0x168   : > { %v2379_v5 = vpack.c.b16 %v2369_v55, %v2368_v48  ;;  %v2348_v55 = vrot.slane %v6024_v7, 5  ;;  %v2352_v7 = vrot.slane %v6036_v33, 5 }
 0x16c   : > { %v1233_v58 = vpop.f32.mrf.mxu2  ;;  %v954_v54 = vpop.f32.mrf.mxu0 }
 0x16d   : > { %v1367_v37 = vpop.f32.mrf.mxu3  ;;  %v1250_v8 = vadd.f32 %v1233_v58, %v1063_v53  ;;  %v1066_v14 = vadd.f32 %v5932_v9, %v954_v54 }
 0x16e   : > { %v6075_v59 = vadd.f32 %v1367_v37, %v6030_v20  ;;  %v2334_v20 = vrot.slane %v5956_v41, 5 }
 0x16f   : > { %4575 = vmatmul.msk.bf16.gmra.mxu0 %vm901_vm15, %v2379_v5  ;;  %v1251_v57 = vadd.f32 %v5983_v23, %v1066_v14 }
 0x170   : > { %v2335_v9 = vsel %vm5759_vm13, %v2333_v19, %v2334_v20  ;;  %v4557_v19 = vrot.slane %v2296_v18, 9  ;;  %v2354_v20 = vrot.slane %v2352_v7, 4 }
 0x171   : > { %v2371_v12 = vunpack.c.l.b16 %v2335_v9 }
 0x172   : > { %4551 = vmatmul.msk.bf16.gmra.mxu3 %vm901_vm15, %v2197_v1 }
 0x173   : > { %v2380_v41 = vpack.c.b16 %v2371_v12, %v2370_v62 }
 0x174   : > { %v956_v30 = vpop.f32.mrf.mxu0 }
 0x175   : > { %v1370_v46 = vpop.f32.mrf.mxu3  ;;  %v1068_v29 = vadd.f32 %v5960_v47, %v956_v30  ;;  %v2341_v47 = vrot.slane %v5995_v3, 5  ;;  %v2345_v3 = vrot.slane %v6007_v35, 5  ;;  %v2353_v30 = vsel %vm5759_vm13, %v4557_v19, %v2352_v7 }
 0x176   : > { %v6084_v27 = vadd.f32 %v1370_v46, %v6047_v60  ;;  %v2338_v60 = vrot.slane %v5981_v22, 5  ;;  %v2355_v46 = vrot.slane %v6053_v6, 5  ;;  %v2376_v33 = vunpack.c.l.b16 %v2353_v30  ;;  %v5120_v30 = vld [vmem:[#allocation2 + $0xc] sm:$0xf] }
 0x177   : > { %v1252_v23 = vadd.f32 %v5997_v56, %v1068_v29  ;;  %v2347_v48 = vrot.slane %v2345_v3, 4  ;;  %v2346_v1 = vsel %vm5759_vm13, %v4556_v51, %v2345_v3 }
 0x178   : > { %v2340_v11 = vrot.slane %v2338_v60, 4  ;;  %v2339_v56 = vsel %vm5759_vm13, %v4555_v4, %v2338_v60  ;;  %v2356_v61 = vsel %vm5759_vm13, %v2354_v20, %v2355_v46  ;;  %v1967_v60 = vpop.f32.mrf.mxu2 }
 0x179   : > { %v2349_v5 = vsel %vm5759_vm13, %v2347_v48, %v2348_v55 }
 0x17c   : > { %v1637_v16 = vpop.f32.mrf.mxu0 }
 0x17d   : > { %v1372_v31 = vpop.f32.mrf.mxu3  ;;  %v6094_v36 = vadd.f32 %v1637_v16, %v6012_v40  ;;  %v2372_v40 = vunpack.c.l.b16 %v2339_v56 }
 0x17e   : > { %v1392_v24 = vadd.f32 %v1372_v31, %v1248_v25  ;;  %v2342_v25 = vsel %vm5759_vm13, %v2340_v11, %v2341_v47  ;;  %v1823_v31 = vpop.f32.mrf.mxu1 }
 0x17f   : > { %4576 = vmatmul.msk.bf16.gmra.mxu0 %vm901_vm15, %v2380_v41  ;;  %v2373_v32 = vunpack.c.l.b16 %v2342_v25 }
 0x180   : > { %v1969_v47 = vpop.f32.mrf.mxu2 }
 0x181   : > { %v2381_v28 = vpack.c.b16 %v2373_v32, %v2372_v40 }
 0x184   : > { %v1639_v2 = vpop.f32.mrf.mxu0 }
 0x185   : > { %v1375_v39 = vpop.f32.mrf.mxu3  ;;  %v6103_v22 = vadd.f32 %v1639_v2, %v6027_v63 }
 0x186   : > { %v1393_v45 = vadd.f32 %v1375_v39, %v1249_v34  ;;  %v1825_v4 = vpop.f32.mrf.mxu1 }
 0x187   : > { %v1854_v21 = vadd.f32 %v1825_v4, %v6103_v22 }
 0x188   : > { %v1972_v25 = vpop.f32.mrf.mxu2 }
 0x18c   : > { %v1642_v53 = vpop.f32.mrf.mxu0 }
 0x18d   : > { %v1377_v49 = vpop.f32.mrf.mxu3  ;;  %v6107_v34 = vadd.f32 %v1642_v53, %v6043_v42  ;;  %v2374_v42 = vunpack.c.l.b16 %v2346_v1 }
 0x18e   : > { %v1394_v50 = vadd.f32 %v1377_v49, %v1250_v8  ;;  %v2375_v8 = vunpack.c.l.b16 %v2349_v5  ;;  %v1828_v56 = vpop.f32.mrf.mxu1 }
 0x18f   : > { %4577 = vmatmul.msk.bf16.gmra.mxu0 %vm901_vm15, %v2381_v28 }
 0x190   : > { %v2382_v14 = vpack.c.b16 %v2375_v8, %v2374_v42  ;;  %v1974_v51 = vpop.f32.mrf.mxu2  ;;  %v1855_v8 = vadd.f32 %v1828_v56, %v6107_v34 }
 0x192   : > { %v1999_v18 = vadd.f32 %v1972_v25, %v1855_v8 }
 0x194   : > { %v1644_v58 = vpop.f32.mrf.mxu0 }
 0x195   : > { %v1380_v63 = vpop.f32.mrf.mxu3  ;;  %v6116_v35 = vadd.f32 %v1644_v58, %v6056_v17 }
 0x196   : > { %v1395_v37 = vadd.f32 %v1380_v63, %v1251_v57  ;;  %v1830_v28 = vpop.f32.mrf.mxu1 }
 0x19c   : > { %v1647_v15 = vpop.f32.mrf.mxu0 }
 0x19d   : > { %v1382_v54 = vpop.f32.mrf.mxu3  ;;  %v6120_v57 = vadd.f32 %v1647_v15, %v6064_v44  ;;  %v2377_v44 = vunpack.c.l.b16 %v2356_v61 }
 0x19e   : > { %v1396_v10 = vadd.f32 %v1382_v54, %v1252_v23  ;;  %v1833_v58 = vpop.f32.mrf.mxu1 }
 0x19f   : > { %4578 = vmatmul.msk.bf16.gmra.mxu0 %vm901_vm15, %v2382_v14  ;;  %v2383_v29 = vpack.c.b16 %v2377_v44, %v2376_v33  ;;  %v1977_v14 = vpop.f32.mrf.mxu2  ;;  %v1856_v44 = vadd.f32 %v1830_v28, %v6116_v35  ;;  %v1857_v28 = vadd.f32 %v1833_v58, %v6120_v57 }
 0x1a4   : > { %v1649_v17 = vpop.f32.mrf.mxu0 }
 0x1a5   : > { %v6129_v9 = vadd.f32 %v1649_v17, %v6075_v59  ;;  %v2249_v38 = vpop.f32.mrf.mxu3 }
 0x1a7   : > { %v1979_v4 = vpop.f32.mrf.mxu2 }
 0x1ac   : > { %v1652_v62 = vpop.f32.mrf.mxu0 }
 0x1ad   : > { %v6132_v12 = vadd.f32 %v1652_v62, %v6084_v27  ;;  %v2251_v39 = vpop.f32.mrf.mxu3 }
 0x1af   : > { %4579 = vmatmul.msk.bf16.gmra.mxu0 %vm901_vm15, %v2383_v29  ;;  %v1835_v29 = vpop.f32.mrf.mxu1 }
 0x1b0   : > { %v1858_v57 = vadd.f32 %v1835_v29, %v6129_v9 }
 0x1b4   : > { %v1654_v6 = vpop.f32.mrf.mxu0 }
 0x1b5   : > { %v6135_v23 = vadd.f32 %v1654_v6, %v1392_v24  ;;  %v1853_v24 = vadd.f32 %v1823_v31, %v6094_v36  ;;  %v1998_v36 = vadd.f32 %v1969_v47, %v1854_v21 }
 0x1b7   : > { %v1997_v49 = vadd.f32 %v1967_v60, %v1853_v24  ;;  %v2280_v1 = vadd.f32 %v2251_v39, %v1998_v36  ;;  %v1838_v21 = vpop.f32.mrf.mxu1  ;;  %v2001_v36 = vadd.f32 %v1977_v14, %v1857_v28  ;;  %v2002_v14 = vadd.f32 %v1979_v4, %v1858_v57 }
 0x1b9   : > { %v2279_v53 = vadd.f32 %v2249_v38, %v1997_v49  ;;  %v2000_v38 = vadd.f32 %v1974_v51, %v1856_v44 }
 0x1bc   : > { %v1657_v41 = vpop.f32.mrf.mxu0 }
 0x1bd   : > { %v6137_v16 = vadd.f32 %v1657_v41, %v1393_v45  ;;  %v2254_v45 = vpop.f32.mrf.mxu3 }
 0x1be   : > { %v2281_v17 = vadd.f32 %v2254_v45, %v1999_v18 }
 0x1c4   : > { %v1659_v59 = vpop.f32.mrf.mxu0 }
 0x1c5   : > { %v6139_v11 = vadd.f32 %v1659_v59, %v1394_v50  ;;  %v6149_v50 = vld [vmem:[%s6525_s2] ss:$0 sm:$0xff]  ;;  %v2256_v63 = vpop.f32.mrf.mxu3  ;;  %v2640_v59 = vld [vmem:[#allocation2 + $0x14] sm:$0x1] }
 0x1c6   : > { %v2282_v25 = vadd.f32 %v2256_v63, %v2000_v38  ;;  %v2643_v63 = vld [vmem:[#allocation2 + $0x18] sm:$0xf] }
 0x1cc   : > { %v1662_v2 = vpop.f32.mrf.mxu0 }
 0x1cd   : > { %v6141_v27 = vadd.f32 %v1662_v2, %v1395_v37  ;;  %v2259_v46 = vpop.f32.mrf.mxu3 }
 0x1d4   : > { %v1664_v40 = vpop.f32.mrf.mxu0 }
 0x1d5   : > { %v6144_v32 = vadd.f32 %v1664_v40, %v1396_v10  ;;  %v2261_v45 = vpop.f32.mrf.mxu3 }
 0x1d6   : > { %v2284_v44 = vadd.f32 %v2261_v45, %v2002_v14 }
 0x1dc   : > { %v2435_v3 = vpop.f32.mrf.mxu0 }
 0x1dd   : > { %v2465_v48 = vadd.f32 %v2435_v3, %v2279_v53 }
 0x1df   : > { %v2481_v55 = vadd.f32 %v6149_v50, %v2465_v48 }
 0x1e1   : > { %v2493_v37 = vmax.f32 %v2481_v55, 0.0 }
 0x1e3   : > { %v2505_v5 = vpack.c.bf16 %v2493_v37, %v2493_v37 }
 0x1e4   : > { %v2437_v42 = vpop.f32.mrf.mxu0 }
 0x1e5   : > { %v2518_v54 = vshrl.u32 %v2505_v5, 16  ;;  %v2466_v10 = vadd.f32 %v2437_v42, %v2280_v1  ;;  %v2521_v7 = vshll.u32 %v2505_v5, 16  ;;  %v1982_v5 = vpop.f32.mrf.mxu2  ;;  %v2283_v42 = vadd.f32 %v2259_v46, %v2001_v36 }
 0x1e7   : > { %v2520_v15 = vrot.slane %v2518_v54, 7  ;;  %v2482_v22 = vadd.f32 %v6149_v50, %v2466_v10 }
 0x1e9   : > { %v2523_v19 = vor.u32 %v2521_v7, %v2520_v15  ;;  %v2494_v20 = vmax.f32 %v2482_v22, 0.0  ;;  %v2524_v47 = vrot.slane %v2520_v15, 4  ;;  %v2264_v7 = vpop.f32.mrf.mxu3 }
 0x1eb   : > { %v2637_v61 = vsel %vm5628_vm7, %v2523_v19, %v5120_v30  ;;  %v2506_v33 = vpack.c.bf16 %v2494_v20, %v2494_v20  ;;  %v2647_v20 = vld [vmem:[#allocation2 + $0x20] sm:$0x1] }
 0x1ec   : > { %2638 = vst [vmem:[#allocation2 + $0xc] sm:$0xf] %v2637_v61  ;;  %v2440_v34 = vpop.f32.mrf.mxu0 }
 0x1ed   : > { %v2526_v62 = vshrl.u32 %v2506_v33, 16  ;;  %v2467_v6 = vadd.f32 %v2440_v34, %v2281_v17  ;;  %v2529_v41 = vshll.u32 %v2506_v33, 16  ;;  %v1840_v17 = vpop.f32.mrf.mxu1 }
 0x1ef   : > { %v2528_v31 = vrot.slane %v2526_v62, 7  ;;  %v2483_v60 = vadd.f32 %v6149_v50, %v2467_v6  ;;  %v1859_v6 = vadd.f32 %v1838_v21, %v6132_v12  ;;  %v1860_v12 = vadd.f32 %v1840_v17, %v6135_v23 }
 0x1f1   : > { %v2531_v39 = vor.u32 %v2529_v41, %v2528_v31  ;;  %v2533_v2 = vrot.slane %v2528_v31, 4  ;;  %v2495_v56 = vmax.f32 %v2483_v60, 0.0  ;;  %v1984_v31 = vpop.f32.mrf.mxu2 }
 0x1f3   : > { %v2532_v35 = vsel %vm5637_vm8, %v2524_v47, %v2531_v39  ;;  %v2641_v40 = vsel %vm5547_vm2, %v2533_v2, %v2640_v59  ;;  %v2507_v24 = vpack.c.bf16 %v2495_v56, %v2495_v56  ;;  %v2266_v47 = vpop.f32.mrf.mxu3  ;;  %v2650_v39 = vld [vmem:[#allocation2 + $0x24] sm:$0xf]  ;;  %v2003_v2 = vadd.f32 %v1982_v5, %v1859_v6 }
 0x1f4   : > { %2639 = vst.msk [vmem:[#allocation2 + $0x10] sm:$0xf] %vm380_vm6, %v2532_v35  ;;  %v2442_v49 = vpop.f32.mrf.mxu0 }
 0x1f5   : > { %2642 = vst [vmem:[#allocation2 + $0x14] sm:$0x1] %v2641_v40  ;;  %v2535_v53 = vshrl.u32 %v2507_v24, 16  ;;  %v2468_v3 = vadd.f32 %v2442_v49, %v2282_v25  ;;  %v2538_v48 = vshll.u32 %v2507_v24, 16  ;;  %v1843_v35 = vpop.f32.mrf.mxu1  ;;  %v2285_v40 = vadd.f32 %v2264_v7, %v2003_v2 }
 0x1f7   : > { %v2537_v51 = vrot.slane %v2535_v53, 7  ;;  %v2484_v55 = vadd.f32 %v6149_v50, %v2468_v3 }
 0x1f9   : > { %v2540_v37 = vor.u32 %v2538_v48, %v2537_v51  ;;  %v2496_v1 = vmax.f32 %v2484_v55, 0.0  ;;  %v2541_v30 = vrot.slane %v2537_v51, 4  ;;  %v1987_v3 = vpop.f32.mrf.mxu2  ;;  %v2004_v55 = vadd.f32 %v1984_v31, %v1860_v12 }
 0x1fb   : > { %v2644_v8 = vsel %vm5628_vm7, %v2540_v37, %v2643_v63  ;;  %v2508_v54 = vpack.c.bf16 %v2496_v1, %v2496_v1  ;;  %v2654_v63 = vld [vmem:[#allocation2 + $0x2c] sm:$0x1] }
 0x1fc   : > { %2645 = vst [vmem:[#allocation2 + $0x18] sm:$0xf] %v2644_v8  ;;  %v2445_v58 = vpop.f32.mrf.mxu0  ;;  %v2286_v8 = vadd.f32 %v2266_v47, %v2004_v55 }
 0x1fd   : > { %v2543_v10 = vshrl.u32 %v2508_v54, 16  ;;  %v2469_v15 = vadd.f32 %v2445_v58, %v2283_v42  ;;  %v2546_v18 = vshll.u32 %v2508_v54, 16  ;;  %v2269_v42 = vpop.f32.mrf.mxu3 }
 0x1ff   : > { %v2545_v22 = vrot.slane %v2543_v10, 7  ;;  %v2485_v19 = vadd.f32 %v6149_v50, %v2469_v15  ;;  %v1861_v10 = vadd.f32 %v1843_v35, %v6137_v16  ;;  %v1845_v15 = vpop.f32.mrf.mxu1 }
 0x200   : > { %v1862_v16 = vadd.f32 %v1845_v15, %v6139_v11 }
 0x201   : > { %v2548_v46 = vor.u32 %v2546_v18, %v2545_v22  ;;  %v2550_v61 = vrot.slane %v2545_v22, 4  ;;  %v2497_v33 = vmax.f32 %v2485_v19, 0.0  ;;  %v2005_v17 = vadd.f32 %v1987_v3, %v1861_v10 }
 0x203   : > { %v2549_v9 = vsel %vm5637_vm8, %v2541_v30, %v2548_v46  ;;  %v2648_v34 = vsel %vm5547_vm2, %v2550_v61, %v2647_v20  ;;  %v2509_v29 = vpack.c.bf16 %v2497_v33, %v2497_v33  ;;  %v2657_v20 = vld [vmem:[#allocation2 + $0x30] sm:$0xf]  ;;  %v1989_v30 = vpop.f32.mrf.mxu2  ;;  %v2287_v33 = vadd.f32 %v2269_v42, %v2005_v17 }
 0x204   : > { %2646 = vst.msk [vmem:[#allocation2 + $0x1c] sm:$0xf] %vm380_vm6, %v2549_v9  ;;  %v2447_v62 = vpop.f32.mrf.mxu0 }
 0x205   : > { %2649 = vst [vmem:[#allocation2 + $0x20] sm:$0x1] %v2648_v34  ;;  %v2552_v41 = vshrl.u32 %v2509_v29, 16  ;;  %v2470_v60 = vadd.f32 %v2447_v62, %v2284_v44  ;;  %v2555_v59 = vshll.u32 %v2509_v29, 16  ;;  %v2271_v34 = vpop.f32.mrf.mxu3 }
 0x207   : > { %v2554_v38 = vrot.slane %v2552_v41, 7  ;;  %v2486_v4 = vadd.f32 %v6149_v50, %v2470_v60  ;;  %v1848_v31 = vpop.f32.mrf.mxu1 }
 0x208   : > { %v1863_v12 = vadd.f32 %v1848_v31, %v6141_v27 }
 0x209   : > { %v2557_v56 = vor.u32 %v2555_v59, %v2554_v38  ;;  %v2498_v25 = vmax.f32 %v2486_v4, 0.0  ;;  %v2558_v36 = vrot.slane %v2554_v38, 4  ;;  %v2006_v59 = vadd.f32 %v1989_v30, %v1862_v16  ;;  %v2661_v4 = vld [vmem:[#allocation2 + $0x38] sm:$0x1] }
 0x20b   : > { %v2651_v24 = vsel %vm5628_vm7, %v2557_v56, %v2650_v39  ;;  %v2510_v45 = vpack.c.bf16 %v2498_v25, %v2498_v25  ;;  %v1992_v25 = vpop.f32.mrf.mxu2  ;;  %v2288_v35 = vadd.f32 %v2271_v34, %v2006_v59 }
 0x20c   : > { %2652 = vst [vmem:[#allocation2 + $0x24] sm:$0xf] %v2651_v24  ;;  %v2450_v49 = vpop.f32.mrf.mxu0  ;;  %v2007_v55 = vadd.f32 %v1992_v25, %v1863_v12 }
 0x20d   : > { %v2560_v28 = vshrl.u32 %v2510_v45, 16  ;;  %v2471_v53 = vadd.f32 %v2450_v49, %v2285_v40  ;;  %v2563_v51 = vshll.u32 %v2510_v45, 16 }
 0x20f   : > { %v2562_v21 = vrot.slane %v2560_v28, 7  ;;  %v2487_v48 = vadd.f32 %v6149_v50, %v2471_v53  ;;  %v2274_v53 = vpop.f32.mrf.mxu3 }
 0x211   : > { %v2565_v37 = vor.u32 %v2563_v51, %v2562_v21  ;;  %v2567_v1 = vrot.slane %v2562_v21, 4  ;;  %v2499_v5 = vmax.f32 %v2487_v48, 0.0  ;;  %v2664_v48 = vld [vmem:[#allocation2 + $0x3c] sm:$0xf] }
 0x213   : > { %v2566_v23 = vsel %vm5637_vm8, %v2558_v36, %v2565_v37  ;;  %v2655_v54 = vsel %vm5547_vm2, %v2567_v1, %v2654_v63  ;;  %v2511_v57 = vpack.c.bf16 %v2499_v5, %v2499_v5  ;;  %v1850_v63 = vpop.f32.mrf.mxu1  ;;  %v2289_v1 = vadd.f32 %v2274_v53, %v2007_v55 }
 0x214   : > { %2653 = vst.msk [vmem:[#allocation2 + $0x28] sm:$0xf] %vm380_vm6, %v2566_v23  ;;  %v2452_v58 = vpop.f32.mrf.mxu0  ;;  %v1864_v27 = vadd.f32 %v1850_v63, %v6144_v32  ;;  %v1994_v23 = vpop.f32.mrf.mxu2 }
 0x215   : > { %2656 = vst [vmem:[#allocation2 + $0x2c] sm:$0x1] %v2655_v54  ;;  %v2569_v7 = vshrl.u32 %v2511_v57, 16  ;;  %v2472_v22 = vadd.f32 %v2452_v58, %v2286_v8  ;;  %v2572_v19 = vshll.u32 %v2511_v57, 16 }
 0x217   : > { %v2571_v18 = vrot.slane %v2569_v7, 7  ;;  %v2488_v14 = vadd.f32 %v6149_v50, %v2472_v22  ;;  %v2008_v7 = vadd.f32 %v1994_v23, %v1864_v27  ;;  %v2276_v22 = vpop.f32.mrf.mxu3 }
 0x219   : > { %v2574_v46 = vor.u32 %v2572_v19, %v2571_v18  ;;  %v2500_v61 = vmax.f32 %v2488_v14, 0.0  ;;  %v2575_v47 = vrot.slane %v2571_v18, 4  ;;  %v2668_v18 = vld [vmem:[#allocation2 + $0x44] sm:$0x1]  ;;  %v2290_v30 = vadd.f32 %v2276_v22, %v2008_v7 }
 0x21b   : > { %v2658_v44 = vsel %vm5628_vm7, %v2574_v46, %v2657_v20  ;;  %v2512_v9 = vpack.c.bf16 %v2500_v61, %v2500_v61 }
 0x21c   : > { %2659 = vst [vmem:[#allocation2 + $0x30] sm:$0xf] %v2658_v44  ;;  %v2455_v29 = vpop.f32.mrf.mxu0 }
 0x21d   : > { %v2577_v62 = vshrl.u32 %v2512_v9, 16  ;;  %v2473_v6 = vadd.f32 %v2455_v29, %v2287_v33  ;;  %v2580_v60 = vshll.u32 %v2512_v9, 16 }
 0x21f   : > { %v2579_v41 = vrot.slane %v2577_v62, 7  ;;  %v2489_v38 = vadd.f32 %v6149_v50, %v2473_v6  ;;  %v2671_v62 = vld [vmem:[#allocation2 + $0x48] sm:$0xf] }
 0x221   : > { %v2582_v39 = vor.u32 %v2580_v60, %v2579_v41  ;;  %v2584_v2 = vrot.slane %v2579_v41, 4  ;;  %v2501_v56 = vmax.f32 %v2489_v38, 0.0 }
 0x223   : > { %v2583_v11 = vsel %vm5637_vm8, %v2575_v47, %v2582_v39  ;;  %v2662_v40 = vsel %vm5547_vm2, %v2584_v2, %v2661_v4  ;;  %v2513_v24 = vpack.c.bf16 %v2501_v56, %v2501_v56  ;;  %v2675_v47 = vld [vmem:[#allocation2 + $0x50] sm:$0x1] }
 0x224   : > { %2660 = vst.msk [vmem:[#allocation2 + $0x34] sm:$0xf] %vm380_vm6, %v2583_v11  ;;  %v2457_v45 = vpop.f32.mrf.mxu0 }
 0x225   : > { %2663 = vst [vmem:[#allocation2 + $0x38] sm:$0x1] %v2662_v40  ;;  %v2586_v49 = vshrl.u32 %v2513_v24, 16  ;;  %v2474_v28 = vadd.f32 %v2457_v45, %v2288_v35  ;;  %v2589_v21 = vshll.u32 %v2513_v24, 16 }
 0x227   : > { %v2588_v3 = vrot.slane %v2586_v49, 7  ;;  %v2490_v51 = vadd.f32 %v6149_v50, %v2474_v28 }
 0x229   : > { %v2591_v36 = vor.u32 %v2589_v21, %v2588_v3  ;;  %v2502_v37 = vmax.f32 %v2490_v51, 0.0  ;;  %v2592_v19 = vrot.slane %v2588_v3, 4 }
 0x22b   : > { %v2665_v5 = vsel %vm5628_vm7, %v2591_v36, %v2664_v48  ;;  %v2514_v42 = vpack.c.bf16 %v2502_v37, %v2502_v37 }
 0x22c   : > { %2666 = vst [vmem:[#allocation2 + $0x3c] sm:$0xf] %v2665_v5  ;;  %v2460_v8 = vpop.f32.mrf.mxu0 }
 0x22d   : > { %v2594_v54 = vshrl.u32 %v2514_v42, 16  ;;  %v2475_v57 = vadd.f32 %v2460_v8, %v2289_v1  ;;  %v2597_v10 = vshll.u32 %v2514_v42, 16 }
 0x22f   : > { %v2596_v58 = vrot.slane %v2594_v54, 7  ;;  %v2491_v15 = vadd.f32 %v6149_v50, %v2475_v57 }
 0x231   : > { %v2599_v14 = vor.u32 %v2597_v10, %v2596_v58  ;;  %v2601_v20 = vrot.slane %v2596_v58, 4  ;;  %v2503_v17 = vmax.f32 %v2491_v15, 0.0 }
 0x233   : > { %v2600_v32 = vsel %vm5637_vm8, %v2592_v19, %v2599_v14  ;;  %v2669_v46 = vsel %vm5547_vm2, %v2601_v20, %v2668_v18  ;;  %v2515_v61 = vpack.c.bf16 %v2503_v17, %v2503_v17 }
 0x234   : > { %2667 = vst.msk [vmem:[#allocation2 + $0x40] sm:$0xf] %vm380_vm6, %v2600_v32  ;;  %v2462_v33 = vpop.f32.mrf.mxu0 }
 0x235   : > { %2670 = vst [vmem:[#allocation2 + $0x44] sm:$0x1] %v2669_v46  ;;  %v2603_v44 = vshrl.u32 %v2515_v61, 16  ;;  %v2476_v9 = vadd.f32 %v2462_v33, %v2290_v30  ;;  %v2606_v34 = vshll.u32 %v2515_v61, 16 }
 0x237   : > { %v2605_v16 = vrot.slane %v2603_v44, 7  ;;  %v2492_v29 = vadd.f32 %v6149_v50, %v2476_v9 }
 0x239   : > { %v2608_v6 = vor.u32 %v2606_v34, %v2605_v16  ;;  %v2504_v31 = vmax.f32 %v2492_v29, 0.0  ;;  %v2609_v39 = vrot.slane %v2605_v16, 4 }
 0x23b   : > { %v2672_v41 = vsel %vm5628_vm7, %v2608_v6, %v2671_v62  ;;  %v2516_v60 = vpack.c.bf16 %v2504_v31, %v2504_v31 }
 0x23c   : > { %2673 = vst [vmem:[#allocation2 + $0x48] sm:$0xf] %v2672_v41 }
 0x23d   : > { %v2611_v38 = vshrl.u32 %v2516_v60, 16  ;;  %v2614_v4 = vshll.u32 %v2516_v60, 16 }
 0x23f   : > { %v2613_v59 = vrot.slane %v2611_v38, 7 }
 0x241   : > { %v2616_v2 = vor.u32 %v2614_v4, %v2613_v59  ;;  %v2618_v56 = vrot.slane %v2613_v59, 4  ;;  %2680 = sbr.rel (%p4290_p2) target bundleno = 586 (0x24a), region = 64 }
 0x243   : > { %v2617_v25 = vsel %vm5637_vm8, %v2609_v39, %v2616_v2  ;;  %v2676_v50 = vsel %vm5547_vm2, %v2618_v56, %v2675_v47 }
 0x244   : > { %2674 = vst.msk [vmem:[#allocation2 + $0x4c] sm:$0xf] %vm380_vm6, %v2617_v25 }
 0x245   : > { %2677 = vst [vmem:[#allocation2 + $0x50] sm:$0x1] %v2676_v50 }
 0x246   : > { %v5346_v43 = vmov 0  }
 0x247   : > { %2681 = vst.msk [vmem:[#allocation2 + $0xc] sm:$0xf] %vm380_vm6, %v5346_v43 }
 0x248   : > { %2682 = vst.msk [vmem:[#allocation2 + $0x10] sm:$0xf] %vm380_vm6, %v5346_v43 }
 0x249   : > { %2684 = vst.msk [vmem:[#allocation2 + $0x14] sm:$0x1] %vm295_vm0, %v5346_v43 }
 0x24a PF: > { %2687 = sbr.rel (%p4291_p3) target bundleno = 595 (0x253), region = 68 }
 0x24f   : > { %v5347_v52 = vmov 0  }
 0x250   : > { %2688 = vst.msk [vmem:[#allocation2 + $0x48] sm:$0xf] %vm380_vm6, %v5347_v52 }
 0x251   : > { %2689 = vst.msk [vmem:[#allocation2 + $0x4c] sm:$0xf] %vm380_vm6, %v5347_v52 }
 0x252   : > { %2691 = vst.msk [vmem:[#allocation2 + $0x50] sm:$0x1] %vm295_vm0, %v5347_v52 }
 0x253 PF: > { %v4921_v0 = vld [vmem:[#allocation8 + $0x38] sm:$0xff]  ;;  %v4920_v40 = vld [vmem:[#allocation8 + $0x30] sm:$0xff]  ;;  %v2692_v12 = vld [vmem:[#allocation2 + $0xc] sm:$0xf]  ;;  %s4959_s6 = sshll.u32 %s5322_s24, 5  ;;  %s4960_s17 = sshll.u32 %s5322_s24, 3 }
 0x254   : > { %v4917_v35 = vld [vmem:[#allocation8 + $0x18] sm:$0xff]  ;;  %2869 = vmatpush.bf16.msra.mxu1 %v4921_v0  ;;  %v4916_v24 = vld [vmem:[#allocation8 + $0x10] sm:$0xff]  ;;  %v4919_v53 = vld [vmem:[#allocation8 + $0x28] sm:$0xff]  ;;  %v2713_v21 = vshrl.u32 %v2692_v12, 16  ;;  %v2716_v51 = vshll.u32 %v2692_v12, 16  ;;  %s6415_s29 = scalar_lea.vmem %s5522_s1, %s4959_s6 [#allocation3]  ;;  %s6571_s1 = sld [smem:[#allocation14_spill]] }
 0x255   : > { %v4925_v11 = vld [vmem:[#allocation8 + $0x58] sm:$0xff]  ;;  %2954 = vmatpush.bf16.msra.mxu2 %v4917_v35  ;;  %v4924_v45 = vld [vmem:[#allocation8 + $0x50] sm:$0xff]  ;;  %v4915_v3 = vld [vmem:[#allocation8 + $0x8] sm:$0xff]  ;;  %s6572_s8 = sld [smem:[#allocation22_spill]]  ;;  %s4092_s9 = sshll.u32 %s5729_s7, 4  ;;  %s4093_s9 = int_to_ptr.vmem [resolvable:$true] %s4092_s9 }
 0x256   : > { %3080 = vmatpush.bf16.msra.mxu3 %v4925_v11  ;;  %v2693_v49 = vld [vmem:[#allocation2 + $0x10] sm:$0xf]  ;;  %v2708_v28 = vld [vmem:[#allocation2 + $0x14] sm:$0x1]  ;;  %v4923_v63 = vld [vmem:[#allocation8 + $0x48] sm:$0xff]  ;;  %v2715_v42 = vrot.slane %v2713_v21, 4 }
 0x257   : > { %v2722_v48 = vshll.u32 %v2693_v49, 16  ;;  %v2726_v55 = vshrl.u32 %v2693_v49, 16  ;;  %v2732_v36 = vshll.u32 %v2708_v28, 16  ;;  %v2979_v37 = vld [vmem:[#allocation2 + $0xc] sm:$0xe]  ;;  %v2993_v1 = vrot.slane %v2693_v49, 5 }
 0x258   : > { %2870 = vmatpush.bf16.msra.mxu1 %v4920_v40  ;;  %v2996_v5 = vrot.slane %v2708_v28, 5  ;;  %v2718_v27 = vrot.slane %v2716_v51, 5  ;;  %v2694_v54 = vld [vmem:[#allocation2 + $0x18] sm:$0xf]  ;;  %v4638_v58 = vrot.slane %v2979_v37, 9  ;;  %v4918_v20 = vld [vmem:[#allocation8 + $0x20] sm:$0xff] }
 0x259   : > { %2955 = vmatpush.bf16.msra.mxu2 %v4916_v24  ;;  %v2724_v8 = vrot.slane %v2722_v48, 5  ;;  %v2728_v23 = vrot.slane %v2726_v55, 4  ;;  %v2734_v57 = vrot.slane %v2732_v36, 5  ;;  %v2995_v10 = vrot.slane %v2993_v1, 4  ;;  %v2695_v15 = vld [vmem:[#allocation2 + $0x1c] sm:$0xf] }
 0x25a   : > { %3081 = vmatpush.bf16.msra.mxu3 %v4924_v45  ;;  %v2737_v7 = vshrl.u32 %v2694_v54, 16  ;;  %v2719_v22 = vor.u32 %v2718_v27, %v2715_v42  ;;  %v2740_v19 = vshll.u32 %v2694_v54, 16  ;;  %v2746_v14 = vshll.u32 %v2695_v15, 16  ;;  %v4914_v17 = vld [vmem:[#allocation8] sm:$0xff]  ;;  %v4937_v16 = vld [vmem:[#allocation8 + $0x98] sm:$0xff]  ;;  %v4910_v4 = vld [vmem:[#allocation2 + $0xc] sm:$0xff] }
 0x25b   : > { %v2729_v18 = vor.u32 %v2728_v23, %v2724_v8  ;;  %v2994_v30 = vsel %vm5759_vm13, %v4638_v58, %v2993_v1  ;;  %v2997_v32 = vsel %vm5759_vm13, %v2995_v10, %v2996_v5  ;;  %v2750_v61 = vshrl.u32 %v2695_v15, 16  ;;  %v4922_v33 = vld [vmem:[#allocation8 + $0x40] sm:$0xff]  ;;  %v4933_v6 = vld [vmem:[#allocation8 + $0x78] sm:$0xff]  ;;  %v4936_v43 = vld [vmem:[#allocation8 + $0x90] sm:$0xff]  ;;  %s4827_s21 = sshll.u32 %s6571_s1, 4  ;;  %s4077_s25 = scalar_lea.sflag [#allocation5], %s289_s5 }
 0x25c   : > { %2871 = vmatpush.bf16.msra.mxu1 %v4919_v53  ;;  %v2739_v46 = vrot.slane %v2737_v7, 4  ;;  %v2720_v44 = vrot.slane %v2719_v22, 4  ;;  %v3028_v34 = vunpack.c.l.b16 %v2994_v30  ;;  %v3029_v29 = vunpack.c.l.b16 %v2997_v32  ;;  %v2709_v62 = vld [vmem:[#allocation2 + $0x20] sm:$0x1]  ;;  %v2980_v52 = vld [vmem:[#allocation2 + $0x18] sm:$0xe]  ;;  %s4089_s11 = sadd.s32 %s4960_s17, %s4827_s21 }
 0x25d   : > { %2956 = vmatpush.bf16.msra.mxu2 %v4915_v3  ;;  %v2730_v9 = vrot.slane %v2729_v18, 4  ;;  %v2742_v31 = vrot.slane %v2740_v19, 5  ;;  %v2748_v41 = vrot.slane %v2746_v14, 5  ;;  %v2752_v60 = vrot.slane %v2750_v61, 4  ;;  %v4932_v11 = vld [vmem:[#allocation8 + $0x70] sm:$0xff]  ;;  %v4935_v21 = vld [vmem:[#allocation8 + $0x88] sm:$0xff] }
 0x25e   : > { %3082 = vmatpush.bf16.msra.mxu3 %v4923_v63  ;;  %v2725_v38 = vsel %vm5768_vm14, %v2720_v44, %v2724_v8  ;;  %v3036_v2 = vpack.c.b16 %v3029_v29, %v3028_v34  ;;  %v2756_v56 = vshll.u32 %v2709_v62, 16  ;;  %v3000_v0 = vrot.slane %v2695_v15, 5  ;;  %v2696_v45 = vld [vmem:[#allocation2 + $0x24] sm:$0xf]  ;;  %v6237_v12 = vld [vmem:[#allocation2 + $0x28] sm:$0xf] }
 0x25f   : > { %v2735_v59 = vsel %vm5768_vm14, %v2730_v9, %v2734_v57  ;;  %v2817_v47 = vunpack.c.l.b16 %v2725_v38  ;;  %v2743_v25 = vor.u32 %v2742_v31, %v2739_v46  ;;  %v2753_v50 = vor.u32 %v2752_v60, %v2748_v41  ;;  %v4931_v51 = vld [vmem:[#allocation8 + $0x68] sm:$0xff]  ;;  %v4911_v22 = vld [vmem:[#allocation2 + $0x18] sm:$0xff]  ;;  %v2981_v30 = vld [vmem:[#allocation2 + $0x24] sm:$0xe]  ;;  %s4828_s12 = sshll.u32 %s4089_s11, 2  ;;  %s5232_s13 = scalar_lea.hbm %s6572_s8, 128 }
 0x260   : > { %2872 = vmatpush.bf16.msra.mxu1 %v4918_v20  ;;  %v2818_v39 = vunpack.c.l.b16 %v2735_v59  ;;  %v2758_v40 = vrot.slane %v2756_v56, 5  ;;  %v4639_v24 = vrot.slane %v2980_v52, 9  ;;  %v3002_v53 = vrot.slane %v3000_v0, 4  ;;  %v2710_v7 = vld [vmem:[#allocation2 + $0x2c] sm:$0x1]  ;;  %v4934_v9 = vld [vmem:[#allocation8 + $0x80] sm:$0xff]  ;;  %s4091_s30 = scalar_lea.hbm %s6572_s8, %s4828_s12 }
 0x261   : > { %2957 = vmatpush.bf16.msra.mxu2 %v4914_v17  ;;  %v2744_v49 = vrot.slane %v2743_v25, 4  ;;  %v2754_v28 = vrot.slane %v2753_v50, 4  ;;  %v3003_v3 = vrot.slane %v2709_v62, 5  ;;  %v2761_v55 = vshrl.u32 %v2696_v45, 16  ;;  %v2698_v46 = vld [vmem:[#allocation2 + $0x30] sm:$0xf] }
 0x262   : > { %3083 = vmatpush.bf16.msra.mxu3 %v4922_v33  ;;  %v2825_v35 = vpack.c.b16 %v2818_v39, %v2817_v47  ;;  %v3001_v48 = vsel %vm5759_vm13, %v4639_v24, %v3000_v0  ;;  %v2764_v63 = vshll.u32 %v2696_v45, 16  ;;  %v2770_v36 = vshll.u32 %v6237_v12, 16  ;;  %v6251_v61 = vld [vmem:[#allocation2 + $0x34] sm:$0xf]  ;;  %v4930_v34 = vld [vmem:[#allocation8 + $0x60] sm:$0xff]  ;;  %v4939_v0 = vld [vmem:[#allocation8 + $0xa8] sm:$0xff] }
 0x263   : > { %v2749_v37 = vsel %vm5768_vm14, %v2744_v49, %v2748_v41  ;;  %v2759_v1 = vsel %vm5768_vm14, %v2754_v28, %v2758_v40  ;;  %v3004_v5 = vsel %vm5759_vm13, %v3002_v53, %v3003_v3  ;;  %v2774_v42 = vshrl.u32 %v6237_v12, 16  ;;  %v4949_v41 = vld [vmem:[#allocation8 + $0xd8] sm:$0xff]  ;;  %v4940_v59 = vld [vmem:[#allocation8 + $0xb0] sm:$0xff]  ;;  %v4938_v3 = vld [vmem:[#allocation8 + $0xa0] sm:$0xff]  ;;  %s4094_s18 = sshll.u32 %s4091_s30, 4  ;;  %s4095_s18 = int_to_ptr.hbm [resolvable:$true] %s4094_s18 }
 0x264   : > { %3190 = vmatpush.bf16.msrb.mxu1 %v4933_v6  ;;  %4634 = vmatmul.msk.bf16.vlgmr.msra.gmra.mxu2 %vm901_vm15, %v4910_v4  ;;  %v2819_v27 = vunpack.c.l.b16 %v2749_v37  ;;  %v2820_v8 = vunpack.c.l.b16 %v2759_v1  ;;  %v3030_v23 = vunpack.c.l.b16 %v3001_v48  ;;  %v3031_v54 = vunpack.c.l.b16 %v3004_v5  ;;  %v4948_v39 = vld [vmem:[#allocation8 + $0xd0] sm:$0xff]  ;;  %s5226_s10 = sshra.s32 %s4095_s18, 4  ;;  %s5227_s10 = int_to_ptr.hbm [resolvable:$true] %s5226_s10 }
 0x265   : > { %3392 = vmatpush.bf16.msrb.mxu2 %v4937_v16  ;;  %4598 = vmatmul.msk.bf16.vlgmr.msra.gmra.mxu1 %vm901_vm15, %v2825_v35  ;;  %v2763_v57 = vrot.slane %v2761_v55, 4  ;;  %v2766_v58 = vrot.slane %v2764_v63, 5  ;;  %v2772_v10 = vrot.slane %v2770_v36, 5  ;;  %v2776_v15 = vrot.slane %v2774_v42, 4  ;;  %v4941_v16 = vld [vmem:[#allocation8 + $0xb8] sm:$0xff]  ;;  %s5228_s6 = scalar_lea.hbm %s5227_s10, 32  ;;  %p5233_p9 = scmp.lt.s32.totalorder %s5227_s10, %s6572_s8 }
 0x266   : > { %4658 = vmatmul.msk.bf16.vlgmr.msra.gmra.mxu3 %vm901_vm15, %v3036_v2  ;;  %v2826_v18 = vpack.c.b16 %v2820_v8, %v2819_v27  ;;  %v3037_v19 = vpack.c.b16 %v3031_v54, %v3030_v23  ;;  %v2780_v17 = vshll.u32 %v2710_v7, 16  ;;  %v3007_v32 = vrot.slane %v6237_v12, 5  ;;  %3640 = vmatpush.bf16.msrb.mxu0 %v4949_v41  ;;  %v2711_v35 = vld [vmem:[#allocation2 + $0x38] sm:$0x1]  ;;  %v2982_v36 = vld [vmem:[#allocation2 + $0x30] sm:$0xe]  ;;  %p5229_p5 = scmp.ne.s32.totalorder %s5227_s10, %s5228_s6  ;;  %p5234_p12 = scmp.lt.s32.totalorder %s5232_s13, %s5228_s6 }
 0x267   : > { %v2767_v14 = vor.u32 %v2766_v58, %v2763_v57  ;;  %v2777_v20 = vor.u32 %v2776_v15, %v2772_v10  ;;  %v4640_v33 = vrot.slane %v2981_v30, 9  ;;  %v3010_v44 = vrot.slane %v2710_v7, 5  ;;  %3530 = vmatpush.bf16.msrb.mxu3 %v4941_v16  ;;  %v4957_v23 = vld [vmem:[#allocation8 + $0x118] sm:$0xff]  ;;  %v4947_v54 = vld [vmem:[#allocation8 + $0xc8] sm:$0xff]  ;;  %v4946_v15 = vld [vmem:[#allocation8 + $0xc0] sm:$0xff] }
 0x268   : > { %3191 = vmatpush.bf16.msrb.mxu1 %v4932_v11  ;;  %v2782_v6 = vrot.slane %v2780_v17, 5  ;;  %v3009_v31 = vrot.slane %v3007_v32, 4  ;;  %v2785_v60 = vshrl.u32 %v2698_v46, 16  ;;  %v2788_v38 = vshll.u32 %v2698_v46, 16  ;;  %v4953_v57 = vld [vmem:[#allocation8 + $0xf8] sm:$0xff]  ;;  %p5230_p7 = pnand %p5229_p5, %p5450_p6  ;;  %p5235_p13 = por %p5234_p12, %p5233_p9 }
 0x269   : > { %3393 = vmatpush.bf16.msrb.mxu2 %v4936_v43  ;;  %v2768_v29 = vrot.slane %v2767_v14, 4  ;;  %v2778_v62 = vrot.slane %v2777_v20, 4  ;;  %v2794_v4 = vshll.u32 %v6251_v61, 16  ;;  %v2798_v47 = vshrl.u32 %v6251_v61, 16  ;;  %v3223_v58 = vld [vmem:[#allocation2 + $0x18] sm:$0xf] }
 0x26a   : > { %v3008_v25 = vsel %vm5759_vm13, %v4640_v33, %v3007_v32  ;;  %v3011_v50 = vsel %vm5759_vm13, %v3009_v31, %v3010_v44  ;;  %v2787_v43 = vrot.slane %v2785_v60, 4  ;;  %v2790_v52 = vrot.slane %v2788_v38, 5  ;;  %3641 = vmatpush.bf16.msrb.mxu0 %v4948_v39  ;;  %v4942_v32 = vld [vmem:[#allocation2 + $0x24] sm:$0xff]  ;;  %p5231_p8 = pneg %p5230_p7 }
 0x26b   : > { %v2773_v2 = vsel %vm5768_vm14, %v2768_v29, %v2772_v10  ;;  %v2783_v56 = vsel %vm5768_vm14, %v2778_v62, %v2782_v6  ;;  %3531 = vmatpush.bf16.msrb.mxu3 %v4940_v59  ;;  %v2796_v11 = vrot.slane %v2794_v4, 5  ;;  %v2800_v40 = vrot.slane %v2798_v47, 4  ;;  %v3224_v10 = vld [vmem:[#allocation2 + $0x1c] sm:$0xf]  ;;  %v3225_v62 = vld [vmem:[#allocation2 + $0x20] sm:$0x1] }
 0x26c   : > { %3192 = vmatpush.bf16.msrb.mxu1 %v4931_v51  ;;  %v2821_v24 = vunpack.c.l.b16 %v2773_v2  ;;  %v2822_v45 = vunpack.c.l.b16 %v2783_v56  ;;  %v3032_v12 = vunpack.c.l.b16 %v3008_v25  ;;  %v3033_v49 = vunpack.c.l.b16 %v3011_v50  ;;  %v4913_v6 = vld [vmem:[#allocation2 + $0x30] sm:$0xff]  ;;  %v3425_v47 = vld [vmem:[#allocation2 + $0x18] sm:$0xe]  ;;  %v3226_v39 = vld [vmem:[#allocation2 + $0x24] sm:$0xf]  ;;  %p5236_p4 = pnand %p5235_p13, %p5231_p8 }
 0x26d   : > { %3394 = vmatpush.bf16.msrb.mxu2 %v4935_v21  ;;  %v2791_v28 = vor.u32 %v2790_v52, %v2787_v43  ;;  %v2804_v53 = vshll.u32 %v2711_v35, 16  ;;  %v4912_v21 = vld [vmem:[#allocation2 + $0x24] sm:$0xff]  ;;  %v2801_v51 = vor.u32 %v2800_v40, %v2796_v11  ;;  %v3014_v48 = vrot.slane %v6251_v61, 5  ;;  %v4956_v43 = vld [vmem:[#allocation8 + $0x110] sm:$0xff] }
 0x26e   : > { %v2827_v55 = vpack.c.b16 %v2822_v45, %v2821_v24  ;;  %v3038_v63 = vpack.c.b16 %v3033_v49, %v3032_v12  ;;  %v4641_v42 = vrot.slane %v2982_v36, 9  ;;  %v3017_v8 = vrot.slane %v2711_v35, 5  ;;  %3642 = vmatpush.bf16.msrb.mxu0 %v4947_v54  ;;  %v3227_v2 = vld [vmem:[#allocation2 + $0x28] sm:$0xf]  ;;  %v4952_v52 = vld [vmem:[#allocation8 + $0xf0] sm:$0xff] }
 0x26f   : > { %3532 = vmatpush.bf16.msrb.mxu3 %v4939_v0  ;;  %v2792_v37 = vrot.slane %v2791_v28, 4  ;;  %v2806_v1 = vrot.slane %v2804_v53, 5  ;;  %v2802_v5 = vrot.slane %v2801_v51, 4  ;;  %v3016_v27 = vrot.slane %v3014_v48, 4 }
 0x270   : > { %3193 = vmatpush.bf16.msrb.mxu1 %v4930_v34  ;;  %v3236_v14 = vshrl.u32 %v3223_v58, 16  ;;  %v3239_v20 = vshll.u32 %v3223_v58, 16  ;;  %v3245_v17 = vshll.u32 %v3224_v10, 16  ;;  %v3249_v30 = vshrl.u32 %v3224_v10, 16  ;;  %v4926_v58 = vld [vmem:[#allocation2 + $0x18] sm:$0xff] }
 0x271   : > { %3395 = vmatpush.bf16.msrb.mxu2 %v4934_v9  ;;  %v2797_v7 = vsel %vm5768_vm14, %v2792_v37, %v2796_v11  ;;  %v3255_v59 = vshll.u32 %v3225_v62, 16  ;;  %v3443_v4 = vrot.slane %v3224_v10, 5  ;;  %v4718_v0 = vrot.slane %v3425_v47, 9 }
 0x272   : > { %3643 = vmatpush.bf16.msrb.mxu0 %v4946_v15  ;;  %v2823_v46 = vunpack.c.l.b16 %v2797_v7  ;;  %v3238_v9 = vrot.slane %v3236_v14, 4  ;;  %v3241_v16 = vrot.slane %v3239_v20, 5  ;;  %v3247_v34 = vrot.slane %v3245_v17, 5  ;;  %v3426_v15 = vld [vmem:[#allocation2 + $0x24] sm:$0xe]  ;;  %v4955_v17 = vld [vmem:[#allocation8 + $0x108] sm:$0xff] }
 0x273   : > { %3533 = vmatpush.bf16.msrb.mxu3 %v4938_v3  ;;  %v3251_v29 = vrot.slane %v3249_v30, 4  ;;  %v3257_v50 = vrot.slane %v3255_v59, 5  ;;  %v3445_v35 = vrot.slane %v3443_v4, 4  ;;  %v3446_v11 = vrot.slane %v3225_v62, 5  ;;  %v4951_v30 = vld [vmem:[#allocation8 + $0xe8] sm:$0xff] }
 0x274   : > { %4635 = vmatmul.msk.bf16.gmra.mxu2 %vm901_vm15, %v4911_v22  ;;  %v2807_v22 = vsel %vm5768_vm14, %v2802_v5, %v2806_v1  ;;  %3842 = vmatpush.bf16.msra.mxu1 %v4953_v57  ;;  %v3242_v60 = vor.u32 %v3241_v16, %v3238_v9  ;;  %v3260_v40 = vshrl.u32 %v3226_v39, 16  ;;  %v3263_v24 = vshll.u32 %v3226_v39, 16 }
 0x275   : > { %4599 = vmatmul.msk.bf16.gmra.mxu1 %vm901_vm15, %v2826_v18  ;;  %3980 = vmatpush.bf16.msra.mxu2 %v4957_v23  ;;  %v3015_v18 = vsel %vm5759_vm13, %v4641_v42, %v3014_v48  ;;  %v2824_v61 = vunpack.c.l.b16 %v2807_v22  ;;  %v3252_v38 = vor.u32 %v3251_v29, %v3247_v34  ;;  %v3269_v45 = vshll.u32 %v3227_v2, 16  ;;  %v3228_v42 = vld [vmem:[#allocation2 + $0x2c] sm:$0x1] }
 0x276   : > { %4659 = vmatmul.msk.bf16.gmra.mxu3 %vm901_vm15, %v3037_v19  ;;  %v3018_v19 = vsel %vm5759_vm13, %v3016_v27, %v3017_v8  ;;  %v3034_v33 = vunpack.c.l.b16 %v3015_v18  ;;  %4774 = vmatmul.msk.bf16.vlgmr.msrb.gmra.mxu0 %vm901_vm15, %v4942_v32  ;;  %v3243_v56 = vrot.slane %v3242_v60, 4  ;;  %v3273_v12 = vshrl.u32 %v3227_v2, 16  ;;  %v3229_v32 = vld [vmem:[#allocation2 + $0x30] sm:$0xf] }
 0x277   : > { %v3035_v44 = vunpack.c.l.b16 %v3018_v19  ;;  %v2828_v41 = vpack.c.b16 %v2824_v61, %v2823_v46  ;;  %v3253_v25 = vrot.slane %v3252_v38, 4  ;;  %v3444_v53 = vsel %vm5759_vm13, %v4718_v0, %v3443_v4  ;;  %v3230_v46 = vld [vmem:[#allocation2 + $0x34] sm:$0xf] }
 0x278   : > { %3843 = vmatpush.bf16.msra.mxu1 %v4952_v52  ;;  %v3248_v49 = vsel %vm5768_vm14, %v3243_v56, %v3247_v34  ;;  %v3447_v3 = vsel %vm5759_vm13, %v3445_v35, %v3446_v11  ;;  %v3262_v51 = vrot.slane %v3260_v40, 4  ;;  %v3265_v48 = vrot.slane %v3263_v24, 5  ;;  %v3427_v11 = vld [vmem:[#allocation2 + $0x30] sm:$0xe]  ;;  %v3232_v40 = vld [vmem:[#allocation2 + $0x3c] sm:$0xf] }
 0x279   : > { %v3039_v31 = vpack.c.b16 %v3035_v44, %v3034_v33  ;;  %3981 = vmatpush.bf16.msra.mxu2 %v4956_v43  ;;  %v3258_v28 = vsel %vm5768_vm14, %v3253_v25, %v3257_v50  ;;  %v3340_v36 = vunpack.c.l.b16 %v3248_v49  ;;  %v3478_v1 = vunpack.c.l.b16 %v3444_v53  ;;  %v4927_v25 = vld [vmem:[#allocation2 + $0x24] sm:$0xff]  ;;  %v3233_v24 = vld [vmem:[#allocation2 + $0x40] sm:$0xf] }
 0x27a   : > { %v3341_v37 = vunpack.c.l.b16 %v3258_v28  ;;  %v3479_v5 = vunpack.c.l.b16 %v3447_v3  ;;  %v3266_v27 = vor.u32 %v3265_v48, %v3262_v51  ;;  %v3279_v54 = vshll.u32 %v3228_v42, 16  ;;  %v4954_v28 = vld [vmem:[#allocation8 + $0x100] sm:$0xff] }
 0x27b   : > { %v3450_v57 = vrot.slane %v3227_v2, 5  ;;  %v4719_v19 = vrot.slane %v3426_v15, 9  ;;  %v3453_v20 = vrot.slane %v3228_v42, 5  ;;  %v3284_v16 = vshrl.u32 %v3229_v32, 16  ;;  %v3231_v2 = vld [vmem:[#allocation2 + $0x38] sm:$0x1] }
 0x27c   : > { %v3348_v23 = vpack.c.b16 %v3341_v37, %v3340_v36  ;;  %v3486_v10 = vpack.c.b16 %v3479_v5, %v3478_v1  ;;  %v3267_v7 = vrot.slane %v3266_v27, 4  ;;  %v3281_v18 = vrot.slane %v3279_v54, 5  ;;  %3844 = vmatpush.bf16.msra.mxu1 %v4951_v30  ;;  %v4950_v53 = vld [vmem:[#allocation8 + $0xe0] sm:$0xff]  ;;  %v4945_v27 = vld [vmem:[#allocation2 + $0x48] sm:$0xff] }
 0x27d   : > { %v3452_v14 = vrot.slane %v3450_v57, 4  ;;  %3982 = vmatpush.bf16.msra.mxu2 %v4955_v17  ;;  %v3451_v44 = vsel %vm5759_vm13, %v4719_v19, %v3450_v57  ;;  %v3287_v34 = vshll.u32 %v3229_v32, 16  ;;  %v3293_v29 = vshll.u32 %v3230_v46, 16  ;;  %v3234_v15 = vld [vmem:[#allocation2 + $0x44] sm:$0x1]  ;;  %v4928_v17 = vld [vmem:[#allocation2 + $0x30] sm:$0xff] }
 0x27e   : > { %v3297_v62 = vshrl.u32 %v3230_v46, 16  ;;  %v3480_v60 = vunpack.c.l.b16 %v3451_v44  ;;  %v3286_v59 = vrot.slane %v3284_v16, 4  ;;  %v3303_v0 = vshll.u32 %v3231_v2, 16  ;;  %v3428_v44 = vld [vmem:[#allocation2 + $0x3c] sm:$0xe] }
 0x27f   : > { %v3454_v9 = vsel %vm5759_vm13, %v3452_v14, %v3453_v20  ;;  %v3289_v4 = vrot.slane %v3287_v34, 5  ;;  %v3295_v47 = vrot.slane %v3293_v29, 5  ;;  %v3457_v35 = vrot.slane %v3230_v46, 5  ;;  %v3674_v16 = vld [vmem:[#allocation2 + $0x28] sm:$0xf] }
 0x280   : > { %v3481_v38 = vunpack.c.l.b16 %v3454_v9  ;;  %v3299_v39 = vrot.slane %v3297_v62, 4  ;;  %v3305_v49 = vrot.slane %v3303_v0, 5  ;;  %v4720_v3 = vrot.slane %v3427_v11, 9  ;;  %3845 = vmatpush.bf16.msra.mxu1 %v4950_v53  ;;  %v3673_v9 = vld [vmem:[#allocation2 + $0x24] sm:$0xf] }
 0x281   : > { %v3290_v43 = vor.u32 %v3289_v4, %v3286_v59  ;;  %v3460_v51 = vrot.slane %v3231_v2, 5  ;;  %v3308_v48 = vshrl.u32 %v3232_v40, 16  ;;  %v3321_v36 = vshrl.u32 %v3233_v24, 16  ;;  %3983 = vmatpush.bf16.msra.mxu2 %v4954_v28  ;;  %v3875_v53 = vld [vmem:[#allocation2 + $0x24] sm:$0xe] }
 0x282   : > { %v3487_v50 = vpack.c.b16 %v3481_v38, %v3480_v60  ;;  %v3300_v52 = vor.u32 %v3299_v39, %v3295_v47  ;;  %v3458_v5 = vsel %vm5759_vm13, %v4720_v3, %v3457_v35  ;;  %v3327_v14 = vshll.u32 %v3234_v15, 16 }
 0x283   : > { %v3323_v57 = vrot.slane %v3321_v36, 4  ;;  %v3464_v32 = vrot.slane %v3233_v24, 5  ;;  %v4721_v34 = vrot.slane %v3428_v44, 9  ;;  %v3467_v62 = vrot.slane %v3234_v15, 5  ;;  %v3676_v36 = vld [vmem:[#allocation2 + $0x30] sm:$0xf] }
 0x284   : > { %4636 = vmatmul.msk.bf16.gmra.mxu2 %vm901_vm15, %v4912_v21  ;;  %v4943_v21 = vld [vmem:[#allocation2 + $0x30] sm:$0xff]  ;;  %v3689_v60 = vshll.u32 %v3673_v9, 16  ;;  %v3695_v38 = vshll.u32 %v3674_v16, 16  ;;  %v3699_v59 = vshrl.u32 %v3674_v16, 16  ;;  %v3893_v28 = vrot.slane %v3674_v16, 5 }
 0x285   : > { %4600 = vmatmul.msk.bf16.gmra.mxu1 %vm901_vm15, %v2827_v55  ;;  %v3271_v55 = vrot.slane %v3269_v45, 5  ;;  %v3291_v45 = vrot.slane %v3290_v43, 4  ;;  %v3466_v29 = vrot.slane %v3464_v32, 4  ;;  %v3465_v4 = vsel %vm5759_vm13, %v4721_v34, %v3464_v32  ;;  %v3876_v32 = vld [vmem:[#allocation2 + $0x30] sm:$0xe] }
 0x286   : > { %4660 = vmatmul.msk.bf16.gmra.mxu3 %vm901_vm15, %v3038_v63  ;;  %v3275_v63 = vrot.slane %v3273_v12, 4  ;;  %4775 = vmatmul.msk.bf16.gmra.mxu0 %vm901_vm15, %v4943_v21  ;;  %v3301_v12 = vrot.slane %v3300_v52, 4  ;;  %v3459_v21 = vrot.slane %v3457_v35, 4  ;;  %v3701_v43 = vrot.slane %v3699_v59, 4  ;;  %v3675_v35 = vld [vmem:[#allocation2 + $0x2c] sm:$0x1] }
 0x287   : > { %v3272_v61 = vsel %vm5768_vm14, %v3267_v7, %v3271_v55  ;;  %v3296_v37 = vsel %vm5768_vm14, %v3291_v45, %v3295_v47  ;;  %v3482_v7 = vunpack.c.l.b16 %v3458_v5  ;;  %v3468_v47 = vsel %vm5759_vm13, %v3466_v29, %v3467_v62  ;;  %v4929_v45 = vld [vmem:[#allocation2 + $0x3c] sm:$0xff] }
 0x288   : > { %v3276_v8 = vor.u32 %v3275_v63, %v3271_v55  ;;  %v3311_v55 = vshll.u32 %v3232_v40, 16  ;;  %v3317_v63 = vshll.u32 %v3233_v24, 16  ;;  %v3306_v1 = vsel %vm5768_vm14, %v3301_v12, %v3305_v49  ;;  %v3679_v62 = vld [vmem:[#allocation2 + $0x3c] sm:$0xf] }
 0x289   : > { %v3461_v42 = vsel %vm5759_vm13, %v3459_v21, %v3460_v51  ;;  %v3484_v52 = vunpack.c.l.b16 %v3465_v4  ;;  %v3485_v0 = vunpack.c.l.b16 %v3468_v47  ;;  %v3705_v49 = vshll.u32 %v3675_v35, 16 }
 0x28a   : > { %v3277_v22 = vrot.slane %v3276_v8, 4  ;;  %v3310_v8 = vrot.slane %v3308_v48, 4  ;;  %v3319_v54 = vrot.slane %v3317_v63, 5  ;;  %v4798_v48 = vrot.slane %v3875_v53, 9 }
 0x28b   : > { %v3489_v12 = vpack.c.b16 %v3485_v0, %v3484_v52  ;;  %v3707_v51 = vrot.slane %v3705_v49, 5  ;;  %v3896_v63 = vrot.slane %v3675_v35, 5  ;;  %v4799_v16 = vrot.slane %v3876_v32, 9 }
 0x28c   : > { %v3282_v33 = vsel %vm5768_vm14, %v3277_v22, %v3281_v18  ;;  %v3483_v22 = vunpack.c.l.b16 %v3461_v42  ;;  %v3324_v19 = vor.u32 %v3323_v57, %v3319_v54  ;;  %v3894_v42 = vsel %vm5759_vm13, %v4798_v48, %v3893_v28 }
 0x28d   : > { %v3734_v47 = vshrl.u32 %v3679_v62, 16 }
 0x28e   : > { %v3488_v30 = vpack.c.b16 %v3483_v22, %v3482_v7 }
 0x294   : > { %4637 = vmatmul.msk.bf16.gmra.mxu2 %vm901_vm15, %v4913_v6  ;;  %v4944_v6 = vld [vmem:[#allocation2 + $0x3c] sm:$0xff] }
 0x295   : > { %4601 = vmatmul.msk.bf16.gmra.mxu1 %vm901_vm15, %v2828_v41  ;;  %v3343_v41 = vunpack.c.l.b16 %v3282_v33  ;;  %v3329_v33 = vrot.slane %v3327_v14, 5 }
 0x296   : > { %4661 = vmatmul.msk.bf16.gmra.mxu3 %vm901_vm15, %v3039_v31  ;;  %v3342_v31 = vunpack.c.l.b16 %v3272_v61  ;;  %4776 = vmatmul.msk.bf16.gmra.mxu0 %vm901_vm15, %v4944_v6  ;;  %v3325_v61 = vrot.slane %v3324_v19, 4 }
 0x298   : > { %v3349_v56 = vpack.c.b16 %v3343_v41, %v3342_v31  ;;  %v3330_v31 = vsel %vm5768_vm14, %v3325_v61, %v3329_v33  ;;  %v3686_v41 = vshrl.u32 %v3673_v9, 16 }
 0x299   : > { %v3347_v2 = vunpack.c.l.b16 %v3330_v31 }
 0x2a4   : > { %4714 = vmatmul.msk.bf16.vlgmr.msrb.gmra.mxu2 %vm901_vm15, %v3348_v23  ;;  %v3313_v23 = vrot.slane %v3311_v55, 5  ;;  %v3895_v55 = vrot.slane %v3893_v28, 4  ;;  %v3681_v28 = vld [vmem:[#allocation2 + $0x44] sm:$0x1] }
 0x2a5   : > { %4694 = vmatmul.msk.bf16.vlgmr.msrb.gmra.mxu1 %vm901_vm15, %v4926_v58  ;;  %v3344_v58 = vunpack.c.l.b16 %v3296_v37  ;;  %v3677_v37 = vld [vmem:[#allocation2 + $0x34] sm:$0xf] }
 0x2a6   : > { %4738 = vmatmul.msk.bf16.vlgmr.msrb.gmra.mxu3 %vm901_vm15, %v3486_v10  ;;  %v3345_v10 = vunpack.c.l.b16 %v3306_v1  ;;  %4777 = vmatmul.msk.bf16.gmra.mxu0 %vm901_vm15, %v4945_v27  ;;  %v3314_v18 = vor.u32 %v3313_v23, %v3310_v8  ;;  %v3897_v27 = vsel %vm5759_vm13, %v3895_v55, %v3896_v63  ;;  %v3710_v8 = vshrl.u32 %v3676_v36, 16 }
 0x2a7   : > { %v3713_v23 = vshll.u32 %v3676_v36, 16  ;;  %v3723_v57 = vshrl.u32 %v3677_v37, 16  ;;  %v3753_v63 = vshll.u32 %v3681_v28, 16 }
 0x2a8   : > { %v3350_v20 = vpack.c.b16 %v3345_v10, %v3344_v58  ;;  %v3315_v46 = vrot.slane %v3314_v18, 4  ;;  %v3928_v58 = vunpack.c.l.b16 %v3894_v42  ;;  %v3929_v10 = vunpack.c.l.b16 %v3897_v27 }
 0x2a9   : > { %v3712_v22 = vrot.slane %v3710_v8, 4  ;;  %v3715_v18 = vrot.slane %v3713_v23, 5  ;;  %v3725_v14 = vrot.slane %v3723_v57, 4  ;;  %v3755_v27 = vrot.slane %v3753_v63, 5 }
 0x2aa   : > { %v3320_v6 = vsel %vm5768_vm14, %v3315_v46, %v3319_v54  ;;  %v3719_v54 = vshll.u32 %v3677_v37, 16 }
 0x2ab   : > { %v3346_v39 = vunpack.c.l.b16 %v3320_v6  ;;  %v3716_v33 = vor.u32 %v3715_v18, %v3712_v22  ;;  %v3680_v6 = vld [vmem:[#allocation2 + $0x40] sm:$0xf] }
 0x2ac   : > { %v3721_v19 = vrot.slane %v3719_v54, 5  ;;  %v3907_v36 = vrot.slane %v3680_v6, 5  ;;  %v3910_v54 = vrot.slane %v3681_v28, 5 }
 0x2ad   : > { %v3351_v11 = vpack.c.b16 %v3347_v2, %v3346_v39  ;;  %v3717_v31 = vrot.slane %v3716_v33, 4  ;;  %v3737_v2 = vshll.u32 %v3679_v62, 16 }
 0x2ae   : > { %v3726_v44 = vor.u32 %v3725_v14, %v3721_v19  ;;  %v3909_v23 = vrot.slane %v3907_v36, 4 }
 0x2b4   : > { %4715 = vmatmul.msk.bf16.gmra.mxu2 %vm901_vm15, %v3349_v56  ;;  %v3688_v56 = vrot.slane %v3686_v41, 4  ;;  %v3727_v41 = vrot.slane %v3726_v44, 4 }
 0x2b5   : > { %4695 = vmatmul.msk.bf16.gmra.mxu1 %vm901_vm15, %v4927_v25  ;;  %v3691_v25 = vrot.slane %v3689_v60, 5 }
 0x2b6   : > { %4739 = vmatmul.msk.bf16.gmra.mxu3 %vm901_vm15, %v3487_v50  ;;  %v3697_v50 = vrot.slane %v3695_v38, 5 }
 0x2b7   : > { %v3692_v40 = vor.u32 %v3691_v25, %v3688_v56  ;;  %v3743_v56 = vshll.u32 %v3680_v6, 16  ;;  %v3747_v25 = vshrl.u32 %v3680_v6, 16 }
 0x2b8   : > { %v3702_v24 = vor.u32 %v3701_v43, %v3697_v50  ;;  %v3722_v43 = vsel %vm5768_vm14, %v3717_v31, %v3721_v19  ;;  %v3911_v19 = vsel %vm5759_vm13, %v3909_v23, %v3910_v54  ;;  %v3684_v31 = vld [vmem:[#allocation2 + $0x50] sm:$0x1] }
 0x2b9   : > { %v3693_v3 = vrot.slane %v3692_v40, 4  ;;  %v3739_v40 = vrot.slane %v3737_v2, 5 }
 0x2ba   : > { %v3703_v21 = vrot.slane %v3702_v24, 4  ;;  %v3745_v24 = vrot.slane %v3743_v56, 5  ;;  %v3777_v56 = vshll.u32 %v3684_v31, 16 }
 0x2bb   : > { %v3698_v1 = vsel %vm5768_vm14, %v3693_v3, %v3697_v50 }
 0x2bc   : > { %v3708_v5 = vsel %vm5768_vm14, %v3703_v21, %v3707_v51  ;;  %v3790_v15 = vunpack.c.l.b16 %v3698_v1  ;;  %v3877_v1 = vld [vmem:[#allocation2 + $0x3c] sm:$0xe] }
 0x2bd   : > { %v3791_v7 = vunpack.c.l.b16 %v3708_v5  ;;  %v4800_v8 = vrot.slane %v3877_v1, 9 }
 0x2bf   : > { %v3798_v46 = vpack.c.b16 %v3791_v7, %v3790_v15  ;;  %v3908_v18 = vsel %vm5759_vm13, %v4800_v8, %v3907_v36 }
 0x2c4   : > { %4716 = vmatmul.msk.bf16.gmra.mxu2 %vm901_vm15, %v3350_v20  ;;  %v3678_v20 = vld [vmem:[#allocation2 + $0x38] sm:$0x1] }
 0x2c5   : > { %4696 = vmatmul.msk.bf16.gmra.mxu1 %vm901_vm15, %v4928_v17  ;;  %v3900_v17 = vrot.slane %v3677_v37, 5  ;;  %v3729_v9 = vshll.u32 %v3678_v20, 16  ;;  %v3903_v29 = vrot.slane %v3678_v20, 5 }
 0x2c6   : > { %4740 = vmatmul.msk.bf16.gmra.mxu3 %vm901_vm15, %v3488_v30  ;;  %v3936_v30 = vpack.c.b16 %v3929_v10, %v3928_v58  ;;  %v3682_v58 = vld [vmem:[#allocation2 + $0x48] sm:$0xf]  ;;  %v3683_v10 = vld [vmem:[#allocation2 + $0x4c] sm:$0xf] }
 0x2c7   : > { %v3902_v34 = vrot.slane %v3900_v17, 4  ;;  %v3731_v60 = vrot.slane %v3729_v9, 5  ;;  %v3901_v59 = vsel %vm5759_vm13, %v4799_v16, %v3900_v17  ;;  %v3758_v20 = vshrl.u32 %v3682_v58, 16 }
 0x2c8   : > { %v3930_v0 = vunpack.c.l.b16 %v3901_v59  ;;  %v3761_v17 = vshll.u32 %v3682_v58, 16  ;;  %v3771_v32 = vshrl.u32 %v3683_v10, 16  ;;  %v3914_v59 = vrot.slane %v3683_v10, 5 }
 0x2c9   : > { %v3904_v4 = vsel %vm5759_vm13, %v3902_v34, %v3903_v29  ;;  %v3732_v52 = vsel %vm5768_vm14, %v3727_v41, %v3731_v60  ;;  %v3760_v9 = vrot.slane %v3758_v20, 4 }
 0x2ca   : > { %v3931_v35 = vunpack.c.l.b16 %v3904_v4  ;;  %v3793_v49 = vunpack.c.l.b16 %v3732_v52  ;;  %v3763_v16 = vrot.slane %v3761_v17, 5  ;;  %v3773_v29 = vrot.slane %v3771_v32, 4 }
 0x2cb   : > { %v3917_v52 = vrot.slane %v3684_v31, 5 }
 0x2cc   : > { %v3937_v21 = vpack.c.b16 %v3931_v35, %v3930_v0 }
 0x2d4   : > { %4717 = vmatmul.msk.bf16.gmra.mxu2 %vm901_vm15, %v3351_v11  ;;  %v3736_v11 = vrot.slane %v3734_v47, 4  ;;  %v3764_v47 = vor.u32 %v3763_v16, %v3760_v9 }
 0x2d5   : > { %4697 = vmatmul.msk.bf16.gmra.mxu1 %vm901_vm15, %v4929_v45  ;;  %v3749_v45 = vrot.slane %v3747_v25, 4  ;;  %v3878_v25 = vld [vmem:[#allocation2 + $0x48] sm:$0xe] }
 0x2d6   : > { %4741 = vmatmul.msk.bf16.gmra.mxu3 %vm901_vm15, %v3489_v12  ;;  %v3792_v12 = vunpack.c.l.b16 %v3722_v43  ;;  %v3740_v51 = vor.u32 %v3739_v40, %v3736_v11  ;;  %v3916_v43 = vrot.slane %v3914_v59, 4  ;;  %v3765_v0 = vrot.slane %v3764_v47, 4 }
 0x2d7   : > { %v3750_v48 = vor.u32 %v3749_v45, %v3745_v24  ;;  %v3779_v11 = vrot.slane %v3777_v56, 5 }
 0x2d8   : > { %v3799_v55 = vpack.c.b16 %v3793_v49, %v3792_v12  ;;  %v3741_v5 = vrot.slane %v3740_v51, 4  ;;  %v3918_v49 = vsel %vm5759_vm13, %v3916_v43, %v3917_v52 }
 0x2d9   : > { %v3751_v42 = vrot.slane %v3750_v48, 4  ;;  %v3935_v48 = vunpack.c.l.b16 %v3918_v49 }
 0x2da   : > { %v3746_v7 = vsel %vm5768_vm14, %v3741_v5, %v3745_v24 }
 0x2db   : > { %v3756_v22 = vsel %vm5768_vm14, %v3751_v42, %v3755_v27  ;;  %v3794_v33 = vunpack.c.l.b16 %v3746_v7 }
 0x2dc   : > { %v3795_v44 = vunpack.c.l.b16 %v3756_v22 }
 0x2e2   : > { %v2874_v61 = vpop.f32.mrf.mxu1 }
 0x2e4   : > { %4818 = vmatmul.msk.bf16.vlgmr.msra.gmra.mxu2 %vm901_vm15, %v3936_v30  ;;  %v3767_v30 = vshll.u32 %v3683_v10, 16 }
 0x2e5   : > { %4794 = vmatmul.msk.bf16.vlgmr.msra.gmra.mxu1 %vm901_vm15, %v3798_v46  ;;  %v3932_v46 = vunpack.c.l.b16 %v3908_v18 }
 0x2e6   : > { %v3769_v34 = vrot.slane %v3767_v30, 5 }
 0x2e7   : > { %v2959_v38 = vpop.f32.mrf.mxu2 }
 0x2e8   : > { %v6342_v39 = vadd.f32 %v2959_v38, %v2874_v61  ;;  %v3933_v61 = vunpack.c.l.b16 %v3911_v19  ;;  %v3800_v38 = vpack.c.b16 %v3795_v44, %v3794_v33  ;;  %v3774_v2 = vor.u32 %v3773_v29, %v3769_v34 }
 0x2e9   : > { %v6362_v62 = vpop.f32.mrf.mxu3 }
 0x2ea   : > { %v2876_v50 = vpop.f32.mrf.mxu1  ;;  %v3938_v60 = vpack.c.b16 %v3933_v61, %v3932_v46  ;;  %v3775_v35 = vrot.slane %v3774_v2, 4  ;;  %v3105_v31 = vadd.f32 %v6362_v62, %v6342_v39  ;;  %v4962_v62 = vld [vmem:[%s6415_s29] sm:$0xff]  }
 0x2ef   : > { %v2961_v53 = vpop.f32.mrf.mxu2 }
 0x2f0   : > { %v6348_v3 = vadd.f32 %v2961_v53, %v2876_v50  ;;  %v4801_v50 = vrot.slane %v3878_v25, 9  ;;  %v3770_v53 = vsel %vm5768_vm14, %v3765_v0, %v3769_v34 }
 0x2f1   : > { %v3087_v45 = vpop.f32.mrf.mxu3 }
 0x2f2   : > { %v2879_v37 = vpop.f32.mrf.mxu1  ;;  %v3915_v12 = vsel %vm5759_vm13, %v4801_v50, %v3914_v59  ;;  %v3106_v56 = vadd.f32 %v3087_v45, %v6348_v3 }
 0x2f3   : > { %v3934_v51 = vunpack.c.l.b16 %v3915_v12  ;;  %v3645_v29 = vpop.f32.mrf.mxu0 }
 0x2f4   : > { %4819 = vmatmul.msk.bf16.gmra.mxu2 %vm901_vm15, %v3937_v21  ;;  %v3780_v21 = vsel %vm5768_vm14, %v3775_v35, %v3779_v11  ;;  %v6421_v11 = vld [vmem:[%s6527_s4] ss:$0 sm:$0xff] }
 0x2f5   : > { %4795 = vmatmul.msk.bf16.gmra.mxu1 %vm901_vm15, %v3799_v55  ;;  %v3796_v55 = vunpack.c.l.b16 %v3770_v53  ;;  %v3797_v63 = vunpack.c.l.b16 %v3780_v21  ;;  %v3939_v1 = vpack.c.b16 %v3935_v48, %v3934_v51 }
 0x2f7   : > { %v2964_v57 = vpop.f32.mrf.mxu2  ;;  %v3801_v5 = vpack.c.b16 %v3797_v63, %v3796_v55 }
 0x2f8   : > { %v6352_v15 = vadd.f32 %v2964_v57, %v2879_v37 }
 0x2f9   : > { %v3090_v27 = vpop.f32.mrf.mxu3 }
 0x2fa   : > { %v2881_v14 = vpop.f32.mrf.mxu1  ;;  %v3107_v3 = vadd.f32 %v3090_v27, %v6352_v15 }
 0x2fb   : > { %v3647_v47 = vpop.f32.mrf.mxu0 }
 0x2ff   : > { %v2966_v6 = vpop.f32.mrf.mxu2 }
 0x300   : > { %v6364_v41 = vadd.f32 %v2966_v6, %v2881_v14 }
 0x301   : > { %v3092_v23 = vpop.f32.mrf.mxu3 }
 0x302   : > { %v2884_v4 = vpop.f32.mrf.mxu1 }
 0x304   : > { %4820 = vmatmul.msk.bf16.gmra.mxu2 %vm901_vm15, %v3938_v60 }
 0x305   : > { %4796 = vmatmul.msk.bf16.gmra.mxu1 %vm901_vm15, %v3800_v38 }
 0x307   : > { %v2969_v40 = vpop.f32.mrf.mxu2 }
 0x308   : > { %v6368_v24 = vadd.f32 %v2969_v40, %v2884_v4  ;;  %v3650_v40 = vpop.f32.mrf.mxu0 }
 0x309   : > { %v6386_v10 = vpop.f32.mrf.mxu3 }
 0x30a   : > { %v2886_v28 = vpop.f32.mrf.mxu1 }
 0x30f   : > { %v2971_v36 = vpop.f32.mrf.mxu2 }
 0x310   : > { %v6378_v37 = vadd.f32 %v2971_v36, %v2886_v28  ;;  %v4963_v28 = vunpack.c.l.bf16 %v4962_v62 }
 0x311   : > { %v6388_v19 = vpop.f32.mrf.mxu3 }
 0x312   : > { %v2889_v42 = vpop.f32.mrf.mxu1 }
 0x314   : > { %4821 = vmatmul.msk.bf16.gmra.mxu2 %vm901_vm15, %v3939_v1 }
 0x315   : > { %4797 = vmatmul.msk.bf16.gmra.mxu1 %vm901_vm15, %v3801_v5 }
 0x317   : > { %v2974_v13 = vpop.f32.mrf.mxu2 }
 0x318   : > { %v6382_v8 = vadd.f32 %v2974_v13, %v2889_v42  ;;  %v3108_v42 = vadd.f32 %v3092_v23, %v6364_v41  ;;  %v3109_v41 = vadd.f32 %v6386_v10, %v6368_v24 }
 0x319   : > { %v6390_v30 = vpop.f32.mrf.mxu3 }
 0x31a   : > { %v2891_v26 = vpop.f32.mrf.mxu1 }
 0x31f   : > { %v2976_v54 = vpop.f32.mrf.mxu2 }
 0x320   : > { %v6384_v57 = vadd.f32 %v2976_v54, %v2891_v26  ;;  %v4964_v54 = vunpack.c.h.bf16 %v4962_v62  ;;  %v3110_v62 = vadd.f32 %v6388_v19, %v6378_v37  ;;  %v4978_v37 = vld [vmem:[%s6415_s29 + $0x10] sm:$0xff]  }
 0x321   : > { %v6394_v61 = vpop.f32.mrf.mxu3 }
 0x322   : > { %v3195_v58 = vpop.f32.mrf.mxu1 }
 0x323   : > { %v3215_v38 = vadd.f32 %v3195_v58, %v3105_v31  ;;  %v3652_v58 = vpop.f32.mrf.mxu0 }
 0x327   : > { %v3397_v7 = vpop.f32.mrf.mxu2 }
 0x328   : > { %v3417_v4 = vadd.f32 %v3397_v7, %v3215_v38 }
 0x329   : > { %v3535_v9 = vpop.f32.mrf.mxu3 }
 0x32a   : > { %v3197_v22 = vpop.f32.mrf.mxu1  ;;  %v3555_v25 = vadd.f32 %v3535_v9, %v3417_v4 }
 0x32b   : > { %v3216_v50 = vadd.f32 %v3197_v22, %v3106_v56 }
 0x32c   : > { %v3665_v0 = vadd.f32 %v3645_v29, %v3555_v25  ;;  %v4977_v29 = vld [vmem:[%s6415_s29 + $0x8] sm:$0xff]  }
 0x32d   : > { %v4967_v56 = vunpack.c.l.bf16 %v4977_v29 }
 0x32f   : > { %v3399_v18 = vpop.f32.mrf.mxu2 }
 0x330   : > { %v3418_v39 = vadd.f32 %v3399_v18, %v3216_v50 }
 0x331   : > { %v3537_v60 = vpop.f32.mrf.mxu3 }
 0x332   : > { %v3200_v14 = vpop.f32.mrf.mxu1  ;;  %v3556_v45 = vadd.f32 %v3537_v60, %v3418_v39 }
 0x333   : > { %v3217_v53 = vadd.f32 %v3200_v14, %v3107_v3  ;;  %v4968_v3 = vunpack.c.h.bf16 %v4977_v29 }
 0x334   : > { %v3666_v48 = vadd.f32 %v3647_v47, %v3556_v45 }
 0x337   : > { %v3402_v20 = vpop.f32.mrf.mxu2 }
 0x338   : > { %v3419_v55 = vadd.f32 %v3402_v20, %v3217_v53 }
 0x339   : > { %v3540_v52 = vpop.f32.mrf.mxu3 }
 0x33a   : > { %v3202_v17 = vpop.f32.mrf.mxu1  ;;  %v3557_v26 = vadd.f32 %v3540_v52, %v3419_v55 }
 0x33b   : > { %v3218_v7 = vadd.f32 %v3202_v17, %v3108_v42  ;;  %v4971_v42 = vunpack.c.l.bf16 %v4978_v37 }
 0x33c   : > { %v3667_v14 = vadd.f32 %v3650_v40, %v3557_v26 }
 0x33f   : > { %v3404_v32 = vpop.f32.mrf.mxu2 }
 0x340   : > { %v3420_v20 = vadd.f32 %v3404_v32, %v3218_v7 }
 0x341   : > { %v3542_v36 = vpop.f32.mrf.mxu3 }
 0x342   : > { %v6392_v46 = vpop.f32.mrf.mxu1  ;;  %v3558_v4 = vadd.f32 %v3542_v36, %v3420_v20 }
 0x343   : > { %v3219_v25 = vadd.f32 %v6392_v46, %v3109_v41 }
 0x344   : > { %v3668_v52 = vadd.f32 %v3652_v58, %v3558_v4 }
 0x347   : > { %v6396_v33 = vpop.f32.mrf.mxu2 }
 0x349   : > { %v3545_v23 = vpop.f32.mrf.mxu3 }
 0x34a   : > { %v6398_v44 = vpop.f32.mrf.mxu1 }
 0x34f   : > { %v6400_v16 = vpop.f32.mrf.mxu2 }
 0x351   : > { %v3547_v45 = vpop.f32.mrf.mxu3 }
 0x352   : > { %v6402_v34 = vpop.f32.mrf.mxu1 }
 0x357   : > { %v6404_v6 = vpop.f32.mrf.mxu2 }
 0x35a   : > { %v6408_v59 = vpop.f32.mrf.mxu1 }
 0x35f   : > { %v6410_v2 = vpop.f32.mrf.mxu2 }
 0x362   : > { %v3847_v43 = vpop.f32.mrf.mxu1 }
 0x363   : > { %v3867_v35 = vadd.f32 %v3847_v43, %v3665_v0  ;;  %v3655_v43 = vpop.f32.mrf.mxu0  ;;  %v3421_v0 = vadd.f32 %v6396_v33, %v3219_v25 }
 0x365   : > { %v3559_v40 = vadd.f32 %v3545_v23, %v3421_v0  ;;  %v4979_v23 = vld [vmem:[%s6415_s29 + $0x18] sm:$0xff]  }
 0x366   : > { %v4975_v25 = vunpack.c.l.bf16 %v4979_v23 }
 0x367   : > { %v3985_v12 = vpop.f32.mrf.mxu2  ;;  %v3669_v53 = vadd.f32 %v3655_v43, %v3559_v40 }
 0x368   : > { %v4005_v49 = vadd.f32 %v3985_v12, %v3867_v35 }
 0x36a   : > { %v4017_v21 = vadd.f32 %v6421_v11, %v4005_v49  ;;  %v3849_v51 = vpop.f32.mrf.mxu1  ;;  %v3220_v49 = vadd.f32 %v6398_v44, %v3110_v62 }
 0x36b   : > { %v3868_v5 = vadd.f32 %v3849_v51, %v3666_v48  ;;  %v3657_v48 = vpop.f32.mrf.mxu0 }
 0x36c   : > { %v4044_v63 = vadd.f32 %v4963_v28, %v4017_v21  ;;  %v3422_v21 = vadd.f32 %v6400_v16, %v3220_v49 }
 0x36e   : > { %v4052_v1 = vmax.f32 %v4044_v63, 0.0  ;;  %v3111_v63 = vadd.f32 %v6390_v30, %v6382_v8  ;;  %v3112_v30 = vadd.f32 %v6394_v61, %v6384_v57 }
 0x36f   : > { %v3987_v13 = vpop.f32.mrf.mxu2 }
 0x370   : > { %v4060_v15 = vpack.c.bf16 %v4052_v1, %v4052_v1  ;;  %v4006_v27 = vadd.f32 %v3987_v13, %v3868_v5  ;;  %v3560_v1 = vadd.f32 %v3547_v45, %v3422_v21  ;;  %v3221_v13 = vadd.f32 %v6402_v34, %v3111_v63 }
 0x371   : > { %v3222_v29 = vadd.f32 %v6408_v59, %v3112_v30 }
 0x372   : > { %4068 = vst.msk [vmem:[%s5729_s7] sm:$0xf] %vm380_vm6, %v4060_v15  ;;  %v4018_v22 = vadd.f32 %v6421_v11, %v4006_v27  ;;  %v3852_v18 = vpop.f32.mrf.mxu1  ;;  %v3550_v15 = vpop.f32.mrf.mxu3  ;;  %v3670_v27 = vadd.f32 %v3657_v48, %v3560_v1 }
 0x373   : > { %v3869_v60 = vadd.f32 %v3852_v18, %v3667_v14  ;;  %v3424_v41 = vadd.f32 %v6410_v2, %v3222_v29 }
 0x374   : > { %v4045_v9 = vadd.f32 %v4964_v54, %v4018_v22  ;;  %v3423_v54 = vadd.f32 %v6404_v6, %v3221_v13  ;;  %v3660_v22 = vpop.f32.mrf.mxu0 }
 0x376   : > { %v4053_v31 = vmax.f32 %v4045_v9, 0.0  ;;  %v3561_v34 = vadd.f32 %v3550_v15, %v3423_v54  ;;  %v4972_v9 = vunpack.c.h.bf16 %v4978_v37 }
 0x377   : > { %v3990_v38 = vpop.f32.mrf.mxu2 }
 0x378   : > { %v4061_v47 = vpack.c.bf16 %v4053_v31, %v4053_v31  ;;  %v4007_v17 = vadd.f32 %v3990_v38, %v3869_v60  ;;  %v3671_v60 = vadd.f32 %v3660_v22, %v3561_v34 }
 0x37a   : > { %4069 = vst.msk [vmem:[%s5729_s7 + $0x4] sm:$0xf] %vm380_vm6, %v4061_v47  ;;  %v4019_v50 = vadd.f32 %v6421_v11, %v4007_v17  ;;  %v3854_v32 = vpop.f32.mrf.mxu1  ;;  %v3552_v61 = vpop.f32.mrf.mxu3 }
 0x37b   : > { %v3870_v10 = vadd.f32 %v3854_v32, %v3668_v52  ;;  %v3562_v17 = vadd.f32 %v3552_v61, %v3424_v41 }
 0x37c   : > { %v4046_v39 = vadd.f32 %v4967_v56, %v4019_v50  ;;  %v3662_v50 = vpop.f32.mrf.mxu0 }
 0x37d   : > { %v3672_v43 = vadd.f32 %v3662_v50, %v3562_v17 }
 0x37e   : > { %v4054_v24 = vmax.f32 %v4046_v39, 0.0 }
 0x37f   : > { %v3992_v35 = vpop.f32.mrf.mxu2 }
 0x380   : > { %v4062_v46 = vpack.c.bf16 %v4054_v24, %v4054_v24  ;;  %v4008_v12 = vadd.f32 %v3992_v35, %v3870_v10  ;;  %v4976_v35 = vunpack.c.h.bf16 %v4979_v23 }
 0x382   : > { %4070 = vst.msk [vmem:[%s5729_s7 + $0x8] sm:$0xf] %vm380_vm6, %v4062_v46  ;;  %v4020_v28 = vadd.f32 %v6421_v11, %v4008_v12  ;;  %v3857_v33 = vpop.f32.mrf.mxu1 }
 0x383   : > { %v3871_v55 = vadd.f32 %v3857_v33, %v3669_v53 }
 0x384   : > { %v4047_v51 = vadd.f32 %v4968_v3, %v4020_v28 }
 0x386   : > { %v4055_v19 = vmax.f32 %v4047_v51, 0.0 }
 0x387   : > { %v3995_v36 = vpop.f32.mrf.mxu2 }
 0x388   : > { %v4063_v44 = vpack.c.bf16 %v4055_v19, %v4055_v19  ;;  %v4009_v5 = vadd.f32 %v3995_v36, %v3871_v55 }
 0x38a   : > { %4071 = vst.msk [vmem:[%s5729_s7 + $0xc] sm:$0xf] %vm380_vm6, %v4063_v44  ;;  %v4021_v26 = vadd.f32 %v6421_v11, %v4009_v5  ;;  %v3859_v16 = vpop.f32.mrf.mxu1 }
 0x38b   : > { %v3872_v8 = vadd.f32 %v3859_v16, %v3670_v27 }
 0x38c   : > { %v4048_v58 = vadd.f32 %v4971_v42, %v4021_v26 }
 0x38e   : > { %v4056_v7 = vmax.f32 %v4048_v58, 0.0 }
 0x38f   : > { %v3997_v18 = vpop.f32.mrf.mxu2 }
 0x390   : > { %v4064_v14 = vpack.c.bf16 %v4056_v7, %v4056_v7  ;;  %v4010_v20 = vadd.f32 %v3997_v18, %v3872_v8 }
 0x392   : > { %4072 = vst.msk [vmem:[%s5729_s7 + $0x10] sm:$0xf] %vm380_vm6, %v4064_v14  ;;  %v4022_v6 = vadd.f32 %v6421_v11, %v4010_v20  ;;  %v3862_v31 = vpop.f32.mrf.mxu1 }
 0x393   : > { %v3873_v4 = vadd.f32 %v3862_v31, %v3671_v60 }
 0x394   : > { %v4049_v57 = vadd.f32 %v4972_v9, %v4022_v6 }
 0x396   : > { %v4057_v38 = vmax.f32 %v4049_v57, 0.0 }
 0x397   : > { %v4000_v47 = vpop.f32.mrf.mxu2 }
 0x398   : > { %v4065_v56 = vpack.c.bf16 %v4057_v38, %v4057_v38  ;;  %v4011_v59 = vadd.f32 %v4000_v47, %v3873_v4 }
 0x39a   : > { %4073 = vst.msk [vmem:[%s5729_s7 + $0x14] sm:$0xf] %vm380_vm6, %v4065_v56  ;;  %v4023_v32 = vadd.f32 %v6421_v11, %v4011_v59  ;;  %v3864_v2 = vpop.f32.mrf.mxu1 }
 0x39b   : > { %v3874_v39 = vadd.f32 %v3864_v2, %v3672_v43 }
 0x39c   : > { %v4050_v52 = vadd.f32 %v4975_v25, %v4023_v32 }
 0x39e   : > { %v4058_v0 = vmax.f32 %v4050_v52, 0.0 }
 0x39f   : > { %v4002_v24 = vpop.f32.mrf.mxu2 }
 0x3a0   : > { %v4066_v10 = vpack.c.bf16 %v4058_v0, %v4058_v0  ;;  %v4012_v62 = vadd.f32 %v4002_v24, %v3874_v39 }
 0x3a2   : > { %4074 = vst.msk [vmem:[%s5729_s7 + $0x18] sm:$0xf] %vm380_vm6, %v4066_v10  ;;  %v4024_v40 = vadd.f32 %v6421_v11, %v4012_v62 }
 0x3a4   : > { %v4051_v46 = vadd.f32 %v4976_v35, %v4024_v40 }
 0x3a6   : > { %v4059_v12 = vmax.f32 %v4051_v46, 0.0 }
 0x3a8   : > { %v4067_v3 = vpack.c.bf16 %v4059_v12, %v4059_v12 }
 0x3aa   : > { %4075 = vst.msk [vmem:[%s5729_s7 + $0x1c] sm:$0xf] %vm380_vm6, %v4067_v3 }
 0x3ab   : > { %5239 = shalt.err (!%p5236_p4)
}
 0x3ac   : > { %s5348_s5 = smov 64   ;;  %s5349_s7 = smov 4  }
 0x3ad   : > { %4998 = dma.vmem_to_hbm [thread:$0]  (%p5450_p6), %s4093_s9, 512, %s4095_s18, %s4077_s25, %s5348_s5, %s5348_s5, %s5349_s7  }
 0x3ae PF: > { %s6574_s21 = sld [smem:[#allocation13_spill]]  ;;  %p5020_p11 = scmp.ge.s32.totalorder %s5338_s28, 2 }
 0x3b0   : > { %p5012_p1 = pnand %p5020_p11, %p5456_p10 }
 0x3b2   : > { %p5013_p0 = pneg %p5012_p1 }
 0x3b4   : > { %s4109_s12 = sand.u32 1, %s6574_s21  }
 0x3b5   : > { %s4110_s24 = scalar_lea.sflag [#allocation5], %s4109_s12 }
 0x3b6   : > { %5293 = dma.done.wait (%p5013_p0), %s4110_s24, 512  }
 0x3b7   : > { %5295 = vsyncadd (%p5013_p0), %s4110_s24, 4294966784  ;;  %s22_s28 = sadd.s32 1, %s5338_s28   ;;  %s6576_s24 = sld [smem:[#allocation15_spill]] }
 0x3b8   : > { %p19_p2 = scmp.ge.s32.totalorder %s22_s28, 6   ;;  %s6577_s26 = sld [smem:[#allocation18_spill]] }
 0x3b9   : > { %s6578_s15 = sld [smem:[#allocation19_spill]]  ;;  %s6579_s18 = smov %s5302_s19 }
 0x3ba   : > { %s6580_s19 = smov %s5306_s20  ;;  %s6581_s20 = smov %s5507_s14 }
 0x3bb   : > { %s6582_s21 = smov %s5314_s22  ;;  %s6583_s22 = smov %s5318_s23 }
 0x3bc   : > { %s6584_s23 = smov %s5504_s3  ;;  %s6585_s25 = smov %s5334_s27 }
 0x3bd   :  { %21 = sbr.rel (!%p19_p2) target bundleno = 14 (0xe), region = 141 }
 0x3bf   : > { %s6586_s27 = smov %s6578_s15 }
 0x3c2   :  { %4116 = vsyncpa [#allocation4], 1 }
 0x3c3   :  { %4118 = vsyncpa [#allocation4 + $0x1], 1 }
 0x3c4   :  { %4119 = vsyncpa [#allocation7], 1 }
 0x3c5   :  { %4120 = vsyncpa [#allocation5], 1 }
 0x3c6   :  { %4122 = vsyncpa [#allocation5 + $0x1], 1 }

</bundles_post_ra>
